<compile_context>
chip_gen: v6e
topology: v6e:2x2x1
jax: 0.10.0
libtpu: 0.0.40
codegen_flags: <defaults>
</compile_context>

<pallas_src>
import functools
import math

import jax
import jax.numpy as jnp
from jax.experimental import pallas as pl
from jax.experimental.pallas import tpu as pltpu


def _erf(x):
    # Abramowitz & Stegun 7.1.26 rational approximation (|err| < 1.5e-7),
    # built only from elementwise ops that lower cleanly in Mosaic.
    a1, a2, a3, a4, a5 = (0.254829592, -0.284496736, 1.421413741,
                          -1.453152027, 1.061405429)
    p = 0.3275911
    sgn = jnp.where(x >= 0.0, 1.0, -1.0)
    ax = jnp.abs(x)
    t = 1.0 / (1.0 + p * ax)
    poly = ((((a5 * t + a4) * t + a3) * t + a2) * t + a1) * t
    return sgn * (1.0 - poly * jnp.exp(-ax * ax))


def _gelu_exact(x):
    # PyTorch nn.GELU() default (erf-based, not tanh approximation).
    return 0.5 * x * (1.0 + _erf(x * (1.0 / math.sqrt(2.0))))


def cross_transformer_kernel(
    x0_ref, x1_ref,
    wqkvT_ref, bqkv_ref,      # fused qk|v projection (D, 2D) bf16 / (1, 2D) f32 (qk half pre-scaled)
    woutT_ref, bout_ref,      # out projection        (D, D)  bf16 / (1, D)  f32
    w1T_ref, b1_ref,          # ffn linear-1          (2D,2D) bf16 / (1, 2D) f32
    ln_g_ref, ln_b_ref,       # layernorm affine      (1, 2D) f32
    w2T_ref, b2_ref,          # ffn linear-2          (2D, D) bf16 / (1, D)  f32
    o0_ref, o1_ref,
    qkv0_sc,                  # (N0, 2D) bf16 : x0's fused qk|v projection (computed once per b)
    m_sc, l_sc,               # (N0, H)  f32  : online softmax stats, 0->1 direction
    acc_sc,                   # (N0, D)  f32  : unnormalized m0 accumulator (head h at lanes h*Dh)
    m1_sc,                    # (TN1, D) f32  : this chunk's m1, head-concatenated
    *, num_heads):
    f32 = jnp.float32
    bf16 = jnp.bfloat16

    j = pl.program_id(1)
    last_j = pl.num_programs(1) - 1

    N0, two_d = qkv0_sc.shape
    D = two_d // 2
    Dh = D // num_heads

    def ffn(x_f32, m_f32):
        xm = jnp.concatenate([x_f32, m_f32], axis=-1).astype(bf16)   # (rows, 2D)
        h1 = jnp.dot(xm, w1T_ref[...], preferred_element_type=f32) + b1_ref[...]
        mu = jnp.mean(h1, axis=-1, keepdims=True)
        var = jnp.mean(jnp.square(h1 - mu), axis=-1, keepdims=True)
        hn = (h1 - mu) * jax.lax.rsqrt(var + 1e-5)
        hn = hn * ln_g_ref[...] + ln_b_ref[...]
        g = _gelu_exact(hn)
        return jnp.dot(g.astype(bf16), w2T_ref[...],
                       preferred_element_type=f32) + b2_ref[...]

    # ---- first chunk of each batch element: project x0 once, reset state ---
    @pl.when(j == 0)
    def _():
        x0b = x0_ref[0].astype(bf16)
        qkv0_sc[...] = (jnp.dot(x0b, wqkvT_ref[...],
                                preferred_element_type=f32)
                        + bqkv_ref[...]).astype(bf16)
        m_sc[...] = jnp.full(m_sc.shape, -jnp.inf, m_sc.dtype)
        l_sc[...] = jnp.zeros(l_sc.shape, l_sc.dtype)
        acc_sc[...] = jnp.zeros(acc_sc.shape, acc_sc.dtype)

    # ---- project this x1 chunk: single fused (D, 2D) matmul ----------------
    x1c = x1_ref[0]                                                  # (TN1, D) f32
    qkv1 = (jnp.dot(x1c.astype(bf16), wqkvT_ref[...],
                    preferred_element_type=f32) + bqkv_ref[...]).astype(bf16)

    dn_last = (((1,), (1,)), ((), ()))    # contract last dims:  a @ b.T
    dn_first = (((0,), (0,)), ((), ()))   # contract first dims: a.T @ b

    for h in range(num_heads):
        qs = slice(h * Dh, (h + 1) * Dh)
        vs = slice(D + h * Dh, D + (h + 1) * Dh)
        qk0h = qkv0_sc[:, qs]             # (N0, Dh)  bf16 (scale folded)
        v0h = qkv0_sc[:, vs]              # (N0, Dh)  bf16
        qk1h = qkv1[:, qs]                # (TN1, Dh) bf16
        v1h = qkv1[:, vs]                 # (TN1, Dh) bf16

        sim = jax.lax.dot_general(qk0h, qk1h, dn_last,
                                  preferred_element_type=f32)        # (N0, TN1)

        # --- 0 -> 1 : online (flash) row softmax, normalization deferred ----
        m_prev = m_sc[:, h:h + 1]                                    # (N0, 1)
        m_new = jnp.maximum(m_prev, jnp.max(sim, axis=-1, keepdims=True))
        alpha = jnp.exp(m_prev - m_new)
        p01 = jnp.exp(sim - m_new)        # unnormalized, <= 1 -> bf16-safe
        l_sc[:, h:h + 1] = alpha * l_sc[:, h:h + 1] + jnp.sum(
            p01, axis=-1, keepdims=True)
        acc_sc[:, qs] = alpha * acc_sc[:, qs] + jnp.dot(
            p01.astype(bf16), v1h, preferred_element_type=f32)
        m_sc[:, h:h + 1] = m_new

        # --- 1 -> 0 : column softmax of the SAME sim, exact in this chunk ---
        m10 = jnp.max(sim, axis=0, keepdims=True)                    # (1, TN1)
        p10 = jnp.exp(sim - m10)
        r10 = pl.reciprocal(jnp.sum(p10, axis=0, keepdims=True), approx=True)
        p10 = (p10 * r10).astype(bf16)
        m1_sc[:, qs] = jax.lax.dot_general(p10, v0h, dn_first,
                                           preferred_element_type=f32)  # (TN1, Dh)

    # ---- finish this x1 chunk: out-projection + FFN + residual -------------
    m1 = jnp.dot(m1_sc[...].astype(bf16), woutT_ref[...],
                 preferred_element_type=f32) + bout_ref[...]
    o1_ref[0] = (x1c + ffn(x1c, m1)).astype(o1_ref.dtype)

    # ---- last chunk: finalize the x0 side -----------------------------------
    @pl.when(j == last_j)
    def _():
        for h in range(num_heads):
            qs = slice(h * Dh, (h + 1) * Dh)
            acc_sc[:, qs] = acc_sc[:, qs] * pl.reciprocal(
                l_sc[:, h:h + 1], approx=True)
        x0 = x0_ref[0]
        m0 = jnp.dot(acc_sc[...].astype(bf16), woutT_ref[...],
                     preferred_element_type=f32) + bout_ref[...]
        o0_ref[0] = (x0 + ffn(x0, m0)).astype(o0_ref.dtype)


def _pick_chunk(n1):
    if n1 <= 512:
        return n1
    for c in (512, 256, 128, 64, 32, 16, 8):
        if n1 % c == 0:
            return c
    return n1


def cross_transformer(x0, x1, params, num_heads, *, tn1=None):
    B, N0, D = x0.shape
    _, N1, _ = x1.shape
    H = num_heads
    Dh = D // H
    s = (Dh ** -0.5) ** 0.5

    if tn1 is None:
        tn1 = _pick_chunk(N1)
    assert N1 % tn1 == 0, "N1 must be a multiple of the chunk size"
    nc = N1 // tn1

    (wqk, bqk, wv, bv, wout, bout, w1, b1, ln_g, ln_b, w2, b2) = params
    bf16, f32 = jnp.bfloat16, jnp.float32

    # Glue: fuse qk|v into one (D, 2D) weight, fold sqrt(scale) into the qk
    # half (weight AND bias), pre-transpose, cast matmul weights to bf16.
    # Biases / layernorm affines stay f32 (added to f32 accumulators).
    wqkvT = jnp.concatenate([wqk.T * s, wv.T], axis=1).astype(bf16)   # (D, 2D)
    bqkv = jnp.concatenate([bqk * s, bv]).reshape(1, 2 * D).astype(f32)
    woutT = wout.T.astype(bf16)                                        # (D, D)
    bout2 = bout.reshape(1, D).astype(f32)
    w1T = w1.T.astype(bf16)                                            # (2D, 2D)
    b1_2 = b1.reshape(1, 2 * D).astype(f32)
    g2 = ln_g.reshape(1, 2 * D).astype(f32)
    beta2 = ln_b.reshape(1, 2 * D).astype(f32)
    w2T = w2.T.astype(bf16)                                            # (2D, D)
    b2_2 = b2.reshape(1, D).astype(f32)

    full = lambda a: pl.BlockSpec(a.shape, lambda b, j: (0, 0))

    kernel = functools.partial(cross_transformer_kernel, num_heads=H)

    out0, out1 = pl.pallas_call(
        kernel,
        grid=(B, nc),
        in_specs=[
            pl.BlockSpec((1, N0, D), lambda b, j: (b, 0, 0)),
            pl.BlockSpec((1, tn1, D), lambda b, j: (b, j, 0)),
            full(wqkvT), full(bqkv),
            full(woutT), full(bout2),
            full(w1T), full(b1_2),
            full(g2), full(beta2),
            full(w2T), full(b2_2),
        ],
        out_specs=(
            pl.BlockSpec((1, N0, D), lambda b, j: (b, 0, 0)),   # resident across chunks
            pl.BlockSpec((1, tn1, D), lambda b, j: (b, j, 0)),
        ),
        out_shape=(
            jax.ShapeDtypeStruct((B, N0, D), x0.dtype),
            jax.ShapeDtypeStruct((B, N1, D), x1.dtype),
        ),
        scratch_shapes=[
            pltpu.VMEM((N0, 2 * D), bf16),   # qkv0
            pltpu.VMEM((N0, H), f32),        # m (running row max, per head)
            pltpu.VMEM((N0, H), f32),        # l (running row sum, per head)
            pltpu.VMEM((N0, D), f32),        # acc (unnormalized m0)
            pltpu.VMEM((tn1, D), f32),       # m1 (per chunk)
        ],
        compiler_params=pltpu.CompilerParams(
            dimension_semantics=("parallel", "arbitrary"),
            vmem_limit_bytes=48 * 1024 * 1024),
    )(x0, x1, wqkvT, bqkv, woutT, bout2, w1T, b1_2, g2, beta2, w2T, b2_2)
    return out0, out1


def cross_transformer_ref(x0, x1, params, num_heads):
    """Pure-JAX f32 reference mirroring the PyTorch module."""
    wqk, bqk, wv, bv, wout, bout, w1, b1, ln_g, ln_b, w2, b2 = params
    B, N0, D = x0.shape
    H = num_heads
    Dh = D // H
    scale = Dh ** -0.5

    def heads(t):
        return t.reshape(t.shape[0], t.shape[1], H, Dh).transpose(0, 2, 1, 3)

    def unheads(t):
        return t.transpose(0, 2, 1, 3).reshape(t.shape[0], t.shape[2], D)

    qk0 = heads(x0 @ wqk.T + bqk) * scale ** 0.5
    qk1 = heads(x1 @ wqk.T + bqk) * scale ** 0.5
    v0 = heads(x0 @ wv.T + bv)
    v1 = heads(x1 @ wv.T + bv)
    sim = jnp.einsum('bhid,bhjd->bhij', qk0, qk1)
    attn01 = jax.nn.softmax(sim, axis=-1)
    attn10 = jax.nn.softmax(sim.transpose(0, 1, 3, 2), axis=-1)
    m0 = jnp.einsum('bhij,bhjd->bhid', attn01, v1)
    m1 = jnp.einsum('bhji,bhjd->bhid', attn10.transpose(0, 1, 3, 2), v0)
    m0 = unheads(m0) @ wout.T + bout
    m1 = unheads(m1) @ wout.T + bout

    def ffn(x, m):
        h = jnp.concatenate([x, m], -1) @ w1.T + b1
        mu = h.mean(-1, keepdims=True)
        var = ((h - mu) ** 2).mean(-1, keepdims=True)
        hn = (h - mu) / jnp.sqrt(var + 1e-5) * ln_g + ln_b
        g = 0.5 * hn * (1.0 + jax.scipy.special.erf(hn / jnp.sqrt(2.0)))
        return g @ w2.T + b2

    return x0 + ffn(x0, m0), x1 + ffn(x1, m1)


if __name__ == "__main__":
    # Lane-dense demo config: embed_dim = 128 (one full lane group),
    # num_heads = 4 (dim_head = 32), token counts are multiples of 8.
    # N1 = 64 with tn1 = 32 exercises the multi-chunk online-softmax path.
    D, H = 128, 4
    B, N0, N1 = 2, 32, 64

    key = jax.random.PRNGKey(0)
    keys = jax.random.split(key, 12)

    def linear_init(kw, kb, out_f, in_f):
        # PyTorch nn.Linear default: U(-1/sqrt(in), 1/sqrt(in))
        bound = 1.0 / math.sqrt(in_f)
        w = jax.random.uniform(kw, (out_f, in_f), jnp.float32, -bound, bound)
        b = jax.random.uniform(kb, (out_f,), jnp.float32, -bound, bound)
        return w, b

    wqk, bqk = linear_init(keys[0], keys[1], D, D)          # to_qk
    wv, bv = linear_init(keys[2], keys[3], D, D)            # to_v
    wout, bout = linear_init(keys[4], keys[5], D, D)        # to_out
    w1, b1 = linear_init(keys[6], keys[7], 2 * D, 2 * D)    # ffn[0]
    w2, b2 = linear_init(keys[8], keys[9], D, 2 * D)        # ffn[3]
    ln_g = jnp.ones((2 * D,), jnp.float32)                  # ffn[1] LayerNorm
    ln_b = jnp.zeros((2 * D,), jnp.float32)

    x0 = jax.random.normal(keys[10], (B, N0, D), jnp.float32)
    x1 = jax.random.normal(keys[11], (B, N1, D), jnp.float32)

    params = (wqk, bqk, wv, bv, wout, bout, w1, b1, ln_g, ln_b, w2, b2)
    o0, o1 = cross_transformer(x0, x1, params, H, tn1=32)
    jax.block_until_ready((o0, o1))
    assert o0.shape == (B, N0, D) and o1.shape == (B, N1, D)

    # Loose sanity check vs f32 reference (kernel uses bf16 MXU operands).
    r0, r1 = cross_transformer_ref(x0, x1, params, H)
    err = max(float(jnp.max(jnp.abs(o0 - r0))), float(jnp.max(jnp.abs(o1 - r1))))
    assert err < 8e-2, f"max abs err {err}"

    print("KERNEL_OK")
</pallas_src>

<mosaic_0001>
module attributes {stable_mosaic.version = 11 : i64} {
  func.func @cross_transformer_kernel(%arg0: i32, %arg1: i32, %arg2: memref<1x32x128xf32, #tpu.memory_space<vmem>>, %arg3: memref<1x32x128xf32, #tpu.memory_space<vmem>>, %arg4: memref<128x256xbf16, #tpu.memory_space<vmem>>, %arg5: memref<1x256xf32, #tpu.memory_space<vmem>>, %arg6: memref<128x128xbf16, #tpu.memory_space<vmem>>, %arg7: memref<1x128xf32, #tpu.memory_space<vmem>>, %arg8: memref<256x256xbf16, #tpu.memory_space<vmem>>, %arg9: memref<1x256xf32, #tpu.memory_space<vmem>>, %arg10: memref<1x256xf32, #tpu.memory_space<vmem>>, %arg11: memref<1x256xf32, #tpu.memory_space<vmem>>, %arg12: memref<256x128xbf16, #tpu.memory_space<vmem>>, %arg13: memref<1x128xf32, #tpu.memory_space<vmem>>, %arg14: memref<1x32x128xf32, #tpu.memory_space<vmem>>, %arg15: memref<1x32x128xf32, #tpu.memory_space<vmem>>, %arg16: memref<32x256xbf16, #tpu.memory_space<vmem>>, %arg17: memref<32x4xf32, #tpu.memory_space<vmem>>, %arg18: memref<32x4xf32, #tpu.memory_space<vmem>>, %arg19: memref<32x128xf32, #tpu.memory_space<vmem>>, %arg20: memref<32x128xf32, #tpu.memory_space<vmem>>) attributes {dimension_semantics = [#tpu.dimension_semantics<parallel>, #tpu.dimension_semantics<arbitrary>], iteration_bounds = array<i64: 2, 2>, scalar_prefetch = 0 : i64, scratch_operands = 5 : i64, tpu.core_type = #tpu.core_type<tc>, window_params = [{transform_indices = @transform_0, window_bounds = array<i64: 1, 32, 128>}, {transform_indices = @transform_1, window_bounds = array<i64: 1, 32, 128>}, {pipeline_mode = #tpu.pipeline_mode<synchronous>, transform_indices = @transform_2, window_bounds = array<i64: 128, 256>}, {pipeline_mode = #tpu.pipeline_mode<synchronous>, transform_indices = @transform_3, window_bounds = array<i64: 1, 256>}, {pipeline_mode = #tpu.pipeline_mode<synchronous>, transform_indices = @transform_4, window_bounds = array<i64: 128, 128>}, {pipeline_mode = #tpu.pipeline_mode<synchronous>, transform_indices = @transform_5, window_bounds = array<i64: 1, 128>}, {pipeline_mode = #tpu.pipeline_mode<synchronous>, transform_indices = @transform_6, window_bounds = array<i64: 256, 256>}, {pipeline_mode = #tpu.pipeline_mode<synchronous>, transform_indices = @transform_7, window_bounds = array<i64: 1, 256>}, {pipeline_mode = #tpu.pipeline_mode<synchronous>, transform_indices = @transform_8, window_bounds = array<i64: 1, 256>}, {pipeline_mode = #tpu.pipeline_mode<synchronous>, transform_indices = @transform_9, window_bounds = array<i64: 1, 256>}, {pipeline_mode = #tpu.pipeline_mode<synchronous>, transform_indices = @transform_10, window_bounds = array<i64: 256, 128>}, {pipeline_mode = #tpu.pipeline_mode<synchronous>, transform_indices = @transform_11, window_bounds = array<i64: 1, 128>}, {transform_indices = @transform_12, window_bounds = array<i64: 1, 32, 128>}, {transform_indices = @transform_13, window_bounds = array<i64: 1, 32, 128>}]} {
    %c0_i32 = arith.constant 0 : i32
    %0 = arith.cmpi eq, %arg1, %c0_i32 : i32
    %1 = arith.extui %0 : i1 to i32
    %c0_i32_0 = arith.constant 0 : i32
    %2 = arith.cmpi ne, %1, %c0_i32_0 : i32
    scf.if %2 {
      %c0_143 = arith.constant 0 : index
      %c0_144 = arith.constant 0 : index
      %c0_145 = arith.constant 0 : index
      %268 = vector.load %arg2[%c0_143, %c0_144, %c0_145] : memref<1x32x128xf32, #tpu.memory_space<vmem>>, vector<1x32x128xf32>
      %269 = vector.shape_cast %268 : vector<1x32x128xf32> to vector<32x128xf32>
      %270 = arith.truncf %269 : vector<32x128xf32> to vector<32x128xbf16>
      %c0_146 = arith.constant 0 : index
      %c0_147 = arith.constant 0 : index
      %271 = vector.load %arg4[%c0_146, %c0_147] : memref<128x256xbf16, #tpu.memory_space<vmem>>, vector<128x256xbf16>
      %cst_148 = arith.constant dense<0.000000e+00> : vector<32x256xf32>
      %272 = tpu.matmul %270, %271, %cst_148 {dimension_numbers = #tpu.dot_dimension_numbers<[1], [0], [0], [1], [0, 0, 1, 1], [], []>} : vector<32x128xbf16>, vector<128x256xbf16>, vector<32x256xf32> -> vector<32x256xf32>
      %c0_149 = arith.constant 0 : index
      %c0_150 = arith.constant 0 : index
      %273 = vector.load %arg5[%c0_149, %c0_150] : memref<1x256xf32, #tpu.memory_space<vmem>>, vector<1x256xf32>
      %274 = vector.broadcast %273 : vector<1x256xf32> to vector<32x256xf32>
      %275 = arith.addf %272, %274 : vector<32x256xf32>
      %276 = arith.truncf %275 : vector<32x256xf32> to vector<32x256xbf16>
      %c0_151 = arith.constant 0 : index
      %c0_152 = arith.constant 0 : index
      %277 = vector.load %arg16[%c0_151, %c0_152] : memref<32x256xbf16, #tpu.memory_space<vmem>>, vector<32x256xbf16>
      tpu.vector_store %arg16[%c0_151, %c0_152], %276 {strides = array<i32>} : memref<32x256xbf16, #tpu.memory_space<vmem>>, vector<32x256xbf16>,
      %cst_153 = arith.constant 0xFF800000 : f32
      %278 = vector.broadcast %cst_153 : f32 to vector<32x4xf32>
      %c0_154 = arith.constant 0 : index
      %c0_155 = arith.constant 0 : index
      %279 = vector.load %arg17[%c0_154, %c0_155] : memref<32x4xf32, #tpu.memory_space<vmem>>, vector<32x4xf32>
      tpu.vector_store %arg17[%c0_154, %c0_155], %278 {strides = array<i32>} : memref<32x4xf32, #tpu.memory_space<vmem>>, vector<32x4xf32>,
      %cst_156 = arith.constant 0.000000e+00 : f32
      %280 = vector.broadcast %cst_156 : f32 to vector<32x4xf32>
      %c0_157 = arith.constant 0 : index
      %c0_158 = arith.constant 0 : index
      %281 = vector.load %arg18[%c0_157, %c0_158] : memref<32x4xf32, #tpu.memory_space<vmem>>, vector<32x4xf32>
      tpu.vector_store %arg18[%c0_157, %c0_158], %280 {strides = array<i32>} : memref<32x4xf32, #tpu.memory_space<vmem>>, vector<32x4xf32>,
      %cst_159 = arith.constant 0.000000e+00 : f32
      %282 = vector.broadcast %cst_159 : f32 to vector<32x128xf32>
      %c0_160 = arith.constant 0 : index
      %c0_161 = arith.constant 0 : index
      %283 = vector.load %arg19[%c0_160, %c0_161] : memref<32x128xf32, #tpu.memory_space<vmem>>, vector<32x128xf32>
      tpu.vector_store %arg19[%c0_160, %c0_161], %282 {strides = array<i32>} : memref<32x128xf32, #tpu.memory_space<vmem>>, vector<32x128xf32>,
    } else {
    }
    %c0 = arith.constant 0 : index
    %c0_1 = arith.constant 0 : index
    %c0_2 = arith.constant 0 : index
    %3 = vector.load %arg3[%c0, %c0_1, %c0_2] : memref<1x32x128xf32, #tpu.memory_space<vmem>>, vector<1x32x128xf32>
    %4 = vector.shape_cast %3 : vector<1x32x128xf32> to vector<32x128xf32>
    %5 = arith.truncf %4 : vector<32x128xf32> to vector<32x128xbf16>
    %c0_3 = arith.constant 0 : index
    %c0_4 = arith.constant 0 : index
    %6 = vector.load %arg4[%c0_3, %c0_4] : memref<128x256xbf16, #tpu.memory_space<vmem>>, vector<128x256xbf16>
    %cst = arith.constant dense<0.000000e+00> : vector<32x256xf32>
    %7 = tpu.matmul %5, %6, %cst {dimension_numbers = #tpu.dot_dimension_numbers<[1], [0], [0], [1], [0, 0, 1, 1], [], []>} : vector<32x128xbf16>, vector<128x256xbf16>, vector<32x256xf32> -> vector<32x256xf32>
    %c0_5 = arith.constant 0 : index
    %c0_6 = arith.constant 0 : index
    %8 = vector.load %arg5[%c0_5, %c0_6] : memref<1x256xf32, #tpu.memory_space<vmem>>, vector<1x256xf32>
    %9 = vector.broadcast %8 : vector<1x256xf32> to vector<32x256xf32>
    %10 = arith.addf %7, %9 : vector<32x256xf32>
    %11 = arith.truncf %10 : vector<32x256xf32> to vector<32x256xbf16>
    %c0_7 = arith.constant 0 : index
    %c0_8 = arith.constant 0 : index
    %12 = vector.load %arg16[%c0_7, %c0_8] : memref<32x256xbf16, #tpu.memory_space<vmem>>, vector<32x32xbf16>
    %c0_9 = arith.constant 0 : index
    %c128 = arith.constant 128 : index
    %13 = vector.load %arg16[%c0_9, %c128] : memref<32x256xbf16, #tpu.memory_space<vmem>>, vector<32x32xbf16>
    %14 = vector.extract_strided_slice %11 {offsets = [0, 0], sizes = [32, 32], strides = [1, 1]} : vector<32x256xbf16> to vector<32x32xbf16>
    %15 = vector.extract_strided_slice %11 {offsets = [0, 128], sizes = [32, 32], strides = [1, 1]} : vector<32x256xbf16> to vector<32x32xbf16>
    %cst_10 = arith.constant dense<0.000000e+00> : vector<32x32xf32>
    %16 = tpu.matmul %12, %14, %cst_10 {dimension_numbers = #tpu.dot_dimension_numbers<[1], [1], [0], [0], [0, 0, 1, 0], [], []>} : vector<32x32xbf16>, vector<32x32xbf16>, vector<32x32xf32> -> vector<32x32xf32>
    %c0_11 = arith.constant 0 : index
    %c0_12 = arith.constant 0 : index
    %17 = vector.load %arg17[%c0_11, %c0_12] : memref<32x4xf32, #tpu.memory_space<vmem>>, vector<32x1xf32>
    %cst_13 = arith.constant dense<0xFF800000> : vector<32xf32>
    %18 = vector.multi_reduction <maximumf>, %16, %cst_13 [1] : vector<32x32xf32> to vector<32xf32>
    %19 = vector.shape_cast %18 : vector<32xf32> to vector<32x1xf32>
    %20 = arith.maximumf %17, %19 : vector<32x1xf32>
    %21 = arith.subf %17, %20 : vector<32x1xf32>
    %22 = math.exp %21 : vector<32x1xf32>
    %23 = vector.broadcast %20 : vector<32x1xf32> to vector<32x32xf32>
    %24 = arith.subf %16, %23 : vector<32x32xf32>
    %25 = math.exp %24 : vector<32x32xf32>
    %c0_14 = arith.constant 0 : index
    %c0_15 = arith.constant 0 : index
    %26 = vector.load %arg18[%c0_14, %c0_15] : memref<32x4xf32, #tpu.memory_space<vmem>>, vector<32x1xf32>
    %27 = arith.mulf %22, %26 : vector<32x1xf32>
    %cst_16 = arith.constant dense<0.000000e+00> : vector<32xf32>
    %28 = vector.multi_reduction <add>, %25, %cst_16 [1] : vector<32x32xf32> to vector<32xf32>
    %29 = vector.shape_cast %28 : vector<32xf32> to vector<32x1xf32>
    %30 = arith.addf %27, %29 : vector<32x1xf32>
    %c0_17 = arith.constant 0 : index
    %c0_18 = arith.constant 0 : index
    %31 = vector.load %arg18[%c0_17, %c0_18] : memref<32x4xf32, #tpu.memory_space<vmem>>, vector<32x1xf32>
    tpu.vector_store %arg18[%c0_17, %c0_18], %30 {strides = array<i32>} : memref<32x4xf32, #tpu.memory_space<vmem>>, vector<32x1xf32>,
    %c0_19 = arith.constant 0 : index
    %c0_20 = arith.constant 0 : index
    %32 = vector.load %arg19[%c0_19, %c0_20] : memref<32x128xf32, #tpu.memory_space<vmem>>, vector<32x32xf32>
    %33 = vector.broadcast %22 : vector<32x1xf32> to vector<32x32xf32>
    %34 = arith.mulf %33, %32 : vector<32x32xf32>
    %35 = arith.truncf %25 : vector<32x32xf32> to vector<32x32xbf16>
    %cst_21 = arith.constant dense<0.000000e+00> : vector<32x32xf32>
    %36 = tpu.matmul %35, %15, %cst_21 {dimension_numbers = #tpu.dot_dimension_numbers<[1], [0], [0], [1], [0, 0, 1, 1], [], []>} : vector<32x32xbf16>, vector<32x32xbf16>, vector<32x32xf32> -> vector<32x32xf32>
    %37 = arith.addf %34, %36 : vector<32x32xf32>
    %c0_22 = arith.constant 0 : index
    %c0_23 = arith.constant 0 : index
    %38 = vector.load %arg19[%c0_22, %c0_23] : memref<32x128xf32, #tpu.memory_space<vmem>>, vector<32x32xf32>
    tpu.vector_store %arg19[%c0_22, %c0_23], %37 {strides = array<i32>} : memref<32x128xf32, #tpu.memory_space<vmem>>, vector<32x32xf32>,
    %c0_24 = arith.constant 0 : index
    %c0_25 = arith.constant 0 : index
    %39 = vector.load %arg17[%c0_24, %c0_25] : memref<32x4xf32, #tpu.memory_space<vmem>>, vector<32x1xf32>
    tpu.vector_store %arg17[%c0_24, %c0_25], %20 {strides = array<i32>} : memref<32x4xf32, #tpu.memory_space<vmem>>, vector<32x1xf32>,
    %cst_26 = arith.constant dense<0xFF800000> : vector<32xf32>
    %40 = vector.multi_reduction <maximumf>, %16, %cst_26 [0] : vector<32x32xf32> to vector<32xf32>
    %41 = vector.shape_cast %40 : vector<32xf32> to vector<1x32xf32>
    %42 = vector.broadcast %41 : vector<1x32xf32> to vector<32x32xf32>
    %43 = arith.subf %16, %42 : vector<32x32xf32>
    %44 = math.exp %43 : vector<32x32xf32>
    %cst_27 = arith.constant dense<0.000000e+00> : vector<32xf32>
    %45 = vector.multi_reduction <add>, %44, %cst_27 [0] : vector<32x32xf32> to vector<32xf32>
    %46 = vector.shape_cast %45 : vector<32xf32> to vector<1x32xf32>
    %47 = tpu.reciprocal %46 {approx = true} : vector<1x32xf32> -> vector<1x32xf32>
    %48 = vector.broadcast %47 : vector<1x32xf32> to vector<32x32xf32>
    %49 = arith.mulf %44, %48 : vector<32x32xf32>
    %50 = arith.truncf %49 : vector<32x32xf32> to vector<32x32xbf16>
    %cst_28 = arith.constant dense<0.000000e+00> : vector<32x32xf32>
    %51 = tpu.matmul %50, %13, %cst_28 {dimension_numbers = #tpu.dot_dimension_numbers<[0], [0], [1], [1], [0, 1, 1, 1], [], []>} : vector<32x32xbf16>, vector<32x32xbf16>, vector<32x32xf32> -> vector<32x32xf32>
    %c0_29 = arith.constant 0 : index
    %c0_30 = arith.constant 0 : index
    %52 = vector.load %arg20[%c0_29, %c0_30] : memref<32x128xf32, #tpu.memory_space<vmem>>, vector<32x32xf32>
    tpu.vector_store %arg20[%c0_29, %c0_30], %51 {strides = array<i32>} : memref<32x128xf32, #tpu.memory_space<vmem>>, vector<32x32xf32>,
    %c0_31 = arith.constant 0 : index
    %c32 = arith.constant 32 : index
    %53 = vector.load %arg16[%c0_31, %c32] : memref<32x256xbf16, #tpu.memory_space<vmem>>, vector<32x32xbf16>
    %c0_32 = arith.constant 0 : index
    %c160 = arith.constant 160 : index
    %54 = vector.load %arg16[%c0_32, %c160] : memref<32x256xbf16, #tpu.memory_space<vmem>>, vector<32x32xbf16>
    %55 = vector.extract_strided_slice %11 {offsets = [0, 32], sizes = [32, 32], strides = [1, 1]} : vector<32x256xbf16> to vector<32x32xbf16>
    %56 = vector.extract_strided_slice %11 {offsets = [0, 160], sizes = [32, 32], strides = [1, 1]} : vector<32x256xbf16> to vector<32x32xbf16>
    %cst_33 = arith.constant dense<0.000000e+00> : vector<32x32xf32>
    %57 = tpu.matmul %53, %55, %cst_33 {dimension_numbers = #tpu.dot_dimension_numbers<[1], [1], [0], [0], [0, 0, 1, 0], [], []>} : vector<32x32xbf16>, vector<32x32xbf16>, vector<32x32xf32> -> vector<32x32xf32>
    %c0_34 = arith.constant 0 : index
    %c1 = arith.constant 1 : index
    %58 = vector.load %arg17[%c0_34, %c1] : memref<32x4xf32, #tpu.memory_space<vmem>>, vector<32x1xf32>
    %cst_35 = arith.constant dense<0xFF800000> : vector<32xf32>
    %59 = vector.multi_reduction <maximumf>, %57, %cst_35 [1] : vector<32x32xf32> to vector<32xf32>
    %60 = vector.shape_cast %59 : vector<32xf32> to vector<32x1xf32>
    %61 = arith.maximumf %58, %60 : vector<32x1xf32>
    %62 = arith.subf %58, %61 : vector<32x1xf32>
    %63 = math.exp %62 : vector<32x1xf32>
    %64 = vector.broadcast %61 : vector<32x1xf32> to vector<32x32xf32>
    %65 = arith.subf %57, %64 : vector<32x32xf32>
    %66 = math.exp %65 : vector<32x32xf32>
    %c0_36 = arith.constant 0 : index
    %c1_37 = arith.constant 1 : index
    %67 = vector.load %arg18[%c0_36, %c1_37] : memref<32x4xf32, #tpu.memory_space<vmem>>, vector<32x1xf32>
    %68 = arith.mulf %63, %67 : vector<32x1xf32>
    %cst_38 = arith.constant dense<0.000000e+00> : vector<32xf32>
    %69 = vector.multi_reduction <add>, %66, %cst_38 [1] : vector<32x32xf32> to vector<32xf32>
    %70 = vector.shape_cast %69 : vector<32xf32> to vector<32x1xf32>
    %71 = arith.addf %68, %70 : vector<32x1xf32>
    %c0_39 = arith.constant 0 : index
    %c1_40 = arith.constant 1 : index
    %72 = vector.load %arg18[%c0_39, %c1_40] : memref<32x4xf32, #tpu.memory_space<vmem>>, vector<32x1xf32>
    tpu.vector_store %arg18[%c0_39, %c1_40], %71 {strides = array<i32>} : memref<32x4xf32, #tpu.memory_space<vmem>>, vector<32x1xf32>,
    %c0_41 = arith.constant 0 : index
    %c32_42 = arith.constant 32 : index
    %73 = vector.load %arg19[%c0_41, %c32_42] : memref<32x128xf32, #tpu.memory_space<vmem>>, vector<32x32xf32>
    %74 = vector.broadcast %63 : vector<32x1xf32> to vector<32x32xf32>
    %75 = arith.mulf %74, %73 : vector<32x32xf32>
    %76 = arith.truncf %66 : vector<32x32xf32> to vector<32x32xbf16>
    %cst_43 = arith.constant dense<0.000000e+00> : vector<32x32xf32>
    %77 = tpu.matmul %76, %56, %cst_43 {dimension_numbers = #tpu.dot_dimension_numbers<[1], [0], [0], [1], [0, 0, 1, 1], [], []>} : vector<32x32xbf16>, vector<32x32xbf16>, vector<32x32xf32> -> vector<32x32xf32>
    %78 = arith.addf %75, %77 : vector<32x32xf32>
    %c0_44 = arith.constant 0 : index
    %c32_45 = arith.constant 32 : index
    %79 = vector.load %arg19[%c0_44, %c32_45] : memref<32x128xf32, #tpu.memory_space<vmem>>, vector<32x32xf32>
    tpu.vector_store %arg19[%c0_44, %c32_45], %78 {strides = array<i32>} : memref<32x128xf32, #tpu.memory_space<vmem>>, vector<32x32xf32>,
    %c0_46 = arith.constant 0 : index
    %c1_47 = arith.constant 1 : index
    %80 = vector.load %arg17[%c0_46, %c1_47] : memref<32x4xf32, #tpu.memory_space<vmem>>, vector<32x1xf32>
    tpu.vector_store %arg17[%c0_46, %c1_47], %61 {strides = array<i32>} : memref<32x4xf32, #tpu.memory_space<vmem>>, vector<32x1xf32>,
    %cst_48 = arith.constant dense<0xFF800000> : vector<32xf32>
    %81 = vector.multi_reduction <maximumf>, %57, %cst_48 [0] : vector<32x32xf32> to vector<32xf32>
    %82 = vector.shape_cast %81 : vector<32xf32> to vector<1x32xf32>
    %83 = vector.broadcast %82 : vector<1x32xf32> to vector<32x32xf32>
    %84 = arith.subf %57, %83 : vector<32x32xf32>
    %85 = math.exp %84 : vector<32x32xf32>
    %cst_49 = arith.constant dense<0.000000e+00> : vector<32xf32>
    %86 = vector.multi_reduction <add>, %85, %cst_49 [0] : vector<32x32xf32> to vector<32xf32>
    %87 = vector.shape_cast %86 : vector<32xf32> to vector<1x32xf32>
    %88 = tpu.reciprocal %87 {approx = true} : vector<1x32xf32> -> vector<1x32xf32>
    %89 = vector.broadcast %88 : vector<1x32xf32> to vector<32x32xf32>
    %90 = arith.mulf %85, %89 : vector<32x32xf32>
    %91 = arith.truncf %90 : vector<32x32xf32> to vector<32x32xbf16>
    %cst_50 = arith.constant dense<0.000000e+00> : vector<32x32xf32>
    %92 = tpu.matmul %91, %54, %cst_50 {dimension_numbers = #tpu.dot_dimension_numbers<[0], [0], [1], [1], [0, 1, 1, 1], [], []>} : vector<32x32xbf16>, vector<32x32xbf16>, vector<32x32xf32> -> vector<32x32xf32>
    %c0_51 = arith.constant 0 : index
    %c32_52 = arith.constant 32 : index
    %93 = vector.load %arg20[%c0_51, %c32_52] : memref<32x128xf32, #tpu.memory_space<vmem>>, vector<32x32xf32>
    tpu.vector_store %arg20[%c0_51, %c32_52], %92 {strides = array<i32>} : memref<32x128xf32, #tpu.memory_space<vmem>>, vector<32x32xf32>,
    %c0_53 = arith.constant 0 : index
    %c64 = arith.constant 64 : index
    %94 = vector.load %arg16[%c0_53, %c64] : memref<32x256xbf16, #tpu.memory_space<vmem>>, vector<32x32xbf16>
    %c0_54 = arith.constant 0 : index
    %c192 = arith.constant 192 : index
    %95 = vector.load %arg16[%c0_54, %c192] : memref<32x256xbf16, #tpu.memory_space<vmem>>, vector<32x32xbf16>
    %96 = vector.extract_strided_slice %11 {offsets = [0, 64], sizes = [32, 32], strides = [1, 1]} : vector<32x256xbf16> to vector<32x32xbf16>
    %97 = vector.extract_strided_slice %11 {offsets = [0, 192], sizes = [32, 32], strides = [1, 1]} : vector<32x256xbf16> to vector<32x32xbf16>
    %cst_55 = arith.constant dense<0.000000e+00> : vector<32x32xf32>
    %98 = tpu.matmul %94, %96, %cst_55 {dimension_numbers = #tpu.dot_dimension_numbers<[1], [1], [0], [0], [0, 0, 1, 0], [], []>} : vector<32x32xbf16>, vector<32x32xbf16>, vector<32x32xf32> -> vector<32x32xf32>
    %c0_56 = arith.constant 0 : index
    %c2 = arith.constant 2 : index
    %99 = vector.load %arg17[%c0_56, %c2] : memref<32x4xf32, #tpu.memory_space<vmem>>, vector<32x1xf32>
    %cst_57 = arith.constant dense<0xFF800000> : vector<32xf32>
    %100 = vector.multi_reduction <maximumf>, %98, %cst_57 [1] : vector<32x32xf32> to vector<32xf32>
    %101 = vector.shape_cast %100 : vector<32xf32> to vector<32x1xf32>
    %102 = arith.maximumf %99, %101 : vector<32x1xf32>
    %103 = arith.subf %99, %102 : vector<32x1xf32>
    %104 = math.exp %103 : vector<32x1xf32>
    %105 = vector.broadcast %102 : vector<32x1xf32> to vector<32x32xf32>
    %106 = arith.subf %98, %105 : vector<32x32xf32>
    %107 = math.exp %106 : vector<32x32xf32>
    %c0_58 = arith.constant 0 : index
    %c2_59 = arith.constant 2 : index
    %108 = vector.load %arg18[%c0_58, %c2_59] : memref<32x4xf32, #tpu.memory_space<vmem>>, vector<32x1xf32>
    %109 = arith.mulf %104, %108 : vector<32x1xf32>
    %cst_60 = arith.constant dense<0.000000e+00> : vector<32xf32>
    %110 = vector.multi_reduction <add>, %107, %cst_60 [1] : vector<32x32xf32> to vector<32xf32>
    %111 = vector.shape_cast %110 : vector<32xf32> to vector<32x1xf32>
    %112 = arith.addf %109, %111 : vector<32x1xf32>
    %c0_61 = arith.constant 0 : index
    %c2_62 = arith.constant 2 : index
    %113 = vector.load %arg18[%c0_61, %c2_62] : memref<32x4xf32, #tpu.memory_space<vmem>>, vector<32x1xf32>
    tpu.vector_store %arg18[%c0_61, %c2_62], %112 {strides = array<i32>} : memref<32x4xf32, #tpu.memory_space<vmem>>, vector<32x1xf32>,
    %c0_63 = arith.constant 0 : index
    %c64_64 = arith.constant 64 : index
    %114 = vector.load %arg19[%c0_63, %c64_64] : memref<32x128xf32, #tpu.memory_space<vmem>>, vector<32x32xf32>
    %115 = vector.broadcast %104 : vector<32x1xf32> to vector<32x32xf32>
    %116 = arith.mulf %115, %114 : vector<32x32xf32>
    %117 = arith.truncf %107 : vector<32x32xf32> to vector<32x32xbf16>
    %cst_65 = arith.constant dense<0.000000e+00> : vector<32x32xf32>
    %118 = tpu.matmul %117, %97, %cst_65 {dimension_numbers = #tpu.dot_dimension_numbers<[1], [0], [0], [1], [0, 0, 1, 1], [], []>} : vector<32x32xbf16>, vector<32x32xbf16>, vector<32x32xf32> -> vector<32x32xf32>
    %119 = arith.addf %116, %118 : vector<32x32xf32>
    %c0_66 = arith.constant 0 : index
    %c64_67 = arith.constant 64 : index
    %120 = vector.load %arg19[%c0_66, %c64_67] : memref<32x128xf32, #tpu.memory_space<vmem>>, vector<32x32xf32>
    tpu.vector_store %arg19[%c0_66, %c64_67], %119 {strides = array<i32>} : memref<32x128xf32, #tpu.memory_space<vmem>>, vector<32x32xf32>,
    %c0_68 = arith.constant 0 : index
    %c2_69 = arith.constant 2 : index
    %121 = vector.load %arg17[%c0_68, %c2_69] : memref<32x4xf32, #tpu.memory_space<vmem>>, vector<32x1xf32>
    tpu.vector_store %arg17[%c0_68, %c2_69], %102 {strides = array<i32>} : memref<32x4xf32, #tpu.memory_space<vmem>>, vector<32x1xf32>,
    %cst_70 = arith.constant dense<0xFF800000> : vector<32xf32>
    %122 = vector.multi_reduction <maximumf>, %98, %cst_70 [0] : vector<32x32xf32> to vector<32xf32>
    %123 = vector.shape_cast %122 : vector<32xf32> to vector<1x32xf32>
    %124 = vector.broadcast %123 : vector<1x32xf32> to vector<32x32xf32>
    %125 = arith.subf %98, %124 : vector<32x32xf32>
    %126 = math.exp %125 : vector<32x32xf32>
    %cst_71 = arith.constant dense<0.000000e+00> : vector<32xf32>
    %127 = vector.multi_reduction <add>, %126, %cst_71 [0] : vector<32x32xf32> to vector<32xf32>
    %128 = vector.shape_cast %127 : vector<32xf32> to vector<1x32xf32>
    %129 = tpu.reciprocal %128 {approx = true} : vector<1x32xf32> -> vector<1x32xf32>
    %130 = vector.broadcast %129 : vector<1x32xf32> to vector<32x32xf32>
    %131 = arith.mulf %126, %130 : vector<32x32xf32>
    %132 = arith.truncf %131 : vector<32x32xf32> to vector<32x32xbf16>
    %cst_72 = arith.constant dense<0.000000e+00> : vector<32x32xf32>
    %133 = tpu.matmul %132, %95, %cst_72 {dimension_numbers = #tpu.dot_dimension_numbers<[0], [0], [1], [1], [0, 1, 1, 1], [], []>} : vector<32x32xbf16>, vector<32x32xbf16>, vector<32x32xf32> -> vector<32x32xf32>
    %c0_73 = arith.constant 0 : index
    %c64_74 = arith.constant 64 : index
    %134 = vector.load %arg20[%c0_73, %c64_74] : memref<32x128xf32, #tpu.memory_space<vmem>>, vector<32x32xf32>
    tpu.vector_store %arg20[%c0_73, %c64_74], %133 {strides = array<i32>} : memref<32x128xf32, #tpu.memory_space<vmem>>, vector<32x32xf32>,
    %c0_75 = arith.constant 0 : index
    %c96 = arith.constant 96 : index
    %135 = vector.load %arg16[%c0_75, %c96] : memref<32x256xbf16, #tpu.memory_space<vmem>>, vector<32x32xbf16>
    %c0_76 = arith.constant 0 : index
    %c224 = arith.constant 224 : index
    %136 = vector.load %arg16[%c0_76, %c224] : memref<32x256xbf16, #tpu.memory_space<vmem>>, vector<32x32xbf16>
    %137 = vector.extract_strided_slice %11 {offsets = [0, 96], sizes = [32, 32], strides = [1, 1]} : vector<32x256xbf16> to vector<32x32xbf16>
    %138 = vector.extract_strided_slice %11 {offsets = [0, 224], sizes = [32, 32], strides = [1, 1]} : vector<32x256xbf16> to vector<32x32xbf16>
    %cst_77 = arith.constant dense<0.000000e+00> : vector<32x32xf32>
    %139 = tpu.matmul %135, %137, %cst_77 {dimension_numbers = #tpu.dot_dimension_numbers<[1], [1], [0], [0], [0, 0, 1, 0], [], []>} : vector<32x32xbf16>, vector<32x32xbf16>, vector<32x32xf32> -> vector<32x32xf32>
    %c0_78 = arith.constant 0 : index
    %c3 = arith.constant 3 : index
    %140 = vector.load %arg17[%c0_78, %c3] : memref<32x4xf32, #tpu.memory_space<vmem>>, vector<32x1xf32>
    %cst_79 = arith.constant dense<0xFF800000> : vector<32xf32>
    %141 = vector.multi_reduction <maximumf>, %139, %cst_79 [1] : vector<32x32xf32> to vector<32xf32>
    %142 = vector.shape_cast %141 : vector<32xf32> to vector<32x1xf32>
    %143 = arith.maximumf %140, %142 : vector<32x1xf32>
    %144 = arith.subf %140, %143 : vector<32x1xf32>
    %145 = math.exp %144 : vector<32x1xf32>
    %146 = vector.broadcast %143 : vector<32x1xf32> to vector<32x32xf32>
    %147 = arith.subf %139, %146 : vector<32x32xf32>
    %148 = math.exp %147 : vector<32x32xf32>
    %c0_80 = arith.constant 0 : index
    %c3_81 = arith.constant 3 : index
    %149 = vector.load %arg18[%c0_80, %c3_81] : memref<32x4xf32, #tpu.memory_space<vmem>>, vector<32x1xf32>
    %150 = arith.mulf %145, %149 : vector<32x1xf32>
    %cst_82 = arith.constant dense<0.000000e+00> : vector<32xf32>
    %151 = vector.multi_reduction <add>, %148, %cst_82 [1] : vector<32x32xf32> to vector<32xf32>
    %152 = vector.shape_cast %151 : vector<32xf32> to vector<32x1xf32>
    %153 = arith.addf %150, %152 : vector<32x1xf32>
    %c0_83 = arith.constant 0 : index
    %c3_84 = arith.constant 3 : index
    %154 = vector.load %arg18[%c0_83, %c3_84] : memref<32x4xf32, #tpu.memory_space<vmem>>, vector<32x1xf32>
    tpu.vector_store %arg18[%c0_83, %c3_84], %153 {strides = array<i32>} : memref<32x4xf32, #tpu.memory_space<vmem>>, vector<32x1xf32>,
    %c0_85 = arith.constant 0 : index
    %c96_86 = arith.constant 96 : index
    %155 = vector.load %arg19[%c0_85, %c96_86] : memref<32x128xf32, #tpu.memory_space<vmem>>, vector<32x32xf32>
    %156 = vector.broadcast %145 : vector<32x1xf32> to vector<32x32xf32>
    %157 = arith.mulf %156, %155 : vector<32x32xf32>
    %158 = arith.truncf %148 : vector<32x32xf32> to vector<32x32xbf16>
    %cst_87 = arith.constant dense<0.000000e+00> : vector<32x32xf32>
    %159 = tpu.matmul %158, %138, %cst_87 {dimension_numbers = #tpu.dot_dimension_numbers<[1], [0], [0], [1], [0, 0, 1, 1], [], []>} : vector<32x32xbf16>, vector<32x32xbf16>, vector<32x32xf32> -> vector<32x32xf32>
    %160 = arith.addf %157, %159 : vector<32x32xf32>
    %c0_88 = arith.constant 0 : index
    %c96_89 = arith.constant 96 : index
    %161 = vector.load %arg19[%c0_88, %c96_89] : memref<32x128xf32, #tpu.memory_space<vmem>>, vector<32x32xf32>
    tpu.vector_store %arg19[%c0_88, %c96_89], %160 {strides = array<i32>} : memref<32x128xf32, #tpu.memory_space<vmem>>, vector<32x32xf32>,
    %c0_90 = arith.constant 0 : index
    %c3_91 = arith.constant 3 : index
    %162 = vector.load %arg17[%c0_90, %c3_91] : memref<32x4xf32, #tpu.memory_space<vmem>>, vector<32x1xf32>
    tpu.vector_store %arg17[%c0_90, %c3_91], %143 {strides = array<i32>} : memref<32x4xf32, #tpu.memory_space<vmem>>, vector<32x1xf32>,
    %cst_92 = arith.constant dense<0xFF800000> : vector<32xf32>
    %163 = vector.multi_reduction <maximumf>, %139, %cst_92 [0] : vector<32x32xf32> to vector<32xf32>
    %164 = vector.shape_cast %163 : vector<32xf32> to vector<1x32xf32>
    %165 = vector.broadcast %164 : vector<1x32xf32> to vector<32x32xf32>
    %166 = arith.subf %139, %165 : vector<32x32xf32>
    %167 = math.exp %166 : vector<32x32xf32>
    %cst_93 = arith.constant dense<0.000000e+00> : vector<32xf32>
    %168 = vector.multi_reduction <add>, %167, %cst_93 [0] : vector<32x32xf32> to vector<32xf32>
    %169 = vector.shape_cast %168 : vector<32xf32> to vector<1x32xf32>
    %170 = tpu.reciprocal %169 {approx = true} : vector<1x32xf32> -> vector<1x32xf32>
    %171 = vector.broadcast %170 : vector<1x32xf32> to vector<32x32xf32>
    %172 = arith.mulf %167, %171 : vector<32x32xf32>
    %173 = arith.truncf %172 : vector<32x32xf32> to vector<32x32xbf16>
    %cst_94 = arith.constant dense<0.000000e+00> : vector<32x32xf32>
    %174 = tpu.matmul %173, %136, %cst_94 {dimension_numbers = #tpu.dot_dimension_numbers<[0], [0], [1], [1], [0, 1, 1, 1], [], []>} : vector<32x32xbf16>, vector<32x32xbf16>, vector<32x32xf32> -> vector<32x32xf32>
    %c0_95 = arith.constant 0 : index
    %c96_96 = arith.constant 96 : index
    %175 = vector.load %arg20[%c0_95, %c96_96] : memref<32x128xf32, #tpu.memory_space<vmem>>, vector<32x32xf32>
    tpu.vector_store %arg20[%c0_95, %c96_96], %174 {strides = array<i32>} : memref<32x128xf32, #tpu.memory_space<vmem>>, vector<32x32xf32>,
    %c0_97 = arith.constant 0 : index
    %c0_98 = arith.constant 0 : index
    %176 = vector.load %arg20[%c0_97, %c0_98] : memref<32x128xf32, #tpu.memory_space<vmem>>, vector<32x128xf32>
    %177 = arith.truncf %176 : vector<32x128xf32> to vector<32x128xbf16>
    %c0_99 = arith.constant 0 : index
    %c0_100 = arith.constant 0 : index
    %178 = vector.load %arg6[%c0_99, %c0_100] : memref<128x128xbf16, #tpu.memory_space<vmem>>, vector<128x128xbf16>
    %cst_101 = arith.constant dense<0.000000e+00> : vector<32x128xf32>
    %179 = tpu.matmul %177, %178, %cst_101 {dimension_numbers = #tpu.dot_dimension_numbers<[1], [0], [0], [1], [0, 0, 1, 1], [], []>} : vector<32x128xbf16>, vector<128x128xbf16>, vector<32x128xf32> -> vector<32x128xf32>
    %c0_102 = arith.constant 0 : index
    %c0_103 = arith.constant 0 : index
    %180 = vector.load %arg7[%c0_102, %c0_103] : memref<1x128xf32, #tpu.memory_space<vmem>>, vector<1x128xf32>
    %181 = vector.broadcast %180 : vector<1x128xf32> to vector<32x128xf32>
    %182 = arith.addf %179, %181 : vector<32x128xf32>
    %183 = tpu.concatenate %4, %182 in 1 : vector<32x128xf32>, vector<32x128xf32> -> vector<32x256xf32>
    %184 = arith.truncf %183 : vector<32x256xf32> to vector<32x256xbf16>
    %c0_104 = arith.constant 0 : index
    %c0_105 = arith.constant 0 : index
    %185 = vector.load %arg8[%c0_104, %c0_105] : memref<256x256xbf16, #tpu.memory_space<vmem>>, vector<256x256xbf16>
    %cst_106 = arith.constant dense<0.000000e+00> : vector<32x256xf32>
    %186 = tpu.matmul %184, %185, %cst_106 {dimension_numbers = #tpu.dot_dimension_numbers<[1], [0], [0], [1], [0, 0, 1, 1], [], []>} : vector<32x256xbf16>, vector<256x256xbf16>, vector<32x256xf32> -> vector<32x256xf32>
    %c0_107 = arith.constant 0 : index
    %c0_108 = arith.constant 0 : index
    %187 = vector.load %arg9[%c0_107, %c0_108] : memref<1x256xf32, #tpu.memory_space<vmem>>, vector<1x256xf32>
    %188 = vector.broadcast %187 : vector<1x256xf32> to vector<32x256xf32>
    %189 = arith.addf %186, %188 : vector<32x256xf32>
    %cst_109 = arith.constant dense<0.000000e+00> : vector<32xf32>
    %190 = vector.multi_reduction <add>, %189, %cst_109 [1] : vector<32x256xf32> to vector<32xf32>
    %191 = vector.shape_cast %190 : vector<32xf32> to vector<32x1xf32>
    %cst_110 = arith.constant 2.560000e+02 : f32
    %192 = vector.broadcast %cst_110 : f32 to vector<32x1xf32>
    %193 = arith.divf %191, %192 : vector<32x1xf32>
    %194 = vector.broadcast %193 : vector<32x1xf32> to vector<32x256xf32>
    %195 = arith.subf %189, %194 : vector<32x256xf32>
    %196 = arith.mulf %195, %195 : vector<32x256xf32>
    %cst_111 = arith.constant dense<0.000000e+00> : vector<32xf32>
    %197 = vector.multi_reduction <add>, %196, %cst_111 [1] : vector<32x256xf32> to vector<32xf32>
    %198 = vector.shape_cast %197 : vector<32xf32> to vector<32x1xf32>
    %cst_112 = arith.constant 2.560000e+02 : f32
    %199 = vector.broadcast %cst_112 : f32 to vector<32x1xf32>
    %200 = arith.divf %198, %199 : vector<32x1xf32>
    %201 = vector.broadcast %193 : vector<32x1xf32> to vector<32x256xf32>
    %202 = arith.subf %189, %201 : vector<32x256xf32>
    %cst_113 = arith.constant 9.99999974E-6 : f32
    %203 = vector.broadcast %cst_113 : f32 to vector<32x1xf32>
    %204 = arith.addf %200, %203 : vector<32x1xf32>
    %205 = math.rsqrt %204 : vector<32x1xf32>
    %206 = vector.broadcast %205 : vector<32x1xf32> to vector<32x256xf32>
    %207 = arith.mulf %202, %206 : vector<32x256xf32>
    %c0_114 = arith.constant 0 : index
    %c0_115 = arith.constant 0 : index
    %208 = vector.load %arg10[%c0_114, %c0_115] : memref<1x256xf32, #tpu.memory_space<vmem>>, vector<1x256xf32>
    %209 = vector.broadcast %208 : vector<1x256xf32> to vector<32x256xf32>
    %210 = arith.mulf %207, %209 : vector<32x256xf32>
    %c0_116 = arith.constant 0 : index
    %c0_117 = arith.constant 0 : index
    %211 = vector.load %arg11[%c0_116, %c0_117] : memref<1x256xf32, #tpu.memory_space<vmem>>, vector<1x256xf32>
    %212 = vector.broadcast %211 : vector<1x256xf32> to vector<32x256xf32>
    %213 = arith.addf %210, %212 : vector<32x256xf32>
    %cst_118 = arith.constant 5.000000e-01 : f32
    %214 = vector.broadcast %cst_118 : f32 to vector<32x256xf32>
    %215 = arith.mulf %214, %213 : vector<32x256xf32>
    %cst_119 = arith.constant 0.707106769 : f32
    %216 = vector.broadcast %cst_119 : f32 to vector<32x256xf32>
    %217 = arith.mulf %213, %216 : vector<32x256xf32>
    %cst_120 = arith.constant 0.000000e+00 : f32
    %218 = vector.broadcast %cst_120 : f32 to vector<32x256xf32>
    %219 = arith.cmpf oge, %217, %218 : vector<32x256xf32>
    %cst_121 = arith.constant 1.000000e+00 : f32
    %cst_122 = arith.constant -1.000000e+00 : f32
    %220 = vector.broadcast %cst_121 : f32 to vector<32x256xf32>
    %221 = vector.broadcast %cst_122 : f32 to vector<32x256xf32>
    %222 = arith.select %219, %220, %221 : vector<32x256xi1>, vector<32x256xf32>
    %223 = math.absf %217 : vector<32x256xf32>
    %cst_123 = arith.constant 0.327591091 : f32
    %224 = vector.broadcast %cst_123 : f32 to vector<32x256xf32>
    %225 = arith.mulf %224, %223 : vector<32x256xf32>
    %cst_124 = arith.constant 1.000000e+00 : f32
    %226 = vector.broadcast %cst_124 : f32 to vector<32x256xf32>
    %227 = arith.addf %226, %225 : vector<32x256xf32>
    %cst_125 = arith.constant 1.000000e+00 : f32
    %228 = vector.broadcast %cst_125 : f32 to vector<32x256xf32>
    %229 = arith.divf %228, %227 : vector<32x256xf32>
    %cst_126 = arith.constant 1.06140542 : f32
    %230 = vector.broadcast %cst_126 : f32 to vector<32x256xf32>
    %231 = arith.mulf %230, %229 : vector<32x256xf32>
    %cst_127 = arith.constant -1.45315206 : f32
    %232 = vector.broadcast %cst_127 : f32 to vector<32x256xf32>
    %233 = arith.addf %231, %232 : vector<32x256xf32>
    %234 = arith.mulf %233, %229 : vector<32x256xf32>
    %cst_128 = arith.constant 1.42141378 : f32
    %235 = vector.broadcast %cst_128 : f32 to vector<32x256xf32>
    %236 = arith.addf %234, %235 : vector<32x256xf32>
    %237 = arith.mulf %236, %229 : vector<32x256xf32>
    %cst_129 = arith.constant -0.284496725 : f32
    %238 = vector.broadcast %cst_129 : f32 to vector<32x256xf32>
    %239 = arith.addf %237, %238 : vector<32x256xf32>
    %240 = arith.mulf %239, %229 : vector<32x256xf32>
    %cst_130 = arith.constant 0.254829586 : f32
    %241 = vector.broadcast %cst_130 : f32 to vector<32x256xf32>
    %242 = arith.addf %240, %241 : vector<32x256xf32>
    %243 = arith.mulf %242, %229 : vector<32x256xf32>
    %cst_131 = arith.constant 0.000000e+00 : f32
    %244 = vector.broadcast %cst_131 : f32 to vector<32x256xf32>
    %245 = arith.subf %244, %223 : vector<32x256xf32>
    %246 = arith.mulf %245, %223 : vector<32x256xf32>
    %247 = math.exp %246 : vector<32x256xf32>
    %248 = arith.mulf %243, %247 : vector<32x256xf32>
    %cst_132 = arith.constant 1.000000e+00 : f32
    %249 = vector.broadcast %cst_132 : f32 to vector<32x256xf32>
    %250 = arith.subf %249, %248 : vector<32x256xf32>
    %251 = arith.mulf %222, %250 : vector<32x256xf32>
    %cst_133 = arith.constant 1.000000e+00 : f32
    %252 = vector.broadcast %cst_133 : f32 to vector<32x256xf32>
    %253 = arith.addf %252, %251 : vector<32x256xf32>
    %254 = arith.mulf %215, %253 : vector<32x256xf32>
    %255 = arith.truncf %254 : vector<32x256xf32> to vector<32x256xbf16>
    %c0_134 = arith.constant 0 : index
    %c0_135 = arith.constant 0 : index
    %256 = vector.load %arg12[%c0_134, %c0_135] : memref<256x128xbf16, #tpu.memory_space<vmem>>, vector<256x128xbf16>
    %cst_136 = arith.constant dense<0.000000e+00> : vector<32x128xf32>
    %257 = tpu.matmul %255, %256, %cst_136 {dimension_numbers = #tpu.dot_dimension_numbers<[1], [0], [0], [1], [0, 0, 1, 1], [], []>} : vector<32x256xbf16>, vector<256x128xbf16>, vector<32x128xf32> -> vector<32x128xf32>
    %c0_137 = arith.constant 0 : index
    %c0_138 = arith.constant 0 : index
    %258 = vector.load %arg13[%c0_137, %c0_138] : memref<1x128xf32, #tpu.memory_space<vmem>>, vector<1x128xf32>
    %259 = vector.broadcast %258 : vector<1x128xf32> to vector<32x128xf32>
    %260 = arith.addf %257, %259 : vector<32x128xf32>
    %261 = arith.addf %4, %260 : vector<32x128xf32>
    %c0_139 = arith.constant 0 : index
    %c0_140 = arith.constant 0 : index
    %c0_141 = arith.constant 0 : index
    %262 = vector.load %arg15[%c0_139, %c0_140, %c0_141] : memref<1x32x128xf32, #tpu.memory_space<vmem>>, vector<1x32x128xf32>
    %263 = vector.shape_cast %262 : vector<1x32x128xf32> to vector<32x128xf32>
    %264 = vector.shape_cast %261 : vector<32x128xf32> to vector<1x32x128xf32>
    tpu.vector_store %arg15[%c0_139, %c0_140, %c0_141], %264 {strides = array<i32>} : memref<1x32x128xf32, #tpu.memory_space<vmem>>, vector<1x32x128xf32>,
    %c1_i32 = arith.constant 1 : i32
    %265 = arith.cmpi eq, %arg1, %c1_i32 : i32
    %266 = arith.extui %265 : i1 to i32
    %c0_i32_142 = arith.constant 0 : i32
    %267 = arith.cmpi ne, %266, %c0_i32_142 : i32
    scf.if %267 {
      %c0_143 = arith.constant 0 : index
      %c0_144 = arith.constant 0 : index
      %268 = vector.load %arg19[%c0_143, %c0_144] : memref<32x128xf32, #tpu.memory_space<vmem>>, vector<32x32xf32>
      %c0_145 = arith.constant 0 : index
      %c0_146 = arith.constant 0 : index
      %269 = vector.load %arg18[%c0_145, %c0_146] : memref<32x4xf32, #tpu.memory_space<vmem>>, vector<32x1xf32>
      %270 = tpu.reciprocal %269 {approx = true} : vector<32x1xf32> -> vector<32x1xf32>
      %271 = vector.broadcast %270 : vector<32x1xf32> to vector<32x32xf32>
      %272 = arith.mulf %268, %271 : vector<32x32xf32>
      %c0_147 = arith.constant 0 : index
      %c0_148 = arith.constant 0 : index
      %273 = vector.load %arg19[%c0_147, %c0_148] : memref<32x128xf32, #tpu.memory_space<vmem>>, vector<32x32xf32>
      tpu.vector_store %arg19[%c0_147, %c0_148], %272 {strides = array<i32>} : memref<32x128xf32, #tpu.memory_space<vmem>>, vector<32x32xf32>,
      %c0_149 = arith.constant 0 : index
      %c32_150 = arith.constant 32 : index
      %274 = vector.load %arg19[%c0_149, %c32_150] : memref<32x128xf32, #tpu.memory_space<vmem>>, vector<32x32xf32>
      %c0_151 = arith.constant 0 : index
      %c1_152 = arith.constant 1 : index
      %275 = vector.load %arg18[%c0_151, %c1_152] : memref<32x4xf32, #tpu.memory_space<vmem>>, vector<32x1xf32>
      %276 = tpu.reciprocal %275 {approx = true} : vector<32x1xf32> -> vector<32x1xf32>
      %277 = vector.broadcast %276 : vector<32x1xf32> to vector<32x32xf32>
      %278 = arith.mulf %274, %277 : vector<32x32xf32>
      %c0_153 = arith.constant 0 : index
      %c32_154 = arith.constant 32 : index
      %279 = vector.load %arg19[%c0_153, %c32_154] : memref<32x128xf32, #tpu.memory_space<vmem>>, vector<32x32xf32>
      tpu.vector_store %arg19[%c0_153, %c32_154], %278 {strides = array<i32>} : memref<32x128xf32, #tpu.memory_space<vmem>>, vector<32x32xf32>,
      %c0_155 = arith.constant 0 : index
      %c64_156 = arith.constant 64 : index
      %280 = vector.load %arg19[%c0_155, %c64_156] : memref<32x128xf32, #tpu.memory_space<vmem>>, vector<32x32xf32>
      %c0_157 = arith.constant 0 : index
      %c2_158 = arith.constant 2 : index
      %281 = vector.load %arg18[%c0_157, %c2_158] : memref<32x4xf32, #tpu.memory_space<vmem>>, vector<32x1xf32>
      %282 = tpu.reciprocal %281 {approx = true} : vector<32x1xf32> -> vector<32x1xf32>
      %283 = vector.broadcast %282 : vector<32x1xf32> to vector<32x32xf32>
      %284 = arith.mulf %280, %283 : vector<32x32xf32>
      %c0_159 = arith.constant 0 : index
      %c64_160 = arith.constant 64 : index
      %285 = vector.load %arg19[%c0_159, %c64_160] : memref<32x128xf32, #tpu.memory_space<vmem>>, vector<32x32xf32>
      tpu.vector_store %arg19[%c0_159, %c64_160], %284 {strides = array<i32>} : memref<32x128xf32, #tpu.memory_space<vmem>>, vector<32x32xf32>,
      %c0_161 = arith.constant 0 : index
      %c96_162 = arith.constant 96 : index
      %286 = vector.load %arg19[%c0_161, %c96_162] : memref<32x128xf32, #tpu.memory_space<vmem>>, vector<32x32xf32>
      %c0_163 = arith.constant 0 : index
      %c3_164 = arith.constant 3 : index
      %287 = vector.load %arg18[%c0_163, %c3_164] : memref<32x4xf32, #tpu.memory_space<vmem>>, vector<32x1xf32>
      %288 = tpu.reciprocal %287 {approx = true} : vector<32x1xf32> -> vector<32x1xf32>
      %289 = vector.broadcast %288 : vector<32x1xf32> to vector<32x32xf32>
      %290 = arith.mulf %286, %289 : vector<32x32xf32>
      %c0_165 = arith.constant 0 : index
      %c96_166 = arith.constant 96 : index
      %291 = vector.load %arg19[%c0_165, %c96_166] : memref<32x128xf32, #tpu.memory_space<vmem>>, vector<32x32xf32>
      tpu.vector_store %arg19[%c0_165, %c96_166], %290 {strides = array<i32>} : memref<32x128xf32, #tpu.memory_space<vmem>>, vector<32x32xf32>,
      %c0_167 = arith.constant 0 : index
      %c0_168 = arith.constant 0 : index
      %c0_169 = arith.constant 0 : index
      %292 = vector.load %arg2[%c0_167, %c0_168, %c0_169] : memref<1x32x128xf32, #tpu.memory_space<vmem>>, vector<1x32x128xf32>
      %293 = vector.shape_cast %292 : vector<1x32x128xf32> to vector<32x128xf32>
      %c0_170 = arith.constant 0 : index
      %c0_171 = arith.constant 0 : index
      %294 = vector.load %arg19[%c0_170, %c0_171] : memref<32x128xf32, #tpu.memory_space<vmem>>, vector<32x128xf32>
      %295 = arith.truncf %294 : vector<32x128xf32> to vector<32x128xbf16>
      %c0_172 = arith.constant 0 : index
      %c0_173 = arith.constant 0 : index
      %296 = vector.load %arg6[%c0_172, %c0_173] : memref<128x128xbf16, #tpu.memory_space<vmem>>, vector<128x128xbf16>
      %cst_174 = arith.constant dense<0.000000e+00> : vector<32x128xf32>
      %297 = tpu.matmul %295, %296, %cst_174 {dimension_numbers = #tpu.dot_dimension_numbers<[1], [0], [0], [1], [0, 0, 1, 1], [], []>} : vector<32x128xbf16>, vector<128x128xbf16>, vector<32x128xf32> -> vector<32x128xf32>
      %c0_175 = arith.constant 0 : index
      %c0_176 = arith.constant 0 : index
      %298 = vector.load %arg7[%c0_175, %c0_176] : memref<1x128xf32, #tpu.memory_space<vmem>>, vector<1x128xf32>
      %299 = vector.broadcast %298 : vector<1x128xf32> to vector<32x128xf32>
      %300 = arith.addf %297, %299 : vector<32x128xf32>
      %301 = tpu.concatenate %293, %300 in 1 : vector<32x128xf32>, vector<32x128xf32> -> vector<32x256xf32>
      %302 = arith.truncf %301 : vector<32x256xf32> to vector<32x256xbf16>
      %c0_177 = arith.constant 0 : index
      %c0_178 = arith.constant 0 : index
      %303 = vector.load %arg8[%c0_177, %c0_178] : memref<256x256xbf16, #tpu.memory_space<vmem>>, vector<256x256xbf16>
      %cst_179 = arith.constant dense<0.000000e+00> : vector<32x256xf32>
      %304 = tpu.matmul %302, %303, %cst_179 {dimension_numbers = #tpu.dot_dimension_numbers<[1], [0], [0], [1], [0, 0, 1, 1], [], []>} : vector<32x256xbf16>, vector<256x256xbf16>, vector<32x256xf32> -> vector<32x256xf32>
      %c0_180 = arith.constant 0 : index
      %c0_181 = arith.constant 0 : index
      %305 = vector.load %arg9[%c0_180, %c0_181] : memref<1x256xf32, #tpu.memory_space<vmem>>, vector<1x256xf32>
      %306 = vector.broadcast %305 : vector<1x256xf32> to vector<32x256xf32>
      %307 = arith.addf %304, %306 : vector<32x256xf32>
      %cst_182 = arith.constant dense<0.000000e+00> : vector<32xf32>
      %308 = vector.multi_reduction <add>, %307, %cst_182 [1] : vector<32x256xf32> to vector<32xf32>
      %309 = vector.shape_cast %308 : vector<32xf32> to vector<32x1xf32>
      %cst_183 = arith.constant 2.560000e+02 : f32
      %310 = vector.broadcast %cst_183 : f32 to vector<32x1xf32>
      %311 = arith.divf %309, %310 : vector<32x1xf32>
      %312 = vector.broadcast %311 : vector<32x1xf32> to vector<32x256xf32>
      %313 = arith.subf %307, %312 : vector<32x256xf32>
      %314 = arith.mulf %313, %313 : vector<32x256xf32>
      %cst_184 = arith.constant dense<0.000000e+00> : vector<32xf32>
      %315 = vector.multi_reduction <add>, %314, %cst_184 [1] : vector<32x256xf32> to vector<32xf32>
      %316 = vector.shape_cast %315 : vector<32xf32> to vector<32x1xf32>
      %cst_185 = arith.constant 2.560000e+02 : f32
      %317 = vector.broadcast %cst_185 : f32 to vector<32x1xf32>
      %318 = arith.divf %316, %317 : vector<32x1xf32>
      %319 = vector.broadcast %311 : vector<32x1xf32> to vector<32x256xf32>
      %320 = arith.subf %307, %319 : vector<32x256xf32>
      %cst_186 = arith.constant 9.99999974E-6 : f32
      %321 = vector.broadcast %cst_186 : f32 to vector<32x1xf32>
      %322 = arith.addf %318, %321 : vector<32x1xf32>
      %323 = math.rsqrt %322 : vector<32x1xf32>
      %324 = vector.broadcast %323 : vector<32x1xf32> to vector<32x256xf32>
      %325 = arith.mulf %320, %324 : vector<32x256xf32>
      %c0_187 = arith.constant 0 : index
      %c0_188 = arith.constant 0 : index
      %326 = vector.load %arg10[%c0_187, %c0_188] : memref<1x256xf32, #tpu.memory_space<vmem>>, vector<1x256xf32>
      %327 = vector.broadcast %326 : vector<1x256xf32> to vector<32x256xf32>
      %328 = arith.mulf %325, %327 : vector<32x256xf32>
      %c0_189 = arith.constant 0 : index
      %c0_190 = arith.constant 0 : index
      %329 = vector.load %arg11[%c0_189, %c0_190] : memref<1x256xf32, #tpu.memory_space<vmem>>, vector<1x256xf32>
      %330 = vector.broadcast %329 : vector<1x256xf32> to vector<32x256xf32>
      %331 = arith.addf %328, %330 : vector<32x256xf32>
      %cst_191 = arith.constant 5.000000e-01 : f32
      %332 = vector.broadcast %cst_191 : f32 to vector<32x256xf32>
      %333 = arith.mulf %332, %331 : vector<32x256xf32>
      %cst_192 = arith.constant 0.707106769 : f32
      %334 = vector.broadcast %cst_192 : f32 to vector<32x256xf32>
      %335 = arith.mulf %331, %334 : vector<32x256xf32>
      %cst_193 = arith.constant 0.000000e+00 : f32
      %336 = vector.broadcast %cst_193 : f32 to vector<32x256xf32>
      %337 = arith.cmpf oge, %335, %336 : vector<32x256xf32>
      %cst_194 = arith.constant 1.000000e+00 : f32
      %cst_195 = arith.constant -1.000000e+00 : f32
      %338 = vector.broadcast %cst_194 : f32 to vector<32x256xf32>
      %339 = vector.broadcast %cst_195 : f32 to vector<32x256xf32>
      %340 = arith.select %337, %338, %339 : vector<32x256xi1>, vector<32x256xf32>
      %341 = math.absf %335 : vector<32x256xf32>
      %cst_196 = arith.constant 0.327591091 : f32
      %342 = vector.broadcast %cst_196 : f32 to vector<32x256xf32>
      %343 = arith.mulf %342, %341 : vector<32x256xf32>
      %cst_197 = arith.constant 1.000000e+00 : f32
      %344 = vector.broadcast %cst_197 : f32 to vector<32x256xf32>
      %345 = arith.addf %344, %343 : vector<32x256xf32>
      %cst_198 = arith.constant 1.000000e+00 : f32
      %346 = vector.broadcast %cst_198 : f32 to vector<32x256xf32>
      %347 = arith.divf %346, %345 : vector<32x256xf32>
      %cst_199 = arith.constant 1.06140542 : f32
      %348 = vector.broadcast %cst_199 : f32 to vector<32x256xf32>
      %349 = arith.mulf %348, %347 : vector<32x256xf32>
      %cst_200 = arith.constant -1.45315206 : f32
      %350 = vector.broadcast %cst_200 : f32 to vector<32x256xf32>
      %351 = arith.addf %349, %350 : vector<32x256xf32>
      %352 = arith.mulf %351, %347 : vector<32x256xf32>
      %cst_201 = arith.constant 1.42141378 : f32
      %353 = vector.broadcast %cst_201 : f32 to vector<32x256xf32>
      %354 = arith.addf %352, %353 : vector<32x256xf32>
      %355 = arith.mulf %354, %347 : vector<32x256xf32>
      %cst_202 = arith.constant -0.284496725 : f32
      %356 = vector.broadcast %cst_202 : f32 to vector<32x256xf32>
      %357 = arith.addf %355, %356 : vector<32x256xf32>
      %358 = arith.mulf %357, %347 : vector<32x256xf32>
      %cst_203 = arith.constant 0.254829586 : f32
      %359 = vector.broadcast %cst_203 : f32 to vector<32x256xf32>
      %360 = arith.addf %358, %359 : vector<32x256xf32>
      %361 = arith.mulf %360, %347 : vector<32x256xf32>
      %cst_204 = arith.constant 0.000000e+00 : f32
      %362 = vector.broadcast %cst_204 : f32 to vector<32x256xf32>
      %363 = arith.subf %362, %341 : vector<32x256xf32>
      %364 = arith.mulf %363, %341 : vector<32x256xf32>
      %365 = math.exp %364 : vector<32x256xf32>
      %366 = arith.mulf %361, %365 : vector<32x256xf32>
      %cst_205 = arith.constant 1.000000e+00 : f32
      %367 = vector.broadcast %cst_205 : f32 to vector<32x256xf32>
      %368 = arith.subf %367, %366 : vector<32x256xf32>
      %369 = arith.mulf %340, %368 : vector<32x256xf32>
      %cst_206 = arith.constant 1.000000e+00 : f32
      %370 = vector.broadcast %cst_206 : f32 to vector<32x256xf32>
      %371 = arith.addf %370, %369 : vector<32x256xf32>
      %372 = arith.mulf %333, %371 : vector<32x256xf32>
      %373 = arith.truncf %372 : vector<32x256xf32> to vector<32x256xbf16>
      %c0_207 = arith.constant 0 : index
      %c0_208 = arith.constant 0 : index
      %374 = vector.load %arg12[%c0_207, %c0_208] : memref<256x128xbf16, #tpu.memory_space<vmem>>, vector<256x128xbf16>
      %cst_209 = arith.constant dense<0.000000e+00> : vector<32x128xf32>
      %375 = tpu.matmul %373, %374, %cst_209 {dimension_numbers = #tpu.dot_dimension_numbers<[1], [0], [0], [1], [0, 0, 1, 1], [], []>} : vector<32x256xbf16>, vector<256x128xbf16>, vector<32x128xf32> -> vector<32x128xf32>
      %c0_210 = arith.constant 0 : index
      %c0_211 = arith.constant 0 : index
      %376 = vector.load %arg13[%c0_210, %c0_211] : memref<1x128xf32, #tpu.memory_space<vmem>>, vector<1x128xf32>
      %377 = vector.broadcast %376 : vector<1x128xf32> to vector<32x128xf32>
      %378 = arith.addf %375, %377 : vector<32x128xf32>
      %379 = arith.addf %293, %378 : vector<32x128xf32>
      %c0_212 = arith.constant 0 : index
      %c0_213 = arith.constant 0 : index
      %c0_214 = arith.constant 0 : index
      %380 = vector.load %arg14[%c0_212, %c0_213, %c0_214] : memref<1x32x128xf32, #tpu.memory_space<vmem>>, vector<1x32x128xf32>
      %381 = vector.shape_cast %380 : vector<1x32x128xf32> to vector<32x128xf32>
      %382 = vector.shape_cast %379 : vector<32x128xf32> to vector<1x32x128xf32>
      tpu.vector_store %arg14[%c0_212, %c0_213, %c0_214], %382 {strides = array<i32>} : memref<1x32x128xf32, #tpu.memory_space<vmem>>, vector<1x32x128xf32>,
    } else {
    }
    return
  }
  func.func @transform_0(%arg0: i32, %arg1: i32) -> (i32, i32, i32) {
    %c0_i32 = arith.constant 0 : i32
    %c0_i32_0 = arith.constant 0 : i32
    %c0_i32_1 = arith.constant 0 : i32
    return %arg0, %c0_i32, %c0_i32_0 : i32, i32, i32
  }
  func.func @transform_1(%arg0: i32, %arg1: i32) -> (i32, i32, i32) {
    %c0_i32 = arith.constant 0 : i32
    %c0_i32_0 = arith.constant 0 : i32
    return %arg0, %arg1, %c0_i32 : i32, i32, i32
  }
  func.func @transform_2(%arg0: i32, %arg1: i32) -> (i32, i32) {
    %c0_i32 = arith.constant 0 : i32
    %c0_i32_0 = arith.constant 0 : i32
    %c0_i32_1 = arith.constant 0 : i32
    return %c0_i32, %c0_i32_0 : i32, i32
  }
  func.func @transform_3(%arg0: i32, %arg1: i32) -> (i32, i32) {
    %c0_i32 = arith.constant 0 : i32
    %c0_i32_0 = arith.constant 0 : i32
    %c0_i32_1 = arith.constant 0 : i32
    return %c0_i32, %c0_i32_0 : i32, i32
  }
  func.func @transform_4(%arg0: i32, %arg1: i32) -> (i32, i32) {
    %c0_i32 = arith.constant 0 : i32
    %c0_i32_0 = arith.constant 0 : i32
    %c0_i32_1 = arith.constant 0 : i32
    return %c0_i32, %c0_i32_0 : i32, i32
  }
  func.func @transform_5(%arg0: i32, %arg1: i32) -> (i32, i32) {
    %c0_i32 = arith.constant 0 : i32
    %c0_i32_0 = arith.constant 0 : i32
    %c0_i32_1 = arith.constant 0 : i32
    return %c0_i32, %c0_i32_0 : i32, i32
  }
  func.func @transform_6(%arg0: i32, %arg1: i32) -> (i32, i32) {
    %c0_i32 = arith.constant 0 : i32
    %c0_i32_0 = arith.constant 0 : i32
    %c0_i32_1 = arith.constant 0 : i32
    return %c0_i32, %c0_i32_0 : i32, i32
  }
  func.func @transform_7(%arg0: i32, %arg1: i32) -> (i32, i32) {
    %c0_i32 = arith.constant 0 : i32
    %c0_i32_0 = arith.constant 0 : i32
    %c0_i32_1 = arith.constant 0 : i32
    return %c0_i32, %c0_i32_0 : i32, i32
  }
  func.func @transform_8(%arg0: i32, %arg1: i32) -> (i32, i32) {
    %c0_i32 = arith.constant 0 : i32
    %c0_i32_0 = arith.constant 0 : i32
    %c0_i32_1 = arith.constant 0 : i32
    return %c0_i32, %c0_i32_0 : i32, i32
  }
  func.func @transform_9(%arg0: i32, %arg1: i32) -> (i32, i32) {
    %c0_i32 = arith.constant 0 : i32
    %c0_i32_0 = arith.constant 0 : i32
    %c0_i32_1 = arith.constant 0 : i32
    return %c0_i32, %c0_i32_0 : i32, i32
  }
  func.func @transform_10(%arg0: i32, %arg1: i32) -> (i32, i32) {
    %c0_i32 = arith.constant 0 : i32
    %c0_i32_0 = arith.constant 0 : i32
    %c0_i32_1 = arith.constant 0 : i32
    return %c0_i32, %c0_i32_0 : i32, i32
  }
  func.func @transform_11(%arg0: i32, %arg1: i32) -> (i32, i32) {
    %c0_i32 = arith.constant 0 : i32
    %c0_i32_0 = arith.constant 0 : i32
    %c0_i32_1 = arith.constant 0 : i32
    return %c0_i32, %c0_i32_0 : i32, i32
  }
  func.func @transform_12(%arg0: i32, %arg1: i32) -> (i32, i32, i32) {
    %c0_i32 = arith.constant 0 : i32
    %c0_i32_0 = arith.constant 0 : i32
    %c0_i32_1 = arith.constant 0 : i32
    return %arg0, %c0_i32, %c0_i32_0 : i32, i32, i32
  }
  func.func @transform_13(%arg0: i32, %arg1: i32) -> (i32, i32, i32) {
    %c0_i32 = arith.constant 0 : i32
    %c0_i32_0 = arith.constant 0 : i32
    return %arg0, %arg1, %c0_i32 : i32, i32, i32
  }
}

</mosaic_0001>

<bundles_post_ra>
// kernel: tpu_custom_call.1
= control target key start
LH: loop header
LB: loop body
LE: loop exit
PB: predicated region body
PF: predicated region fallthrough
CT: control target
= control target key end

     0   :  { %s8139_s0 = inlined_call_operand.hbm [shape: f32[2,32,128], index: 0, kind: input, shape index: {}]   ;;  %s8140_s1 = inlined_call_operand.hbm [shape: f32[2,64,128], index: 1, kind: input, shape index: {}]   ;;  %s8141_s2 = inlined_call_operand.hbm [shape: bf16[128,256], index: 2, kind: input, shape index: {}]   ;;  %s8142_s3 = inlined_call_operand.vmem [shape: f32[1,256], index: 3, kind: input, shape index: {}]   ;;  %s8143_s4 = inlined_call_operand.hbm [shape: bf16[128,128], index: 4, kind: input, shape index: {}]   ;;  %s8144_s5 = inlined_call_operand.vmem [shape: f32[1,128], index: 5, kind: input, shape index: {}]   ;;  %s8145_s6 = inlined_call_operand.hbm [shape: bf16[256,256], index: 6, kind: input, shape index: {}]   ;;  %s8146_s7 = inlined_call_operand.vmem [shape: f32[1,256], index: 7, kind: input, shape index: {}]   ;;  %s8147_s8 = inlined_call_operand.vmem [shape: f32[1,256], index: 8, kind: input, shape index: {}]   ;;  %s8148_s9 = inlined_call_operand.vmem [shape: f32[1,256], index: 9, kind: input, shape index: {}]   ;;  %s8149_s10 = inlined_call_operand.hbm [shape: bf16[256,128], index: 10, kind: input, shape index: {}]   ;;  %s8150_s11 = inlined_call_operand.vmem [shape: f32[1,128], index: 11, kind: input, shape index: {}]   ;;  %s8151_s12 = inlined_call_operand.hbm [shape: f32[2,32,128], index: 12, kind: output, shape index: {0}]   ;;  %s8152_s13 = inlined_call_operand.hbm [shape: f32[2,64,128], index: 13, kind: output, shape index: {1}]  }
   0x1   :  { %8213 = sst [smem:[#allocation66_spill]] %s8139_s0 }
   0x2   :  { %8214 = sst [smem:[#allocation67_spill]] %s8140_s1 }
   0x3   :  { %8215 = sst [smem:[#allocation68_spill]] %s8141_s2 }
   0x4   :  { %8216 = sst [smem:[#allocation69_spill]] %s8142_s3 }
   0x5   :  { %8217 = sst [smem:[#allocation70_spill]] %s8143_s4 }
   0x6   :  { %8218 = sst [smem:[#allocation71_spill]] %s8144_s5 }
   0x7   :  { %8219 = sst [smem:[#allocation72_spill]] %s8145_s6 }
   0x8   :  { %8220 = sst [smem:[#allocation73_spill]] %s8146_s7 }
   0x9   :  { %8221 = sst [smem:[#allocation74_spill]] %s8147_s8 }
   0xa   :  { %8222 = sst [smem:[#allocation75_spill]] %s8148_s9 }
   0xb   :  { %8223 = sst [smem:[#allocation76_spill]] %s8149_s10 }
   0xc   :  { %8224 = sst [smem:[#allocation77_spill]] %s8150_s11 }
   0xd   :  { %8225 = sst [smem:[#allocation78_spill]] %s8151_s12 }
   0xe   :  { %8226 = sst [smem:[#allocation79_spill]] %s8152_s13 }
   0xf   :  { %19 = vsyncpa [#allocation8], 0 }
  0x10   :  { %21 = vsyncpa [#allocation8 + $0x1], 0 }
  0x11   :  { %22 = vsyncpa [#allocation11], 0 }
  0x12   :  { %24 = vsyncpa [#allocation11 + $0x1], 0 }
  0x13   :  { %25 = vsyncpa [#allocation14], 0 }
  0x14   :  { %26 = vsyncpa [#allocation17], 0 }
  0x15   :  { %27 = vsyncpa [#allocation9], 0 }
  0x16   :  { %29 = vsyncpa [#allocation9 + $0x1], 0 }
  0x17   :  { %30 = vsyncpa [#allocation20], 0 }
  0x18   :  { %32 = vsyncpa [#allocation20 + $0x1], 0  ;;  %s6458_s25 = smov 0   ;;  %s6460_s26 = smov 0  }
  0x19   :  { %s6462_s27 = smov 0   ;;  %s6464_s28 = smov 0  }
  0x1a   :  { %s6466_s29 = smov 0   ;;  %s6468_s30 = smov 0  }
  0x1b   :  { %s6470_s14 = smov 0   ;;  %s6472_s15 = smov 0  }
  0x1c   :  { %s6474_s16 = smov 0   ;;  %s6476_s17 = smov 0  }
  0x1d   :  { %s6478_s18 = smov 0  }
  0x1e LB: > { %8227 = sst [smem:[#allocation28_spill]] %s6316_s25  ;;  %s6514_s19 = sadd.s32 4294967295, %s6356_s18   ;;  %s6356_s18 = sphi %s6478_s18, %s38_s18   ;;  %s6352_s17 = sphi %s6476_s17, %s8381_s17   ;;  %s6348_s16 = sphi %s6474_s16, %s8380_s16   ;;  %s6344_s15 = sphi %s6472_s15, %s8379_s15   ;;  %s6340_s14 = sphi %s6470_s14, %s8378_s14   ;;  %s6336_s30 = sphi %s6468_s30, %s8377_s30   ;;  %s6332_s29 = sphi %s6466_s29, %s8376_s29   ;;  %s6328_s28 = sphi %s6464_s28, %s8375_s28   ;;  %s6324_s27 = sphi %s6462_s27, %s8374_s27   ;;  %s6320_s26 = sphi %s6460_s26, %s8373_s26   ;;  %s6316_s25 = sphi %s6458_s25, %s8370_s25  }
  0x1f   : > { %8228 = sst [smem:[#allocation29_spill]] %s6320_s26  ;;  %p8160_p0 = scmp.ne.s32.totalorder %s6320_s26, %s6316_s25 }
  0x20   : > { %8229 = sst [smem:[#allocation30_spill]] %s6328_s28  ;;  %p8165_p1 = scmp.eq.s32.totalorder %s6514_s19, 0 }
  0x21   : > { %8230 = sst [smem:[#allocation31_spill]] %s6340_s14  ;;  %p8169_p2 = scmp.eq.s32.totalorder %s6514_s19, 3 }
  0x22   : > { %8231 = sst [smem:[#allocation32_spill]] %s6344_s15  ;;  %p4913_p3 = scmp.ge.s32.totalorder %s6356_s18, 1 }
  0x23   : > { %8232 = sst [smem:[#allocation33_spill]] %s6514_s19  ;;  %p373_p4 = scmp.lt.s32.totalorder %s6356_s18, 5 }
  0x24   : > { %p6527_p5 = por %p8160_p0, %p8165_p1  ;;  %s6358_s22 = smov [#allocation12]  }
  0x25   : > { %p6531_p6 = pnand %p4913_p3, %p373_p4  ;;  %s385_s23 = sshll.u32 %s6358_s22, 4  ;;  %s386_s23 = int_to_ptr.vmem [resolvable:$true] %s385_s23 }
  0x26   : > { %s8233_s20 = scalar_select %p6527_p5, 1, 0 }
  0x27   : > { %p5452_p7 = pneg %p6531_p6  ;;  %s6359_s13 = smov [#allocation13]  }
  0x28   : > { %8234 = sst [smem:[#allocation34_spill]] %s8233_s20  ;;  %s401_s12 = sshll.u32 %s6359_s13, 4  ;;  %s402_s12 = int_to_ptr.vmem [resolvable:$true] %s401_s12 }
  0x29   : > { %p6539_p8 = pnand %p5452_p7, %p8165_p1  ;;  %s6041_s15 = scalar_lea.vmem %s386_s23, 2048 }
  0x2a   : > { %p6042_p10 = scmp.ne.s32.totalorder %s386_s23, %s6041_s15  ;;  %p6049_p13 = scmp.lt.s32.totalorder %s386_s23, %s386_s23 }
  0x2b   : > { %p6032_p9 = pneg %p6539_p8  ;;  %p6050_p3 = scmp.lt.s32.totalorder %s6041_s15, %s6041_s15 }
  0x2d   : > { %p6044_p11 = pnand %p6042_p10, %p6032_p9  ;;  %p6051_p4 = por %p6050_p3, %p6049_p13 }
  0x2f   : > { %p6045_p12 = pneg %p6044_p11 }
  0x31   : > { %p6052_p7 = pnand %p6051_p4, %p6045_p12 }
  0x33   : > { %6055 = shalt.err (!%p6052_p7)
}
  0x34   : > { %s8156_s22 = smov 128   ;;  %s8158_s11 = smov 8  }
  0x35   : > { %s8237_s2 = sld [smem:[#allocation68_spill]]  ;;  %s6067_s8 = scalar_lea.vmem %s402_s12, 1024 }
  0x36   : > { %p6068_p10 = scmp.ne.s32.totalorder %s402_s12, %s6067_s8  ;;  %p6075_p12 = scmp.lt.s32.totalorder %s402_s12, %s402_s12 }
  0x37   : > { %p6076_p3 = scmp.lt.s32.totalorder %s6067_s8, %s6067_s8 }
  0x38   : > { %p6070_p11 = pnand %p6068_p10, %p6032_p9 }
  0x39   : > { %p6077_p4 = por %p6076_p3, %p6075_p12 }
  0x3a   : > { %p6071_p13 = pneg %p6070_p11 }
  0x3b   : > { %5455 = dma.hbm_to_vmem [thread:$0]  (!%p6539_p8), %s8237_s2, 2048, %s386_s23, [#allocation11], %s8156_s22, %s8156_s22, %s8158_s11  }
  0x3c   : > { %p6078_p7 = pnand %p6077_p4, %p6071_p13 }
  0x3e   : > { %6081 = shalt.err (!%p6078_p7)
}
  0x3f   : > { %s6362_s15 = smov 64   ;;  %s6363_s7 = smov 4  }
  0x40   : > { %s8238_s4 = sld [smem:[#allocation70_spill]]  ;;  %s6364_s13 = smov [#allocation15]  }
  0x41   : > { %s417_s22 = sshll.u32 %s6364_s13, 4  ;;  %s6365_s11 = smov [#allocation16]   ;;  %s418_s22 = int_to_ptr.vmem [resolvable:$true] %s417_s22 }
  0x42   : > { %s439_s8 = sshll.u32 %s6365_s11, 4  ;;  %s6093_s2 = scalar_lea.vmem %s418_s22, 4096  ;;  %s440_s8 = int_to_ptr.vmem [resolvable:$true] %s439_s8 }
  0x43   : > { %p6094_p10 = scmp.ne.s32.totalorder %s418_s22, %s6093_s2  ;;  %p6101_p12 = scmp.lt.s32.totalorder %s418_s22, %s418_s22 }
  0x44   : > { %p6102_p3 = scmp.lt.s32.totalorder %s6093_s2, %s6093_s2 }
  0x45   : > { %p6096_p11 = pnand %p6094_p10, %p6032_p9 }
  0x46   : > { %5458 = dma.hbm_to_vmem [thread:$0]  (!%p6539_p8), %s8238_s4, 1024, %s402_s12, [#allocation14], %s6362_s15, %s6362_s15, %s6363_s7  }
  0x47   : > { %p6097_p13 = pneg %p6096_p11  ;;  %p6103_p4 = por %p6102_p3, %p6101_p12 }
  0x49   : > { %p6104_p7 = pnand %p6103_p4, %p6097_p13 }
  0x4b   : > { %6107 = shalt.err (!%p6104_p7)
}
  0x4c   : > { %s8239_s9 = smov 8   ;;  %s8240_s12 = smov 128  }
  0x4d   : > { %s8241_s6 = sld [smem:[#allocation72_spill]]  ;;  %s6119_s11 = scalar_lea.vmem %s440_s8, 2048 }
  0x4e   : > { %p6120_p0 = scmp.ne.s32.totalorder %s440_s8, %s6119_s11  ;;  %p6127_p12 = scmp.lt.s32.totalorder %s440_s8, %s440_s8 }
  0x4f   : > { %p6128_p13 = scmp.lt.s32.totalorder %s6119_s11, %s6119_s11 }
  0x50   : > { %p6122_p10 = pnand %p6120_p0, %p6032_p9 }
  0x51   : > { %p6129_p3 = por %p6128_p13, %p6127_p12 }
  0x52   : > { %p6123_p11 = pneg %p6122_p10 }
  0x53   : > { %5461 = dma.hbm_to_vmem [thread:$0]  (!%p6539_p8), %s8241_s6, 4096, %s418_s22, [#allocation14], %s8240_s12, %s8240_s12, %s8239_s9  }
  0x54   : > { %p6130_p4 = pnand %p6129_p3, %p6123_p11 }
  0x56   : > { %6133 = shalt.err (!%p6130_p4)
}
  0x57   : > { %s8242_s10 = sld [smem:[#allocation76_spill]]  ;;  %s4912_s24 = sadd.s32 4294967294, %s6356_s18  }
  0x58   : > { %p64_p0 = scmp.ne.s32.totalorder %s6336_s30, %s6332_s29  ;;  %p8161_p9 = scmp.eq.s32.totalorder %s6356_s18, 0 }
  0x59   : > { %p70_p7 = scmp.ne.s32.totalorder %s6332_s29, %s6328_s28  ;;  %p338_p10 = scmp.eq.s32.totalorder %s4912_s24, 3 }
  0x5a   : > { %p66_p11 = por %p8161_p9, %p64_p0  ;;  %p6600_p12 = por %p8169_p2, %p64_p0 }
  0x5b   : > { %p6606_p13 = por %p8165_p1, %p70_p7  ;;  %p8248_p3 = scmp.ne.s32.totalorder %s6320_s26, %s6316_s25 }
  0x5c   : > { %s8243_s13 = scalar_select %p6600_p12, 1, 0 }
  0x5d   : > { %5464 = dma.hbm_to_vmem [thread:$0]  (!%p6539_p8), %s8242_s10, 2048, %s440_s8, [#allocation17], %s6362_s15, %s6362_s15, %s6363_s7  }
  0x5e   : > { %8244 = sst [smem:[#allocation35_spill]] %s8243_s13  ;;  %p6610_p8 = por %p338_p10, %p70_p7 }
  0x5f   : > { %p6617_p4 = por %p338_p10, %p8248_p3  ;;  %p5483_p9 = scmp.lt.s32.totalorder %s6356_s18, 4 }
  0x60   : > { %s8246_s7 = scalar_select %p6610_p8, 1, 0 }
  0x61   : > { %s8249_s15 = scalar_select %p6617_p4, 1, 0 }
  0x62   : > { %8247 = sst [smem:[#allocation36_spill]] %s8246_s7  ;;  %s456_s8 = sand.u32 1, %s6336_s30  }
  0x63   : > { %8250 = sst [smem:[#allocation37_spill]] %s8249_s15  ;;  %s5138_s2 = sshll.u32 %s6352_s17, 9 }
  0x64   : > { %s4919_s23 = sshll.u32 %s456_s8, 5  ;;  %s8251_s0 = sld [smem:[#allocation66_spill]] }
  0x65   : > { %s460_s6 = scalar_lea.vmem [#allocation7], %s4919_s23  ;;  %p6629_p0 = pnand %p5483_p9, %p66_p11 }
  0x66   : > { %s467_s10 = sshll.u32 %s460_s6, 4  ;;  %s457_s25 = scalar_lea.sflag [#allocation8], %s456_s8  ;;  %s468_s10 = int_to_ptr.vmem [resolvable:$true] %s467_s10 }
  0x67   : > { %p6136_p7 = pneg %p6629_p0  ;;  %s6147_s15 = scalar_lea.vmem %s468_s10, 512 }
  0x68   : > { %p6148_p10 = scmp.ne.s32.totalorder %s468_s10, %s6147_s15  ;;  %s6366_s7 = smov [#allocation7]  }
  0x69   : > { %s6152_s13 = sshll.u32 %s6366_s7, 4  ;;  %s6153_s13 = int_to_ptr.vmem [resolvable:$false] %s6152_s13 }
  0x6a   : > { %s466_s4 = scalar_lea.hbm %s8251_s0, %s5138_s2  ;;  %p6150_p3 = pnand %p6148_p10, %p6136_p7 }
  0x6b   : > { %s6154_s22 = scalar_lea.vmem %s6153_s13, 1024  ;;  %p6155_p2 = scmp.lt.s32.totalorder %s468_s10, %s6153_s13 }
  0x6c   : > { %p6151_p1 = pneg %p6150_p3  ;;  %p6156_p4 = scmp.lt.s32.totalorder %s6154_s22, %s6147_s15 }
  0x6e   : > { %p6157_p8 = por %p6156_p4, %p6155_p2 }
  0x70   : > { %p6158_p11 = pnand %p6157_p8, %p6151_p1 }
  0x72   : > { %6161 = shalt.err (!%p6158_p11)
}
  0x73   : > { %5468 = dma.hbm_to_vmem [thread:$0]  (!%p6629_p0), %s466_s4, 512, %s468_s10, %s457_s25, %s8240_s12, %s8240_s12, %s8239_s9  }
  0x74   : > { %s57_s6 = sadd.s32 1, %s6336_s30  ;;  %s47_s28 = sadd.s32 1, %s6348_s16 }
  0x75   : > { %p48_p1 = scmp.ge.s32.totalorder %s47_s28, 2  ;;  %s85_s13 = sadd.s32 1, %s6324_s27 }
  0x76   : > { %p92_p2 = scmp.ne.s32.totalorder %s6324_s27, %s6320_s26  ;;  %s479_s7 = sand.u32 1, %s6324_s27  }
  0x77   : > { %s8383_s28 = smov (%p48_p1, %s47_s28), 0  ;;  %s8254_s15 = sadd.s32 1, %s6352_s17 }
  0x78   : > { %8253 = sst [smem:[#allocation38_spill]] %s8383_s28  ;;  %s8385_s15 = smov (!%p48_p1, %s8254_s15), %s6352_s17 }
  0x79   : > { %s81_s8 = ssub.s32 %s6348_s16, %s8383_s28  ;;  %s477_s2 = sand.u32 1, %s6356_s18  }
  0x7a   : > { %p52_p8 = scmp.ge.s32.totalorder %s8385_s15, 2  ;;  %p8255_p4 = scmp.eq.s32.totalorder %s6514_s19, 3 }
  0x7b   : > { %p8258_p7 = scmp.eq.s32.totalorder %s6356_s18, 0  ;;  %s4922_s25 = sshll.u32 %s479_s7, 5 }
  0x7c   : > { %p6656_p0 = por %p8255_p4, %p92_p2  ;;  %s8387_s15 = smov (%p52_p8, %s8385_s15), 0 }
  0x7d   : > { %p6662_p10 = por %p92_p2, %p8258_p7  ;;  %8260 = sst [smem:[#allocation40_spill]] %s8387_s15 }
  0x7e   : > { %s8256_s4 = scalar_select %p6656_p0, 1, 0 }
  0x7f   : > { %s4923_s23 = sshll.u32 %s6348_s16, 2  ;;  %s54_s24 = ssub.s32 %s6352_s17, %s8387_s15 }
  0x80   : > { %8257 = sst [smem:[#allocation39_spill]] %s8256_s4  ;;  %s4924_s22 = sshll.u32 %s6352_s17, 3 }
  0x81   : > { %p55_p3 = scmp.eq.s32.totalorder %s54_s24, 0  ;;  %s82_s0 = sor.u32 %s81_s8, %s54_s24 }
  0x82   : > { %p83_p11 = scmp.eq.s32.totalorder %s82_s0, 0  ;;  %s487_s28 = sadd.s32 %s4924_s22, %s4923_s23 }
  0x83   : > { %s6673_s5 = scalar_select %p55_p3, %s6336_s30, %s57_s6  }
  0x84   : > { %s6676_s4 = scalar_select %p83_p11, %s6324_s27, %s85_s13  }
  0x85   : > { %s4925_s3 = sshll.u32 %s487_s28, 7  ;;  %s481_s14 = scalar_lea.vmem [#allocation10], %s4922_s25 }
  0x86   : > { %s490_s20 = sshll.u32 %s481_s14, 4  ;;  %s8261_s1 = sld [smem:[#allocation67_spill]]  ;;  %s491_s20 = int_to_ptr.vmem [resolvable:$true] %s490_s20 }
  0x87   : > { %p6685_p1 = pnand %p5483_p9, %p6662_p10  ;;  %s478_s0 = scalar_lea.sflag [#allocation11], %s477_s2 }
  0x88   : > { %s6175_s6 = scalar_lea.vmem %s491_s20, 512  ;;  %s6367_s14 = smov [#allocation10]  }
  0x89   : > { %p6164_p2 = pneg %p6685_p1  ;;  %p6176_p8 = scmp.ne.s32.totalorder %s491_s20, %s6175_s6 }
  0x8a   : > { %s6180_s28 = sshll.u32 %s6367_s14, 4  ;;  %s6181_s28 = int_to_ptr.vmem [resolvable:$false] %s6180_s28 }
  0x8b   : > { %p6178_p4 = pnand %p6176_p8, %p6164_p2  ;;  %s6182_s26 = scalar_lea.vmem %s6181_s28, 1024 }
  0x8c   : > { %s489_s19 = scalar_lea.hbm %s8261_s1, %s4925_s3  ;;  %p6183_p3 = scmp.lt.s32.totalorder %s491_s20, %s6181_s28 }
  0x8d   : > { %p6179_p7 = pneg %p6178_p4  ;;  %p6184_p11 = scmp.lt.s32.totalorder %s6182_s26, %s6175_s6 }
  0x8f   : > { %p6185_p0 = por %p6184_p11, %p6183_p3 }
  0x91   : > { %p6186_p12 = pnand %p6185_p0, %p6179_p7 }
  0x93   : > { %6189 = shalt.err (!%p6186_p12)
}
  0x94   : > { %5471 = dma.hbm_to_vmem [thread:$0]  (!%p6685_p1), %s489_s19, 512, %s491_s20, %s478_s0, %s8240_s12, %s8240_s12, %s8239_s9  }
  0x95   : > { %502 = sbr.rel (%p6531_p6) target bundleno = 3939 (0xf63), region = 68 }
  0x9a   : > { %s6699_s3 = sand.u32 1, %s6332_s29  }
  0x9b   : > { %s4927_s13 = sshll.u32 %s6699_s3, 5  ;;  %s505_s8 = scalar_lea.sflag [#allocation8], %s6699_s3 }
  0x9c   : > { %s6703_s2 = scalar_lea.vmem [#allocation7], %s4927_s13 }
  0x9d   : > { %6287 = dma.done.wait (%p6606_p13), %s505_s8, 512  }
  0x9e   : > { %6289 = vsyncadd (%p6606_p13), %s505_s8, 4294966784  ;;  %s8263_s15 = sld [smem:[#allocation33_spill]] }
  0x9f   : > { %s8264_s19 = sld [smem:[#allocation29_spill]] }
  0xa4   : > { %s513_s21 = sand.u32 1, %s8263_s15  }
  0xa5   : > { %s8211_s9 = sand.u32 1, %s8264_s19   ;;  %s514_s10 = scalar_lea.sflag [#allocation11], %s513_s21 }
  0xa6   : > { %s4928_s12 = sshll.u32 %s8211_s9, 5 }
  0xa7   : > { %s6713_s25 = scalar_lea.vmem [#allocation10], %s4928_s12 }
  0xa8   : > { %6291 = dma.done.wait (%p6527_p5), %s514_s10, 512  }
  0xa9   : > { %6293 = vsyncadd (%p6527_p5), %s514_s10, 4294966784  ;;  %p8266_p6 = scmp.eq.s32.totalorder %s8263_s15, 0 }
  0xab   : > { %6295 = dma.done.wait (%p8266_p6), [#allocation11], 2048   ;;  %p8267_p9 = pmov %p8266_p6 }
  0xac   : > { %p8268_p12 = pmov %p8266_p6 }
  0xad   : > { %6297 = vsyncadd (%p8267_p9), [#allocation11], 4294965248 }
  0xae   : > { %6299 = dma.done.wait (%p8268_p12), [#allocation14], 5120   ;;  %p8269_p13 = pmov %p8266_p6 }
  0xaf   : > { %p8270_p0 = pmov %p8266_p6 }
  0xb0   : > { %6301 = vsyncadd (%p8269_p13), [#allocation14], 4294962176 }
  0xb1   : > { %6303 = dma.done.wait (%p8270_p0), [#allocation17], 2048   ;;  %p8271_p10 = pmov %p8270_p0 }
  0xb2   : > { %s6731_s11 = scalar_lea.vmem [#allocation18], %s4927_s13  ;;  %s6733_s23 = scalar_lea.vmem [#allocation19], %s4928_s12 }
  0xb3   : > { %6305 = vsyncadd (%p8271_p10), [#allocation17], 4294965248  ;;  %s8272_s24 = sld [smem:[#allocation31_spill]] }
  0xb9   : > { %p4935_p5 = scmp.ne.s32.totalorder %s8272_s24, 0 }
  0xba   : > { %s8273_s0 = sld [smem:[#allocation69_spill]] (!%p4935_p5) }
  0xbb   : > { %592 = sbr.rel (%p4935_p5) target bundleno = 430 (0x1ae), region = 96 }
  0xc0   : > { %v5603_v0 = vld [vmem:[#allocation12 + $0x74] ss:$8 sps:$4 sm:$0xff]   ;;  %v5605_v1 = vld [vmem:[#allocation12 + $0x70] ss:$8 sps:$4 sm:$0xff]   ;;  %v6368_v2 = vmov 0   ;;  %v593_v17 = vld [vmem:[%s6703_s2] sm:$0xff]  ;;  %v617_v25 = vlaneseq }
  0xc1   : > { %739 = vmatprep.mubr.bf16.mxu0 %v6368_v2  ;;  %749 = vmatprep.mubr.bf16.mxu1 %v6368_v2  ;;  %v5606_v3 = vld [vmem:[#allocation12 + $0x64] ss:$8 sps:$4 sm:$0xff]   ;;  %v5608_v4 = vld [vmem:[#allocation12 + $0x60] ss:$8 sps:$4 sm:$0xff]   ;;  %v5609_v5 = vld [vmem:[#allocation12 + $0x54] ss:$8 sps:$4 sm:$0xff]  }
  0xc2   : > { %707 = vmatprep.subr.bf16.mxu0 %v5603_v0  ;;  %5404 = vmatprep.subr.bf16.mxu1 %v5603_v0  ;;  %v5611_v6 = vld [vmem:[#allocation12 + $0x50] ss:$8 sps:$4 sm:$0xff]   ;;  %v5612_v7 = vld [vmem:[#allocation12 + $0x44] ss:$8 sps:$4 sm:$0xff]   ;;  %v5614_v8 = vld [vmem:[#allocation12 + $0x40] ss:$8 sps:$4 sm:$0xff]  }
  0xc3   : > { %708 = vmatpush1.bf16.msra.mxu0 %v5605_v1  ;;  %5412 = vmatpush1.bf16.msra.mxu1 %v5605_v1  ;;  %v5615_v9 = vld [vmem:[#allocation12 + $0x34] ss:$8 sps:$4 sm:$0xff]   ;;  %v5617_v10 = vld [vmem:[#allocation12 + $0x30] ss:$8 sps:$4 sm:$0xff]   ;;  %v5618_v11 = vld [vmem:[#allocation12 + $0x24] ss:$8 sps:$4 sm:$0xff]  }
  0xc4   : > { %709 = vmatprep.subr.bf16.mxu0 %v5606_v3  ;;  %5405 = vmatprep.subr.bf16.mxu1 %v5606_v3  ;;  %v5620_v12 = vld [vmem:[#allocation12 + $0x20] ss:$8 sps:$4 sm:$0xff]   ;;  %v5621_v13 = vld [vmem:[#allocation12 + $0x14] ss:$8 sps:$4 sm:$0xff]   ;;  %v5623_v14 = vld [vmem:[#allocation12 + $0x10] ss:$8 sps:$4 sm:$0xff]  }
  0xc5   : > { %v5624_v15 = vld [vmem:[#allocation12 + $0x4] ss:$8 sps:$4 sm:$0xff]   ;;  %v5626_v16 = vld [vmem:[#allocation12] ss:$8 sps:$4 sm:$0xff]   ;;  %v595_v19 = vld [vmem:[%s6703_s2 + $0x10] sm:$0xff]  ;;  %vm788_vm0 = vcmask 31744  }
  0xc6   : > { %v594_v18 = vld [vmem:[%s6703_s2 + $0x8] sm:$0xff]  ;;  %v596_v20 = vld [vmem:[%s6703_s2 + $0x18] sm:$0xff]  ;;  %v6369_v23 = vmov -inf   ;;  %v6370_v24 = vmov 0.0   ;;  %v618_v26 = vshrl.u32 %v617_v25, 7 }
  0xc7   : > { %710 = vmatpush1.bf16.msra.mxu0 %v5608_v4  ;;  %5413 = vmatpush1.bf16.msra.mxu1 %v5608_v4  ;;  %v597_v21 = vpack.c.bf16 %v594_v18, %v593_v17  ;;  %v598_v22 = vpack.c.bf16 %v596_v20, %v595_v19  ;;  %789 = vst.msk [vmem:[#allocation3] sm:$0xff] %vm788_vm0, %v6369_v23  ;;  %790 = vst.msk [vmem:[#allocation3 + $0x8] sm:$0xff] %vm788_vm0, %v6369_v23  ;;  %v615_v29 = vld [vmem:[%s8273_s0] sm:$0x3] }
  0xc8   : > { %711 = vmatprep.subr.bf16.mxu0 %v5609_v5  ;;  %5406 = vmatprep.subr.bf16.mxu1 %v5609_v5  ;;  %791 = vst.msk [vmem:[#allocation3 + $0x10] sm:$0xff] %vm788_vm0, %v6369_v23  ;;  %792 = vst.msk [vmem:[#allocation3 + $0x18] sm:$0xff] %vm788_vm0, %v6369_v23  ;;  %v619_v27 = vsub.s32 0, %v618_v26  ;;  %v623_v28 = vsub.s32 1, %v618_v26 }
  0xc9   : > { %793 = vst.msk [vmem:[#allocation4] sm:$0xff] %vm788_vm0, %v6370_v24  ;;  %794 = vst.msk [vmem:[#allocation4 + $0x8] sm:$0xff] %vm788_vm0, %v6370_v24 }
  0xca   : > { %795 = vst.msk [vmem:[#allocation4 + $0x10] sm:$0xff] %vm788_vm0, %v6370_v24  ;;  %796 = vst.msk [vmem:[#allocation4 + $0x18] sm:$0xff] %vm788_vm0, %v6370_v24  ;;  %v620_v30 = vrot.slane %v615_v29, %v619_v27  ;;  %v624_v31 = vrot.slane %v615_v29, %v623_v28 }
  0xcb   : > { %712 = vmatpush1.bf16.msra.mxu0 %v5611_v6  ;;  %5414 = vmatpush1.bf16.msra.mxu1 %v5611_v6  ;;  %797 = vst [vmem:[#allocation5] sm:$0xff] %v6370_v24  ;;  %798 = vst [vmem:[#allocation5 + $0x8] sm:$0xff] %v6370_v24 }
  0xcc   : > { %713 = vmatprep.subr.bf16.mxu0 %v5612_v7  ;;  %5407 = vmatprep.subr.bf16.mxu1 %v5612_v7  ;;  %799 = vst [vmem:[#allocation5 + $0x10] sm:$0xff] %v6370_v24  ;;  %800 = vst [vmem:[#allocation5 + $0x18] sm:$0xff] %v6370_v24 }
  0xcf   : > { %714 = vmatpush1.bf16.msra.mxu0 %v5614_v8  ;;  %5415 = vmatpush1.bf16.msra.mxu1 %v5614_v8 }
  0xd0   : > { %715 = vmatprep.subr.bf16.mxu0 %v5615_v9  ;;  %5408 = vmatprep.subr.bf16.mxu1 %v5615_v9 }
  0xd3   : > { %716 = vmatpush1.bf16.msra.mxu0 %v5617_v10  ;;  %5416 = vmatpush1.bf16.msra.mxu1 %v5617_v10 }
  0xd4   : > { %717 = vmatprep.subr.bf16.mxu0 %v5618_v11  ;;  %5409 = vmatprep.subr.bf16.mxu1 %v5618_v11 }
  0xd7   : > { %718 = vmatpush1.bf16.msra.mxu0 %v5620_v12  ;;  %5417 = vmatpush1.bf16.msra.mxu1 %v5620_v12 }
  0xd8   : > { %719 = vmatprep.subr.bf16.mxu0 %v5621_v13  ;;  %5410 = vmatprep.subr.bf16.mxu1 %v5621_v13 }
  0xdb   : > { %720 = vmatpush1.bf16.msra.mxu0 %v5623_v14  ;;  %5418 = vmatpush1.bf16.msra.mxu1 %v5623_v14 }
  0xdc   : > { %721 = vmatprep.subr.bf16.mxu0 %v5624_v15  ;;  %5411 = vmatprep.subr.bf16.mxu1 %v5624_v15 }
  0xdf   : > { %722 = vmatpush1.bf16.msra.mxu0 %v5626_v16  ;;  %5419 = vmatpush1.bf16.msra.mxu1 %v5626_v16 }
  0xe2   : > { %740 = vmatmul.mubr.bf16.vlgmr.msra.gmra.mxu0 %v597_v21  ;;  %750 = vmatmul.mubr.bf16.vlgmr.msra.gmra.mxu1 %v598_v22 }
 0x1a2   : > { %v741_v32 = vpop.f32.mrf.mxu0  ;;  %v751_v33 = vpop.f32.mrf.mxu1 }
 0x1a3   : > { %v742_v36 = vadd.f32 %v741_v32, %v620_v30  ;;  %v752_v37 = vadd.f32 %v751_v33, %v620_v30 }
 0x1a4   : > { %v743_v34 = vpop.f32.mrf.mxu0  ;;  %v753_v35 = vpop.f32.mrf.mxu1 }
 0x1a5   : > { %v744_v38 = vadd.f32 %v743_v34, %v624_v31  ;;  %v754_v39 = vadd.f32 %v753_v35, %v624_v31 }
 0x1a6   : > { %v745_v40 = vpop.f32.mrf.mxu0  ;;  %v755_v41 = vpop.f32.mrf.mxu1 }
 0x1a7   : > { %v5139_v42 = vpack.c.bf16 %v744_v38, %v742_v36  ;;  %v5141_v43 = vpack.c.bf16 %v754_v39, %v752_v37  ;;  %v746_v46 = vadd.f32 %v745_v40, %v620_v30  ;;  %v756_v47 = vadd.f32 %v755_v41, %v620_v30 }
 0x1a8   : > { %v747_v44 = vpop.f32.mrf.mxu0  ;;  %v757_v45 = vpop.f32.mrf.mxu1 }
 0x1a9   : > { %784 = vst [vmem:[#allocation2] sm:$0xff] %v5139_v42  ;;  %786 = vst [vmem:[#allocation2 + $0x10] sm:$0xff] %v5141_v43  ;;  %v748_v48 = vadd.f32 %v747_v44, %v624_v31  ;;  %v758_v49 = vadd.f32 %v757_v45, %v624_v31 }
 0x1ab   : > { %v5140_v50 = vpack.c.bf16 %v748_v48, %v746_v46  ;;  %v5142_v51 = vpack.c.bf16 %v758_v49, %v756_v47 }
 0x1ad   : > { %785 = vst [vmem:[#allocation2 + $0x8] sm:$0xff] %v5140_v50  ;;  %787 = vst [vmem:[#allocation2 + $0x18] sm:$0xff] %v5142_v51 }
 0x1ae PF: > { %v5642_v52 = vld [vmem:[#allocation12 + $0x74] ss:$8 sps:$4 sm:$0xff]   ;;  %v5644_v53 = vld [vmem:[#allocation12 + $0x70] ss:$8 sps:$4 sm:$0xff]   ;;  %v8186_v54 = vmov 0   ;;  %v801_v5 = vld [vmem:[%s6713_s25] sm:$0xff]  ;;  %v825_v15 = vlaneseq }
 0x1af   : > { %947 = vmatprep.mubr.bf16.mxu0 %v8186_v54  ;;  %5627 = vset.pattern.permute.xlu0 %v8186_v54  ;;  %v5645_v55 = vld [vmem:[#allocation12 + $0x64] ss:$8 sps:$4 sm:$0xff]   ;;  %v5647_v56 = vld [vmem:[#allocation12 + $0x60] ss:$8 sps:$4 sm:$0xff]   ;;  %v5648_v57 = vld [vmem:[#allocation12 + $0x54] ss:$8 sps:$4 sm:$0xff]  }
 0x1b0   : > { %915 = vmatprep.subr.bf16.mxu0 %v5642_v52  ;;  %v5650_v58 = vld [vmem:[#allocation12 + $0x50] ss:$8 sps:$4 sm:$0xff]   ;;  %v5651_v59 = vld [vmem:[#allocation12 + $0x44] ss:$8 sps:$4 sm:$0xff]   ;;  %v5653_v60 = vld [vmem:[#allocation12 + $0x40] ss:$8 sps:$4 sm:$0xff]  }
 0x1b1   : > { %916 = vmatpush1.bf16.msra.mxu0 %v5644_v53  ;;  %v5654_v61 = vld [vmem:[#allocation12 + $0x34] ss:$8 sps:$4 sm:$0xff]   ;;  %v5656_v62 = vld [vmem:[#allocation12 + $0x30] ss:$8 sps:$4 sm:$0xff]   ;;  %v5657_v63 = vld [vmem:[#allocation12 + $0x24] ss:$8 sps:$4 sm:$0xff]  }
 0x1b2   : > { %917 = vmatprep.subr.bf16.mxu0 %v5645_v55  ;;  %v5659_v0 = vld [vmem:[#allocation12 + $0x20] ss:$8 sps:$4 sm:$0xff]   ;;  %v5660_v1 = vld [vmem:[#allocation12 + $0x14] ss:$8 sps:$4 sm:$0xff]   ;;  %v5662_v2 = vld [vmem:[#allocation12 + $0x10] ss:$8 sps:$4 sm:$0xff]  }
 0x1b3   : > { %v5663_v3 = vld [vmem:[#allocation12 + $0x4] ss:$8 sps:$4 sm:$0xff]   ;;  %v5665_v4 = vld [vmem:[#allocation12] ss:$8 sps:$4 sm:$0xff]   ;;  %v803_v8 = vld [vmem:[%s6713_s25 + $0x10] sm:$0xff]  ;;  %s6372_s6 = smov 96  }
 0x1b4   : > { %v802_v6 = vld [vmem:[%s6713_s25 + $0x8] sm:$0xff]  ;;  %v804_v9 = vld [vmem:[%s6713_s25 + $0x18] sm:$0xff]  ;;  %vm990_vm1 = vcmask 261120   ;;  %v826_v16 = vshrl.u32 %v825_v15, 7  ;;  %s8274_s26 = sld [smem:[#allocation69_spill]]  ;;  %s6373_s13 = smov 64  }
 0x1b5   : > { %918 = vmatpush1.bf16.msra.mxu0 %v5647_v56  ;;  %v6747_v7 = vpack.c.bf16 %v802_v6, %v801_v5  ;;  %v6753_v10 = vpack.c.bf16 %v804_v9, %v803_v8  ;;  %v5666_v11 = vld [vmem:[#allocation2] ss:$8 sps:$4 sm:$0xff]   ;;  %v5667_v12 = vld [vmem:[#allocation2 + $0x10] ss:$8 sps:$4 sm:$0xff]   ;;  %s6374_s8 = smov 32   ;;  %vm1140_vm2 = vcmask 7168  }
 0x1b6   : > { %919 = vmatprep.subr.bf16.mxu0 %v5648_v57  ;;  %1388 = vrot.lane.b32.xlu1 %v5666_v11, %s6372_s6  ;;  %v5670_v13 = vld [vmem:[#allocation2] ss:$8 sps:$4 sm:$0xff]   ;;  %v6760_v17 = vsub.s32 0, %v826_v16  ;;  %v5668_v28 = vld [vmem:[#allocation2 + $0x10] ss:$8 sps:$4 sm:$0xff]   ;;  %v6768_v33 = vsub.s32 1, %v826_v16 }
 0x1b7   : > { %5272 = vmatprep.mubr.msk.bf16.mxu1 %vm990_vm1, %v5670_v13  ;;  %v5673_v37 = vld [vmem:[#allocation2 + $0x10] ss:$8 sps:$4 sm:$0xff]   ;;  %v5669_v43 = vld [vmem:[#allocation2] ss:$8 sps:$4 sm:$0xff]   ;;  %vm1547_vm3 = vcmask 15368   ;;  %vm1997_vm4 = vcmask 23568  }
 0x1b8   : > { %v5671_v45 = vld [vmem:[#allocation2 + $0x10] ss:$8 sps:$4 sm:$0xff]   ;;  %v5672_v48 = vld [vmem:[#allocation2] ss:$8 sps:$4 sm:$0xff]   ;;  %vm2445_vm5 = vcmask 31768   ;;  %vm1665_vm6 = vcmask 523520  }
 0x1b9   : > { %920 = vmatpush1.bf16.msra.mxu0 %v5650_v58  ;;  %vm2113_vm7 = vcmask 785920   ;;  %vm2561_vm8 = vcmask 1048320   ;;  %s8301_s20 = sld [smem:[#allocation71_spill]] }
 0x1ba   : > { %921 = vmatprep.subr.bf16.mxu0 %v5651_v59  ;;  %1390 = vrot.lane.b32.xlu1 %v5667_v12, %s6372_s6  ;;  %v823_v18 = vld [vmem:[%s8274_s26] sm:$0x3]  ;;  %s8302_s10 = sld [smem:[#allocation73_spill]] }
 0x1bb   : > { %v828_v20 = vrot.slane %v823_v18, %v6760_v17  ;;  %v832_v38 = vrot.slane %v823_v18, %v6768_v33  ;;  %s8321_s7 = sld [smem:[#allocation74_spill]] }
 0x1bc   : > { %s8323_s28 = sld [smem:[#allocation75_spill]] }
 0x1bd   : > { %922 = vmatpush1.bf16.msra.mxu0 %v5653_v60 }
 0x1be   : > { %923 = vmatprep.subr.bf16.mxu0 %v5654_v61 }
 0x1c1   : > { %924 = vmatpush1.bf16.msra.mxu0 %v5656_v62 }
 0x1c2   : > { %925 = vmatprep.subr.bf16.mxu0 %v5657_v63 }
 0x1c5   : > { %926 = vmatpush1.bf16.msra.mxu0 %v5659_v0 }
 0x1c6   : > { %927 = vmatprep.subr.bf16.mxu0 %v5660_v1 }
 0x1c9   : > { %928 = vmatpush1.bf16.msra.mxu0 %v5662_v2 }
 0x1ca   : > { %929 = vmatprep.subr.bf16.mxu0 %v5663_v3 }
 0x1cd   : > { %930 = vmatpush1.bf16.msra.mxu0 %v5665_v4 }
 0x1d0   : > { %948 = vmatmul.mubr.bf16.vlgmr.msra.gmra.mxu0 %v6747_v7 }
 0x1d1   : > { %957 = vmatprep.mubr.bf16.mxu0 %v8186_v54 }
 0x1d8   : > { %958 = vmatmul.mubr.bf16.gmra.mxu0 %v6753_v10 }
 0x228   : > { %v1389_v14 = vpop.permute.xlu1 %1388 }
 0x229   : > { %5296 = vmatprep.mubr.msk.bf16.mxu0 %vm990_vm1, %v1389_v14 }
 0x22c   : > { %v1391_v55 = vpop.permute.xlu1 %1390 }
 0x290   : > { %v949_v19 = vpop.f32.mrf.mxu0 }
 0x291   : > { %v950_v23 = vadd.f32 %v949_v19, %v828_v20 }
 0x292   : > { %v951_v21 = vpop.f32.mrf.mxu0 }
 0x293   : > { %v952_v46 = vadd.f32 %v951_v21, %v832_v38 }
 0x294   : > { %v953_v22 = vpop.f32.mrf.mxu0 }
 0x295   : > { %v954_v24 = vadd.f32 %v953_v22, %v828_v20 }
 0x296   : > { %v955_v25 = vpop.f32.mrf.mxu0 }
 0x297   : > { %v968_v26 = vpack.c.bf16 %v954_v24, %v950_v23  ;;  %v956_v44 = vadd.f32 %v955_v25, %v832_v38 }
 0x298   : > { %v959_v27 = vpop.f32.mrf.mxu0 }
 0x299   : > { %1844 = vrot.lane.b32.xlu1 %v968_v26, %s6373_s13  ;;  %v960_v31 = vadd.f32 %v959_v27, %v828_v20  ;;  %v998_v42 = vsel %vm990_vm1, %v968_v26, 0  ;;  %v6784_v47 = vpack.c.bf16 %v956_v44, %v952_v46 }
 0x29a   : > { %v961_v29 = vpop.f32.mrf.mxu0 }
 0x29b   : > { %v962_v40 = vadd.f32 %v961_v29, %v832_v38 }
 0x29c   : > { %v963_v30 = vpop.f32.mrf.mxu0 }
 0x29d   : > { %v964_v32 = vadd.f32 %v963_v30, %v828_v20  ;;  %1842 = vrot.lane.b32.xlu1 %v5668_v28, %s6373_s13 }
 0x29e   : > { %v965_v36 = vpop.f32.mrf.mxu0 }
 0x29f   : > { %v970_v34 = vpack.c.bf16 %v964_v32, %v960_v31  ;;  %v966_v39 = vadd.f32 %v965_v36, %v832_v38 }
 0x2a1   : > { %1396 = vrot.lane.b32.xlu0 %v970_v34, %s6372_s6  ;;  %5420 = vmatprep.subr.msk.bf16.mxu1 %vm990_vm1, %v970_v34  ;;  %v1001_v35 = vsel %vm990_vm1, %v970_v34, 0  ;;  %v6778_v41 = vpack.c.bf16 %v966_v39, %v962_v40 }
 0x2a2   : > { %2292 = vrot.lane.b32.xlu1 %v968_v26, %s6374_s8  ;;  %5269 = vmatpush3.bf16.xpose.msra.mxu1 %v1001_v35 }
 0x2a3   : > { %5421 = vmatprep.subr.msk.bf16.mxu1 %vm990_vm1, %v968_v26 }
 0x2a5   : > { %1394 = vrot.lane.b32.xlu0 %v968_v26, %s6372_s6 }
 0x2a6   : > { %2290 = vrot.lane.b32.xlu1 %v5673_v37, %s6374_s8 }
 0x2a9   : > { %1846 = vrot.lane.b32.xlu0 %v970_v34, %s6373_s13 }
 0x2aa   : > { %5271 = vmatpush3.bf16.xpose.msra.mxu1 %v998_v42 }
 0x2ab   : > { %5276 = vmatprep.subr.bf16.mxu1 %v6778_v41 }
 0x2ad   : > { %1840 = vrot.lane.b32.xlu0 %v5669_v43, %s6373_s13 }
 0x2b1   : > { %2294 = vrot.lane.b32.xlu0 %v970_v34, %s6374_s8  ;;  %5273 = vmatmul.mubr.msk.bf16.vlgmr.msra.gmra.mxu1 %vm990_vm1, %v5671_v45 }
 0x2b2   : > { %5277 = vmatpush3.bf16.msra.mxu1 %v6778_v41 }
 0x2b3   : > { %5278 = vmatprep.subr.bf16.mxu1 %v6784_v47 }
 0x2b5   : > { %2288 = vrot.lane.b32.xlu0 %v5672_v48, %s6374_s8 }
 0x2b6   : > { %5279 = vmatpush3.bf16.msra.mxu1 %v6784_v47 }
 0x2b9   : > { %1584 = vrot.lane.b32.xlu0 %v6784_v47, %s6372_s6 }
 0x30b   : > { %v1845_v58 = vpop.permute.xlu1 %1844 }
 0x30c   : > { %v1855_v59 = vsel %vm990_vm1, %v1845_v58, 0 }
 0x30f   : > { %v1843_v61 = vpop.permute.xlu1 %1842 }
 0x313   : > { %v1397_v49 = vpop.permute.xlu0 %1396 }
 0x314   : > { %5422 = vmatprep.subr.msk.bf16.mxu0 %vm990_vm1, %v1397_v49  ;;  %v1408_v50 = vsel %vm990_vm1, %v1397_v49, 0  ;;  %v2293_v0 = vpop.permute.xlu1 %2292 }
 0x315   : > { %5293 = vmatpush3.bf16.xpose.msra.mxu0 %v1408_v50  ;;  %v2303_v1 = vsel %vm990_vm1, %v2293_v0, 0 }
 0x317   : > { %v1395_v51 = vpop.permute.xlu0 %1394 }
 0x318   : > { %5423 = vmatprep.subr.msk.bf16.mxu0 %vm990_vm1, %v1395_v51  ;;  %v1405_v52 = vsel %vm990_vm1, %v1395_v51, 0  ;;  %v2291_v2 = vpop.permute.xlu1 %2290 }
 0x31b   : > { %v1847_v53 = vpop.permute.xlu0 %1846 }
 0x31c   : > { %v1858_v57 = vsel %vm990_vm1, %v1847_v53, 0 }
 0x31d   : > { %5295 = vmatpush3.bf16.xpose.msra.mxu0 %v1405_v52 }
 0x31e   : > { %5424 = vmatprep.subr.msk.bf16.mxu0 %vm990_vm1, %v1847_v53 }
 0x31f   : > { %v1841_v56 = vpop.permute.xlu0 %1840 }
 0x323   : > { %v2295_v60 = vpop.permute.xlu0 %2294 }
 0x324   : > { %5297 = vmatmul.mubr.msk.bf16.vlgmr.msra.gmra.mxu0 %vm990_vm1, %v1391_v55  ;;  %v2306_v63 = vsel %vm990_vm1, %v2295_v60, 0 }
 0x325   : > { %5317 = vmatpush3.bf16.xpose.msra.mxu0 %v1858_v57  ;;  %5320 = vmatprep.mubr.msk.bf16.mxu0 %vm990_vm1, %v1841_v56  ;;  %v6869_v57 = vld [vmem:[#allocation3 + $0x10] sm:$0xff] }
 0x326   : > { %5425 = vmatprep.subr.msk.bf16.mxu0 %vm990_vm1, %v1845_v58 }
 0x327   : > { %v2289_v62 = vpop.permute.xlu0 %2288 }
 0x32b   : > { %v6859_v50 = vpop.permute.xlu0 %1584 }
 0x32d   : > { %5319 = vmatpush3.bf16.xpose.msra.mxu0 %v1855_v59 }
 0x32e   : > { %5426 = vmatprep.subr.msk.bf16.mxu0 %vm990_vm1, %v2295_v60 }
 0x334   : > { %5321 = vmatmul.mubr.msk.bf16.vlgmr.msra.gmra.mxu0 %vm990_vm1, %v1843_v61 }
 0x335   : > { %5341 = vmatpush3.bf16.xpose.msra.mxu0 %v2306_v63  ;;  %5344 = vmatprep.mubr.msk.bf16.mxu0 %vm990_vm1, %v2289_v62 }
 0x336   : > { %5427 = vmatprep.subr.msk.bf16.mxu0 %vm990_vm1, %v2293_v0 }
 0x33d   : > { %5343 = vmatpush3.bf16.xpose.msra.mxu0 %v2303_v1 }
 0x344   : > { %5345 = vmatmul.mubr.msk.bf16.vlgmr.msra.gmra.mxu0 %vm990_vm1, %v2291_v2  ;;  %v6880_v2 = vld [vmem:[#allocation3] sm:$0xff] }
 0x371   : > { %v6811_v3 = vpop.f32.mrf.mxu1 }
 0x372   : > { %v1062_v4 = vsel %vm990_vm1, %v6811_v3, -inf }
 0x373   : > { %v6815_v5 = vpop.f32.mrf.mxu1  ;;  %1063 = vmax.xlane.f32.xlu0 %v1062_v4 }
 0x374   : > { %v1056_v8 = vsel %vm990_vm1, %v6815_v5, -inf }
 0x375   : > { %v6817_v6 = vpop.f32.mrf.mxu1 }
 0x376   : > { %v1065_v9 = vsel %vm990_vm1, %v6817_v6, -inf }
 0x377   : > { %v6823_v11 = vpop.f32.mrf.mxu1  ;;  %1057 = vmax.xlane.f32.xlu0 %v1056_v8  ;;  %v1243_v12 = vmax.f32 %v1062_v4, %v1065_v9 }
 0x378   : > { %v1059_v13 = vsel %vm990_vm1, %v6823_v11, -inf }
 0x379   : > { %1060 = vmax.xlane.f32.xlu1 %v1059_v13  ;;  %v1242_v14 = vmax.f32 %v1056_v8, %v1059_v13 }
 0x37b   : > { %1066 = vmax.xlane.f32.xlu0 %v1065_v9  ;;  %v1244_v15 = vmax.f32 %v1242_v14, %v1243_v12  ;;  %v6887_v12 = vld [vmem:[#allocation3 + $0x8] sm:$0xff] }
 0x37d   : > { %v1245_v16 = vrot.slane %v1244_v15, 4 }
 0x37f   : > { %v1246_v18 = vmax.f32 %v1244_v15, %v1245_v16  ;;  %v6892_v16 = vld [vmem:[#allocation3 + $0x18] sm:$0xff] }
 0x381   : > { %v1247_v19 = vrot.slane %v1246_v18, 2 }
 0x383   : > { %v1248_v20 = vmax.f32 %v1246_v18, %v1247_v19 }
 0x385   : > { %v1249_v21 = vrot.slane %v1248_v20, 1 }
 0x387   : > { %v1250_v22 = vmax.f32 %v1248_v20, %v1249_v21 }
 0x389   : > { %v1251_v23 = vsub.f32 %v6815_v5, %v1250_v22  ;;  %v1252_v24 = vsub.f32 %v6823_v11, %v1250_v22  ;;  %v1253_v30 = vsub.f32 %v6811_v3, %v1250_v22  ;;  %v1254_v38 = vsub.f32 %v6817_v6, %v1250_v22 }
 0x38b   : > { %v1255_v27 = vmul.f32 1.442695, %v1251_v23  ;;  %v1257_v29 = vmul.f32 1.442695, %v1252_v24  ;;  %v1259_v39 = vmul.f32 1.442695, %v1253_v30 }
 0x38c   : > { %v1261_v43 = vmul.f32 1.442695, %v1254_v38 }
 0x38d   : > { %5754 = vpow2.f32 %v1255_v27 }
 0x38e   : > { %5756 = vpow2.f32 %v1257_v29 }
 0x38f   : > { %5758 = vpow2.f32 %v1259_v39 }
 0x390   : > { %5760 = vpow2.f32 %v1261_v43 }
 0x39a   : > { %v6853_v46 = vpop.eup %5754 }
 0x39b   : > { %v6857_v49 = vpop.eup %5756  ;;  %v1263_v58 = vsel %vm990_vm1, %v6853_v46, 0.0 }
 0x39c   : > { %v1264_v59 = vsel %vm990_vm1, %v6857_v49, 0.0  ;;  %v5759_v62 = vpop.eup %5758 }
 0x39d   : > { %v1265_v1 = vadd.f32 %v1264_v59, %v1263_v58  ;;  %v1266_v8 = vsel %vm990_vm1, %v5759_v62, 0.0  ;;  %v5761_v13 = vpop.eup %5760  ;;  %v8182_v58 = vmov 2  }
 0x39e   : > { %v1268_v21 = vsel %vm990_vm1, %v5761_v13, 0.0 }
 0x39f   : > { %v1267_v15 = vadd.f32 %v1266_v8, %v1265_v1 }
 0x3a1   : > { %v1269_v27 = vadd.f32 %v1268_v21, %v1267_v15  ;;  %v5674_v21 = vld [vmem:[#allocation2 + $0x4] ss:$8 sps:$4 sm:$0xff]  }
 0x3e4   : > { %v6829_v25 = vpop.f32.mrf.mxu0 }
 0x3e5   : > { %v1469_v26 = vsel %vm990_vm1, %v6829_v25, -inf }
 0x3e6   : > { %v6833_v28 = vpop.f32.mrf.mxu0  ;;  %1470 = vmax.xlane.f32.xlu1 %v1469_v26 }
 0x3e7   : > { %v1463_v34 = vsel %vm990_vm1, %v6833_v28, -inf }
 0x3e8   : > { %v6836_v31 = vpop.f32.mrf.mxu0 }
 0x3e9   : > { %v1472_v32 = vsel %vm990_vm1, %v6836_v31, -inf }
 0x3ea   : > { %v6842_v35 = vpop.f32.mrf.mxu0  ;;  %v1675_v36 = vmax.f32 %v1469_v26, %v1472_v32  ;;  %1473 = vmax.xlane.f32.xlu0 %v1472_v32  ;;  %1464 = vmax.xlane.f32.xlu1 %v1463_v34 }
 0x3eb   : > { %v1466_v37 = vsel %vm990_vm1, %v6842_v35, -inf }
 0x3ec   : > { %v1674_v40 = vmax.f32 %v1463_v34, %v1466_v37 }
 0x3ee   : > { %v6847_v42 = vmax.f32 %v1674_v40, %v1675_v36  ;;  %1467 = vmax.xlane.f32.xlu0 %v1466_v37  ;;  %v1270_v37 = vrot.slane %v1269_v27, 4 }
 0x3f4   : > { %v6849_v44 = vpop.f32.mrf.mxu0 }
 0x3f5   : > { %v1919_v45 = vsel %vm990_vm1, %v6849_v44, -inf }
 0x3f6   : > { %v6855_v48 = vpop.f32.mrf.mxu0  ;;  %1920 = vmax.xlane.f32.xlu1 %v1919_v45 }
 0x3f7   : > { %v1913_v53 = vsel %vm990_vm1, %v6855_v48, -inf }
 0x3f8   : > { %v6861_v51 = vpop.f32.mrf.mxu0 }
 0x3f9   : > { %v1922_v52 = vsel %vm990_vm1, %v6861_v51, -inf }
 0x3fa   : > { %v6867_v55 = vpop.f32.mrf.mxu0  ;;  %v2123_v56 = vmax.f32 %v1919_v45, %v1922_v52  ;;  %1923 = vmax.xlane.f32.xlu0 %v1922_v52  ;;  %1914 = vmax.xlane.f32.xlu1 %v1913_v53  ;;  %v1271_v45 = vadd.f32 %v1270_v37, %v1269_v27  ;;  %v1677_v37 = vrot.slane %v6847_v42, 4 }
 0x3fb   : > { %v1916_v60 = vsel %vm990_vm1, %v6867_v55, -inf }
 0x3fc   : > { %v1064_v61 = vpop.xlane.xlu0 %1063  ;;  %v2122_v63 = vmax.f32 %v1913_v53, %v1916_v60  ;;  %v1272_v53 = vrot.slane %v1271_v45, 2 }
 0x3fd   : > { %v6878_v0 = vmax.f32 %v6869_v57, %v1064_v61 }
 0x3fe   : > { %1917 = vmax.xlane.f32.xlu0 %v1916_v60  ;;  %v6882_v4 = vmax.f32 %v2122_v63, %v2123_v56  ;;  %v1273_v56 = vadd.f32 %v1272_v53, %v1271_v45 }
 0x3ff   : > { %1240 = vst.msk [vmem:[#allocation3 + $0x10] sm:$0xff] %vm1140_vm2, %v6878_v0 }
 0x400   : > { %v1058_v9 = vpop.xlane.xlu0 %1057  ;;  %v1274_v59 = vrot.slane %v1273_v56, 1 }
 0x401   : > { %v6890_v14 = vmax.f32 %v6880_v2, %v1058_v9 }
 0x402   : > { %v1061_v18 = vpop.xlane.xlu1 %1060  ;;  %v1275_v60 = vadd.f32 %v1274_v59, %v1273_v56 }
 0x403   : > { %1238 = vst.msk [vmem:[#allocation3] sm:$0xff] %vm1140_vm2, %v6890_v14  ;;  %v6899_v20 = vmax.f32 %v6887_v12, %v1061_v18 }
 0x404   : > { %v6902_v22 = vpop.f32.mrf.mxu0  ;;  %v1067_v23 = vpop.xlane.xlu0 %1066  ;;  %5762 = vrcp.f32 %v1275_v60  ;;  %v1678_v60 = vmax.f32 %v6847_v42, %v1677_v37 }
 0x405   : > { %v2367_v24 = vsel %vm990_vm1, %v6902_v22, -inf  ;;  %v6907_v26 = vmax.f32 %v6892_v16, %v1067_v23  ;;  %1239 = vst.msk [vmem:[#allocation3 + $0x8] sm:$0xff] %vm1140_vm2, %v6899_v20  ;;  %v5676_v23 = vld [vmem:[#allocation2 + $0x4] ss:$8 sps:$4 sm:$0xff]  }
 0x406   : > { %v6911_v29 = vpop.f32.mrf.mxu0  ;;  %2368 = vmax.xlane.f32.xlu1 %v2367_v24 }
 0x407   : > { %v2361_v32 = vsel %vm990_vm1, %v6911_v29, -inf  ;;  %1241 = vst.msk [vmem:[#allocation3 + $0x18] sm:$0xff] %vm1140_vm2, %v6907_v26 }
 0x408   : > { %v6919_v34 = vpop.f32.mrf.mxu0 }
 0x409   : > { %v2370_v36 = vsel %vm990_vm1, %v6919_v34, -inf }
 0x40a   : > { %v6923_v38 = vpop.f32.mrf.mxu0  ;;  %2362 = vmax.xlane.f32.xlu1 %v2361_v32  ;;  %v2571_v39 = vmax.f32 %v2367_v24, %v2370_v36  ;;  %v6953_v24 = vld [vmem:[#allocation3 + $0x10] sm:$0xff] }
 0x40b   : > { %v2364_v40 = vsel %vm990_vm1, %v6923_v38, -inf  ;;  %8275 = vst [vmem:[#allocation41_spill] sm:$0xff] %v6953_v24 }
 0x40c   : > { %v2570_v43 = vmax.f32 %v2361_v32, %v2364_v40 }
 0x40e   : > { %v6927_v52 = vmax.f32 %v2570_v43, %v2571_v39  ;;  %v6964_v39 = vld [vmem:[#allocation3 + $0x18] sm:$0xff] }
 0x40f   : > { %8277 = vst [vmem:[#allocation43_spill] sm:$0xff] %v6964_v39 }
 0x411   : > { %v5763_v61 = vpop.eup %5762 }
 0x412   : > { %v1277_v63 = vmul.f32 %v5763_v61, %v6853_v46  ;;  %v1278_v1 = vmul.f32 %v5763_v61, %v6857_v49  ;;  %v1279_v9 = vmul.f32 %v5763_v61, %v5759_v62  ;;  %v1280_v15 = vmul.f32 %v5763_v61, %v5761_v13  ;;  %v5677_v46 = vld [vmem:[#allocation2 + $0x14] ss:$8 sps:$4 sm:$0xff]  }
 0x413   : > { %v8184_v49 = vmov 1   ;;  %v6944_v62 = vld [vmem:[#allocation2 + $0x14] ss:$8 sps:$4 sm:$0xff]  }
 0x414   : > { %1091 = vperm.xlu0 %5627, %v6899_v20   ;;  %v1281_v8 = vpack.c.bf16 %v1278_v1, %v1277_v63  ;;  %v1282_v18 = vpack.c.bf16 %v1280_v15, %v1279_v9  ;;  %v5675_v13 = vld [vmem:[#allocation2 + $0x14] ss:$8 sps:$4 sm:$0xff]   ;;  %5284 = vmatprep.subr.bf16.mxu1 %v6944_v62  ;;  %v6984_v63 = vld [vmem:[#allocation3 + $0x8] sm:$0xff]  ;;  %v1679_v9 = vrot.slane %v1678_v60, 2  ;;  %v2573_v15 = vrot.slane %v6927_v52, 4 }
 0x416   : > { %v1680_v42 = vmax.f32 %v1678_v60, %v1679_v9 }
 0x418   : > { %5630 = vset.pattern.permute.xlu0 %v8182_v58  ;;  %v1681_v37 = vrot.slane %v1680_v42, 1 }
 0x433   : > { %2371 = vmax.xlane.f32.xlu0 %v2370_v36 }
 0x437   : > { %2365 = vmax.xlane.f32.xlu0 %v2364_v40  ;;  %1283 = vxpose.xlu1.c.b16.start [1/2] (short) (narrow) %v1281_v8, 32  ;;  %v6966_v40 = vld [vmem:[#allocation3] sm:$0xff] }
 0x438   : > { %8278 = vst [vmem:[#allocation44_spill] sm:$0xff] %v6966_v40 }
 0x43b   : > { %1284 = vxpose.xlu1.c.b16.end [2/2] (short) (narrow) %v1282_v18, 32  ;;  %v2125_v18 = vrot.slane %v6882_v4, 4 }
 0x43f   : > { %5628 = vset.pattern.permute.xlu1 %v8186_v54 }
 0x440   : > { %1086 = vperm.xlu1 %5628, %v6890_v14  }
 0x444   : > { %1096 = vperm.xlu1 %5628, %v6878_v0  }
 0x448   : > { %1101 = vperm.xlu1 %5628, %v6907_v26  }
 0x44c   : > { %1586 = vrot.lane.b32.xlu1 %v6778_v41, %s6372_s6 }
 0x44d   : > { %1741 = vrot.lane.b32.xlu0 %v5674_v21, %s6372_s6  ;;  %5629 = vset.pattern.permute.xlu1 %v8184_v49  ;;  %v2574_v21 = vmax.f32 %v6927_v52, %v2573_v15  ;;  %v2126_v52 = vmax.f32 %v6882_v4, %v2125_v18  ;;  %v8189_v18 = vmov 3  }
 0x450   : > { %1743 = vrot.lane.b32.xlu1 %v5677_v46, %s6372_s6 }
 0x451   : > { %2034 = vrot.lane.b32.xlu0 %v6778_v41, %s6373_s13 }
 0x455   : > { %2032 = vrot.lane.b32.xlu0 %v6784_v47, %s6373_s13 }
 0x459   : > { %2191 = vrot.lane.b32.xlu0 %v5675_v13, %s6373_s13 }
 0x45d   : > { %2189 = vrot.lane.b32.xlu0 %v5676_v23, %s6373_s13 }
 0x461   : > { %2482 = vrot.lane.b32.xlu0 %v6778_v41, %s6374_s8 }
 0x46f   : > { %v1471_v27 = vpop.xlane.xlu1 %1470 }
 0x470   : > { %v6956_v32 = vmax.f32 %v6953_v24, %v1471_v27 }
 0x472   : > { %8276 = vst [vmem:[#allocation42_spill] sm:$0xff] %v6956_v32  ;;  %1672 = vst.msk [vmem:[#allocation3 + $0x10] sm:$0xff] %vm1547_vm3, %v6956_v32  ;;  %1503 = vperm.xlu1 %5629, %v6956_v32  }
 0x473   : > { %v1474_v41 = vpop.xlane.xlu0 %1473  ;;  %v1465_v43 = vpop.xlane.xlu1 %1464 }
 0x474   : > { %v6969_v45 = vmax.f32 %v6964_v39, %v1474_v41  ;;  %v6972_v53 = vmax.f32 %v6966_v40, %v1465_v43  ;;  %v2575_v41 = vrot.slane %v2574_v21, 2 }
 0x476   : > { %8279 = vst [vmem:[#allocation45_spill] sm:$0xff] %v6969_v45  ;;  %8280 = vst [vmem:[#allocation46_spill] sm:$0xff] %v6972_v53  ;;  %1493 = vperm.xlu1 %5629, %v6972_v53  }
 0x477   : > { %1673 = vst.msk [vmem:[#allocation3 + $0x18] sm:$0xff] %vm1547_vm3, %v6969_v45  ;;  %1670 = vst.msk [vmem:[#allocation3] sm:$0xff] %vm1547_vm3, %v6972_v53  ;;  %v1468_v61 = vpop.xlane.xlu0 %1467 }
 0x478   : > { %v6987_v1 = vmax.f32 %v6984_v63, %v1468_v61 }
 0x479   : > { %v6998_v46 = vld [vmem:[#allocation3 + $0x10] sm:$0xff] }
 0x47a   : > { %8281 = vst [vmem:[#allocation47_spill] sm:$0xff] %v6987_v1  ;;  %1671 = vst.msk [vmem:[#allocation3 + $0x8] sm:$0xff] %vm1547_vm3, %v6987_v1  ;;  %1508 = vperm.xlu1 %5629, %v6969_v45  }
 0x47b   : > { %8282 = vst [vmem:[#allocation48_spill] sm:$0xff] %v6998_v46 }
 0x47e   : > { %1498 = vperm.xlu1 %5629, %v6987_v1   ;;  %v7010_v43 = vld [vmem:[#allocation3 + $0x18] sm:$0xff]  ;;  %v7012_v61 = vld [vmem:[#allocation3] sm:$0xff] }
 0x47f   : > { %v1921_v13 = vpop.xlane.xlu1 %1920  ;;  %8284 = vst [vmem:[#allocation50_spill] sm:$0xff] %v7010_v43  ;;  %8285 = vst [vmem:[#allocation51_spill] sm:$0xff] %v7012_v61 }
 0x480   : > { %v7001_v23 = vmax.f32 %v6998_v46, %v1921_v13 }
 0x481   : > { %v7030_v36 = vld [vmem:[#allocation3 + $0x8] sm:$0xff] }
 0x482   : > { %8283 = vst [vmem:[#allocation49_spill] sm:$0xff] %v7001_v23  ;;  %2120 = vst.msk [vmem:[#allocation3 + $0x10] sm:$0xff] %vm1997_vm4, %v7001_v23  ;;  %1953 = vperm.xlu0 %5630, %v7001_v23   ;;  %5631 = vset.pattern.permute.xlu1 %v8182_v58  ;;  %v2576_v58 = vmax.f32 %v2574_v21, %v2575_v41 }
 0x483   : > { %v1924_v60 = vpop.xlane.xlu0 %1923  ;;  %v1915_v9 = vpop.xlane.xlu1 %1914  ;;  %8288 = vst [vmem:[#allocation54_spill] sm:$0xff] %v7030_v36 }
 0x484   : > { %v7015_v15 = vmax.f32 %v7010_v43, %v1924_v60  ;;  %v7018_v13 = vmax.f32 %v7012_v61, %v1915_v9  ;;  %v1682_v60 = vmax.f32 %v1680_v42, %v1681_v37  ;;  %v2127_v9 = vrot.slane %v2126_v52, 2 }
 0x485   : > { %v2577_v42 = vrot.slane %v2576_v58, 1 }
 0x486   : > { %8286 = vst [vmem:[#allocation52_spill] sm:$0xff] %v7015_v15  ;;  %8287 = vst [vmem:[#allocation53_spill] sm:$0xff] %v7018_v13  ;;  %1943 = vperm.xlu1 %5631, %v7018_v13   ;;  %5633 = vset.pattern.permute.xlu0 %v8189_v18  ;;  %v1683_v59 = vsub.f32 %v6833_v28, %v1682_v60  ;;  %v2128_v8 = vmax.f32 %v2126_v52, %v2127_v9 }
 0x487   : > { %2121 = vst.msk [vmem:[#allocation3 + $0x18] sm:$0xff] %vm1997_vm4, %v7015_v15  ;;  %2118 = vst.msk [vmem:[#allocation3] sm:$0xff] %vm1997_vm4, %v7018_v13  ;;  %v1918_v56 = vpop.xlane.xlu0 %1917  ;;  %v1684_v21 = vsub.f32 %v6842_v35, %v1682_v60  ;;  %v1685_v54 = vsub.f32 %v6829_v25, %v1682_v60  ;;  %v1686_v52 = vsub.f32 %v6836_v31, %v1682_v60 }
 0x488   : > { %v7033_v27 = vmax.f32 %v7030_v36, %v1918_v56  ;;  %v1687_v37 = vmul.f32 1.442695, %v1683_v59  ;;  %v2129_v41 = vrot.slane %v2128_v8, 1  ;;  %v2578_v56 = vmax.f32 %v2576_v58, %v2577_v42 }
 0x489   : > { %v7043_v49 = vld [vmem:[#allocation3 + $0x10] sm:$0xff]  ;;  %v1689_v30 = vmul.f32 1.442695, %v1684_v21 }
 0x48a   : > { %8289 = vst [vmem:[#allocation55_spill] sm:$0xff] %v7033_v27  ;;  %2119 = vst.msk [vmem:[#allocation3 + $0x8] sm:$0xff] %vm1997_vm4, %v7033_v27  ;;  %1958 = vperm.xlu1 %5631, %v7015_v15   ;;  %5764 = vpow2.f32 %v1687_v37  ;;  %v2130_v58 = vmax.f32 %v2128_v8, %v2129_v41  ;;  %v2579_v59 = vsub.f32 %v6911_v29, %v2578_v56 }
 0x48b   : > { %8290 = vst [vmem:[#allocation56_spill] sm:$0xff] %v7043_v49  ;;  %5766 = vpow2.f32 %v1689_v30  ;;  %v2581_v30 = vsub.f32 %v6902_v22, %v2578_v56 }
 0x48c   : > { %v2131_v8 = vsub.f32 %v6855_v48, %v2130_v58  ;;  %v2583_v41 = vmul.f32 1.442695, %v2579_v59  ;;  %v2133_v15 = vsub.f32 %v6849_v44, %v2130_v58 }
 0x48d   : > { %v2587_v37 = vmul.f32 1.442695, %v2581_v30 }
 0x48e   : > { %1948 = vperm.xlu1 %5631, %v7033_v27   ;;  %v7055_v9 = vld [vmem:[#allocation3] sm:$0xff]  ;;  %v2135_v60 = vmul.f32 1.442695, %v2131_v8 }
 0x48f   : > { %v2369_v4 = vpop.xlane.xlu1 %2368  ;;  %8292 = vst [vmem:[#allocation58_spill] sm:$0xff] %v7055_v9 }
 0x490   : > { %v7046_v19 = vmax.f32 %v7043_v49, %v2369_v4  ;;  %v2580_v4 = vsub.f32 %v6923_v38, %v2578_v56  ;;  %v1691_v49 = vmul.f32 1.442695, %v1685_v54  ;;  %v2582_v54 = vsub.f32 %v6919_v34, %v2578_v56 }
 0x492   : > { %8291 = vst [vmem:[#allocation57_spill] sm:$0xff] %v7046_v19  ;;  %2568 = vst.msk [vmem:[#allocation3 + $0x10] sm:$0xff] %vm2445_vm5, %v7046_v19  ;;  %5632 = vset.pattern.permute.xlu1 %v8189_v18  ;;  %v2585_v18 = vmul.f32 1.442695, %v2580_v4  ;;  %5768 = vpow2.f32 %v1691_v49  ;;  %v2134_v49 = vsub.f32 %v6861_v51, %v2130_v58 }
 0x493   : > { %v2363_v42 = vpop.xlane.xlu1 %2362  ;;  %2401 = vperm.xlu1 %5632, %v7046_v19   ;;  %v1693_v19 = vmul.f32 1.442695, %v1686_v52  ;;  %5770 = vpow2.f32 %v2583_v41  ;;  %v2139_v52 = vmul.f32 1.442695, %v2133_v15 }
 0x494   : > { %v7060_v21 = vmax.f32 %v7055_v9, %v2363_v42  ;;  %v2132_v42 = vsub.f32 %v6867_v55, %v2130_v58  ;;  %5772 = vpow2.f32 %v2585_v18  ;;  %v2141_v41 = vmul.f32 1.442695, %v2134_v49 }
 0x495   : > { %5774 = vpow2.f32 %v1693_v19 }
 0x496   : > { %8293 = vst [vmem:[#allocation59_spill] sm:$0xff] %v7060_v21  ;;  %2566 = vst.msk [vmem:[#allocation3] sm:$0xff] %vm2445_vm5, %v7060_v21  ;;  %v2137_v9 = vmul.f32 1.442695, %v2132_v42  ;;  %5776 = vpow2.f32 %v2135_v60 }
 0x497   : > { %2391 = vperm.xlu1 %5632, %v7060_v21   ;;  %v7073_v59 = vpop.eup %5764  ;;  %5778 = vpow2.f32 %v2587_v37  ;;  %v2589_v21 = vmul.f32 1.442695, %v2582_v54 }
 0x498   : > { %v7075_v4 = vpop.eup %5766  ;;  %5780 = vpow2.f32 %v2137_v9  ;;  %v1695_v56 = vsel %vm990_vm1, %v7073_v59, 0.0 }
 0x499   : > { %v1696_v18 = vsel %vm990_vm1, %v7075_v4, 0.0  ;;  %5782 = vpow2.f32 %v2589_v21  ;;  %v7104_v43 = vpop.trf.xlu1 }
 0x49a   : > { %v1697_v8 = vadd.f32 %v1696_v18, %v1695_v56  ;;  %5784 = vpow2.f32 %v2139_v52 }
 0x49b   : > { %5786 = vpow2.f32 %v2141_v41 }
 0x49f   : > { %v7082_v19 = vpop.eup %5768 }
 0x4a0   : > { %v7084_v37 = vpop.eup %5770  ;;  %v1698_v58 = vsel %vm990_vm1, %v7082_v19, 0.0 }
 0x4a1   : > { %v7086_v30 = vpop.eup %5772  ;;  %v1699_v9 = vadd.f32 %v1698_v58, %v1697_v8  ;;  %v2591_v21 = vsel %vm990_vm1, %v7084_v37, 0.0 }
 0x4a2   : > { %v7090_v15 = vpop.eup %5774  ;;  %v2592_v60 = vsel %vm990_vm1, %v7086_v30, 0.0 }
 0x4a3   : > { %v7092_v42 = vpop.eup %5776  ;;  %v1700_v52 = vsel %vm990_vm1, %v7090_v15, 0.0  ;;  %v2593_v18 = vadd.f32 %v2592_v60, %v2591_v21  ;;  %v1092_v21 = vpop.permute.xlu0 %1091 }
 0x4a4   : > { %v7098_v54 = vpop.eup %5778  ;;  %v1701_v56 = vadd.f32 %v1700_v52, %v1699_v9  ;;  %v2143_v58 = vsel %vm990_vm1, %v7092_v42, 0.0  ;;  %v7118_v60 = vpop.trf.xlu1  ;;  %v1105_v39 = vsub.f32 %v6823_v11, %v1092_v21 }
 0x4a5   : > { %v7100_v49 = vpop.eup %5780  ;;  %v2594_v8 = vsel %vm990_vm1, %v7098_v54, 0.0 }
 0x4a6   : > { %v7108_v41 = vpop.eup %5782  ;;  %v2144_v27 = vsel %vm990_vm1, %v7100_v49, 0.0  ;;  %v1702_v36 = vrot.slane %v1701_v56, 4  ;;  %v2595_v23 = vadd.f32 %v2594_v8, %v2593_v18 }
 0x4a7   : > { %v7114_v46 = vpop.eup %5784  ;;  %v2145_v13 = vadd.f32 %v2144_v27, %v2143_v58  ;;  %v2596_v9 = vsel %vm990_vm1, %v7108_v41, 0.0  ;;  %v1110_v58 = vmul.f32 1.442695, %v1105_v39 }
 0x4a8   : > { %v1703_v52 = vadd.f32 %v1702_v36, %v1701_v56  ;;  %v2146_v61 = vsel %vm990_vm1, %v7114_v46, 0.0  ;;  %v2597_v45 = vadd.f32 %v2596_v9, %v2595_v23  ;;  %v7123_v32 = vpop.eup %5786  ;;  %v7128_v36 = vld [vmem:[#allocation3 + $0x18] sm:$0xff] }
 0x4a9   : > { %v2147_v24 = vadd.f32 %v2146_v61, %v2145_v13  ;;  %v2148_v27 = vsel %vm990_vm1, %v7123_v32, 0.0  ;;  %8294 = vst [vmem:[#allocation60_spill] sm:$0xff] %v7128_v36  ;;  %5788 = vpow2.f32 %v1110_v58  ;;  %v7139_v13 = vld [vmem:[#allocation3 + $0x8] sm:$0xff] }
 0x4aa   : > { %v1704_v18 = vrot.slane %v1703_v52, 2  ;;  %v2598_v8 = vrot.slane %v2597_v45, 4 }
 0x4ab   : > { %v2149_v40 = vadd.f32 %v2148_v27, %v2147_v24 }
 0x4ac   : > { %v1705_v9 = vadd.f32 %v1704_v18, %v1703_v52  ;;  %v2599_v21 = vadd.f32 %v2598_v8, %v2597_v45  ;;  %v5678_v8 = vld [vmem:[#allocation2 + $0x14] ss:$8 sps:$4 sm:$0xff]  }
 0x4ae   : > { %v1706_v45 = vrot.slane %v1705_v9, 1  ;;  %v2600_v52 = vrot.slane %v2599_v21, 2 }
 0x4bb   : > { %v1087_v53 = vpop.permute.xlu1 %1086 }
 0x4bc   : > { %v1104_v1 = vsub.f32 %v6815_v5, %v1087_v53  ;;  %v2372_v56 = vpop.xlane.xlu0 %2371  ;;  %v2150_v5 = vrot.slane %v2149_v40, 4 }
 0x4bd   : > { %v7131_v23 = vmax.f32 %v7128_v36, %v2372_v56 }
 0x4be   : > { %v1108_v11 = vmul.f32 1.442695, %v1104_v1  ;;  %v2151_v58 = vadd.f32 %v2150_v5, %v2149_v40 }
 0x4bf   : > { %8295 = vst [vmem:[#allocation61_spill] sm:$0xff] %v7131_v23  ;;  %2569 = vst.msk [vmem:[#allocation3 + $0x18] sm:$0xff] %vm2445_vm5, %v7131_v23  ;;  %2406 = vperm.xlu1 %5632, %v7131_v23   ;;  %v1097_v24 = vpop.permute.xlu1 %1096  ;;  %v7154_v23 = vpop.eup %5788 }
 0x4c0   : > { %5790 = vpow2.f32 %v1108_v11  ;;  %v1106_v39 = vsub.f32 %v6811_v3, %v1097_v24  ;;  %v2366_v53 = vpop.xlane.xlu0 %2365  ;;  %v1707_v24 = vadd.f32 %v1706_v45, %v1705_v9  ;;  %v2152_v61 = vrot.slane %v2151_v58, 2 }
 0x4c1   : > { %v7142_v1 = vmax.f32 %v7139_v13, %v2366_v53  ;;  %v2601_v53 = vadd.f32 %v2600_v52, %v2599_v21 }
 0x4c2   : > { %v1112_v18 = vmul.f32 1.442695, %v1106_v39  ;;  %v5679_v39 = vld [vmem:[#allocation2 + $0x4] ss:$8 sps:$4 sm:$0xff]  }
 0x4c3   : > { %2567 = vst.msk [vmem:[#allocation3 + $0x8] sm:$0xff] %vm2445_vm5, %v7142_v1  ;;  %2396 = vperm.xlu0 %5633, %v7142_v1   ;;  %2480 = vrot.lane.b32.xlu1 %v6784_v47, %s6374_s8  ;;  %v1102_v3 = vpop.permute.xlu1 %1101  ;;  %v2602_v27 = vrot.slane %v2601_v53, 1  ;;  %v2153_v47 = vadd.f32 %v2152_v61, %v2151_v58 }
 0x4c4   : > { %v1107_v56 = vsub.f32 %v6817_v6, %v1102_v3  ;;  %5792 = vpow2.f32 %v1112_v18  ;;  %v5681_v18 = vld [vmem:[#allocation2 + $0x4] ss:$8 sps:$4 sm:$0xff]  }
 0x4c5   : > { %v2603_v40 = vadd.f32 %v2602_v27, %v2601_v53  ;;  %v2154_v9 = vrot.slane %v2153_v47, 1 }
 0x4c6   : > { %v1114_v11 = vmul.f32 1.442695, %v1107_v56 }
 0x4c7   : > { %2639 = vrot.lane.b32.xlu1 %v5678_v8, %s6374_s8  ;;  %v2155_v5 = vadd.f32 %v2154_v9, %v2153_v47  ;;  %v1587_v8 = vpop.permute.xlu1 %1586 }
 0x4c8   : > { %5794 = vpow2.f32 %v1114_v11 }
 0x4c9   : > { %5796 = vrcp.f32 %v1707_v24 }
 0x4ca   : > { %5798 = vrcp.f32 %v2603_v40 }
 0x4cb   : > { %2637 = vrot.lane.b32.xlu1 %v5679_v39, %s6374_s8  ;;  %5800 = vrcp.f32 %v2155_v5 }
 0x4cd   : > { %v7156_v36 = vpop.eup %5790 }
 0x4ce   : > { %v1173_v6 = vpack.c.bf16 %v7154_v23, %v7156_v36 }
 0x4d0   : > { %5280 = vmatprep.mubr.msk.bf16.mxu1 %vm990_vm1, %v1173_v6 }
 0x4d1   : > { %v7161_v21 = vpop.eup %5792 }
 0x4d5   : > { %v7163_v45 = vpop.eup %5794 }
 0x4d6   : > { %v1174_v52 = vpack.c.bf16 %v7163_v45, %v7161_v21  ;;  %v5797_v61 = vpop.eup %5796 }
 0x4d7   : > { %v1709_v27 = vmul.f32 %v5797_v61, %v7073_v59  ;;  %v1710_v3 = vmul.f32 %v5797_v61, %v7075_v4  ;;  %v1711_v56 = vmul.f32 %v5797_v61, %v7082_v19  ;;  %v1712_v11 = vmul.f32 %v5797_v61, %v7090_v15  ;;  %v5799_v24 = vpop.eup %5798  ;;  %v1744_v19 = vpop.permute.xlu1 %1743 }
 0x4d8   : > { %5281 = vmatmul.mubr.msk.bf16.vlgmr.msra.gmra.mxu1 %vm990_vm1, %v1174_v52  ;;  %v2606_v59 = vmul.f32 %v5799_v24, %v7086_v30  ;;  %v5801_v4 = vpop.eup %5800  ;;  %v2607_v53 = vmul.f32 %v5799_v24, %v7098_v54  ;;  %v8296_v52 = vmov 0  }
 0x4d9   : > { %5285 = vmatpush3.bf16.msra.mxu1 %v6944_v62  ;;  %5288 = vmatprep.mubr.msk.bf16.mxu1 %vm990_vm1, %v7104_v43  ;;  %v1713_v58 = vpack.c.bf16 %v1710_v3, %v1709_v27  ;;  %v1714_v62 = vpack.c.bf16 %v1712_v11, %v1711_v56  ;;  %v2605_v43 = vmul.f32 %v5799_v24, %v7084_v37  ;;  %v1742_v56 = vpop.permute.xlu0 %1741 }
 0x4da   : > { %5286 = vmatprep.subr.bf16.mxu1 %v5681_v18  ;;  %v2157_v39 = vmul.f32 %v5801_v4, %v7092_v42  ;;  %v2158_v47 = vmul.f32 %v5801_v4, %v7100_v49  ;;  %v2159_v30 = vmul.f32 %v5801_v4, %v7114_v46  ;;  %v2160_v40 = vmul.f32 %v5801_v4, %v7123_v32 }
 0x4db   : > { %v2609_v15 = vpack.c.bf16 %v2606_v59, %v2605_v43 }
 0x4dc   : > { %v2161_v37 = vpack.c.bf16 %v2158_v47, %v2157_v39  ;;  %v2162_v9 = vpack.c.bf16 %v2160_v40, %v2159_v30 }
 0x4dd   : > { %5287 = vmatpush3.bf16.msra.mxu1 %v5681_v18  ;;  %v2035_v11 = vpop.permute.xlu0 %2034 }
 0x4de   : > { %5300 = vmatprep.subr.bf16.mxu1 %v1587_v8 }
 0x4e0   : > { %5289 = vmatmul.mubr.msk.bf16.vlgmr.msra.gmra.mxu1 %vm990_vm1, %v7118_v60  ;;  %v2608_v60 = vmul.f32 %v5799_v24, %v7108_v41 }
 0x4e1   : > { %5301 = vmatpush3.bf16.msra.mxu1 %v1587_v8  ;;  %1715 = vxpose.xlu0.c.b16.start [1/2] (short) (narrow) %v1713_v58, 32 }
 0x4e2   : > { %5302 = vmatprep.subr.bf16.mxu1 %v6859_v50  ;;  %v2610_v6 = vpack.c.bf16 %v2608_v60, %v2607_v53 }
 0x4e5   : > { %5303 = vmatpush3.bf16.msra.mxu1 %v6859_v50  ;;  %1716 = vxpose.xlu0.c.b16.end [2/2] (short) (narrow) %v1714_v62, 32  ;;  %v2033_v62 = vpop.permute.xlu0 %2032 }
 0x4e6   : > { %5308 = vmatprep.subr.bf16.mxu1 %v1744_v19 }
 0x4e9   : > { %2611 = vxpose.xlu0.c.b16.start [1/2] (short) (narrow) %v2609_v15, 32  ;;  %v2192_v59 = vpop.permute.xlu0 %2191 }
 0x4ed   : > { %2612 = vxpose.xlu0.c.b16.end [2/2] (short) (narrow) %v2610_v6, 32  ;;  %v1504_v50 = vpop.permute.xlu1 %1503  ;;  %v2190_v15 = vpop.permute.xlu0 %2189 }
 0x4ee   : > { %2163 = vxpose.xlu1.c.b16.start [1/2] (short) (narrow) %v2161_v37, 32  ;;  %v1513_v49 = vsub.f32 %v6829_v25, %v1504_v50 }
 0x4f0   : > { %v1519_v27 = vmul.f32 1.442695, %v1513_v49 }
 0x4f1   : > { %v1494_v5 = vpop.permute.xlu1 %1493  ;;  %v2483_v39 = vpop.permute.xlu0 %2482 }
 0x4f2   : > { %2164 = vxpose.xlu1.c.b16.end [2/2] (short) (narrow) %v2162_v9, 32  ;;  %v1511_v54 = vsub.f32 %v6833_v28, %v1494_v5 }
 0x4f4   : > { %v1515_v46 = vmul.f32 1.442695, %v1511_v54 }
 0x4f5   : > { %v1509_v41 = vpop.permute.xlu1 %1508 }
 0x4f6   : > { %v1514_v42 = vsub.f32 %v6836_v31, %v1509_v41  ;;  %5634 = vset.pattern.permute.xlu1 %v8296_v52  ;;  %5635 = vset.pattern.permute.xlu0 %v8296_v52  ;;  %5802 = vpow2.f32 %v1515_v46 }
 0x4f8   : > { %v1521_v18 = vmul.f32 1.442695, %v1514_v42 }
 0x4f9   : > { %v1499_v32 = vpop.permute.xlu1 %1498 }
 0x4fa   : > { %v1512_v61 = vsub.f32 %v6842_v35, %v1499_v32  ;;  %5804 = vpow2.f32 %v1521_v18 }
 0x4fc   : > { %v1517_v3 = vmul.f32 1.442695, %v1512_v61 }
 0x4fd   : > { %v1954_v37 = vpop.permute.xlu0 %1953 }
 0x4fe   : > { %5806 = vpow2.f32 %v1517_v3  ;;  %v1963_v50 = vsub.f32 %v6849_v44, %v1954_v37 }
 0x4ff   : > { %5808 = vpow2.f32 %v1519_v27 }
 0x500   : > { %v1969_v54 = vmul.f32 1.442695, %v1963_v50 }
 0x501   : > { %v1944_v24 = vpop.permute.xlu1 %1943 }
 0x502   : > { %v1961_v47 = vsub.f32 %v6855_v48, %v1944_v24 }
 0x503   : > { %v7193_v28 = vpop.eup %5802 }
 0x504   : > { %v1965_v30 = vmul.f32 1.442695, %v1961_v47 }
 0x505   : > { %v1959_v43 = vpop.permute.xlu1 %1958 }
 0x507   : > { %v7195_v31 = vpop.eup %5804 }
 0x509   : > { %v1949_v4 = vpop.permute.xlu1 %1948 }
 0x50a   : > { %v1962_v53 = vsub.f32 %v6867_v55, %v1949_v4 }
 0x50b   : > { %v7197_v8 = vpop.eup %5806 }
 0x50c   : > { %v7199_v58 = vpop.eup %5808  ;;  %v1580_v25 = vpack.c.bf16 %v7197_v8, %v7193_v28  ;;  %v1967_v6 = vmul.f32 1.442695, %v1962_v53 }
 0x50d   : > { %v1581_v35 = vpack.c.bf16 %v7195_v31, %v7199_v58 }
 0x50e   : > { %5304 = vmatprep.mubr.msk.bf16.mxu1 %vm990_vm1, %v1580_v25  ;;  %v2402_v60 = vpop.permute.xlu1 %2401  ;;  %5810 = vpow2.f32 %v1967_v6 }
 0x50f   : > { %5305 = vmatmul.mubr.msk.bf16.vlgmr.msra.gmra.mxu1 %vm990_vm1, %v1581_v35  ;;  %5812 = vpow2.f32 %v1965_v30  ;;  %v2411_v27 = vsub.f32 %v6902_v22, %v2402_v60 }
 0x510   : > { %5309 = vmatpush3.bf16.msra.mxu1 %v1744_v19  ;;  %v1964_v19 = vsub.f32 %v6861_v51, %v1959_v43 }
 0x511   : > { %5310 = vmatprep.subr.bf16.mxu1 %v1742_v56  ;;  %v2417_v25 = vmul.f32 1.442695, %v2411_v27 }
 0x512   : > { %v2392_v40 = vpop.permute.xlu1 %2391  ;;  %v1971_v9 = vmul.f32 1.442695, %v1964_v19 }
 0x513   : > { %v2409_v48 = vsub.f32 %v6911_v29, %v2392_v40 }
 0x514   : > { %5311 = vmatpush3.bf16.msra.mxu1 %v1742_v56  ;;  %5814 = vpow2.f32 %v1971_v9 }
 0x515   : > { %5324 = vmatprep.subr.bf16.mxu1 %v2035_v11  ;;  %5816 = vpow2.f32 %v1969_v54  ;;  %v2413_v51 = vmul.f32 1.442695, %v2409_v48 }
 0x51b   : > { %v7213_v46 = vpop.eup %5810 }
 0x51c   : > { %v7216_v44 = vpop.eup %5812 }
 0x521   : > { %v7224_v3 = vpop.eup %5814 }
 0x522   : > { %v7226_v35 = vpop.eup %5816 }
 0x523   : > { %v2031_v22 = vpack.c.bf16 %v7224_v3, %v7226_v35 }
 0x53a   : > { %v2407_v5 = vpop.permute.xlu1 %2406 }
 0x53b   : > { %v2412_v18 = vsub.f32 %v6919_v34, %v2407_v5 }
 0x53d   : > { %v2419_v29 = vmul.f32 1.442695, %v2412_v18 }
 0x53e   : > { %v2397_v41 = vpop.permute.xlu0 %2396  ;;  %v2481_v42 = vpop.permute.xlu1 %2480 }
 0x53f   : > { %v2410_v55 = vsub.f32 %v6923_v38, %v2397_v41  ;;  %v2030_v38 = vpack.c.bf16 %v7213_v46, %v7216_v44 }
 0x541   : > { %v2415_v52 = vmul.f32 1.442695, %v2410_v55 }
 0x542   : > { %v2640_v32 = vpop.permute.xlu1 %2639 }
 0x543   : > { %v1723_v49 = vpop.trf.xlu0  ;;  %5818 = vpow2.f32 %v2415_v52 }
 0x544   : > { %5312 = vmatprep.mubr.msk.bf16.mxu1 %vm990_vm1, %v1723_v49  ;;  %5820 = vpow2.f32 %v2413_v51  ;;  %v5682_v51 = vld [vmem:[#allocation13 + $0x38] sm:$0xff]  }
 0x545   : > { %5822 = vpow2.f32 %v2419_v29  ;;  %5364 = vmatprep.subr.bf16.mxu0 %v5682_v51 }
 0x546   : > { %v2638_v34 = vpop.permute.xlu1 %2637  ;;  %5824 = vpow2.f32 %v2417_v25  ;;  %5365 = vmatpush3.bf16.msra.mxu0 %v5682_v51  ;;  %v5685_v25 = vld [vmem:[#allocation13 + $0x20] sm:$0xff]   ;;  %v5692_v51 = vld [vmem:[#allocation15 + $0x74] ss:$8 sps:$4 sm:$0xff]  }
 0x547   : > { %v1724_v61 = vpop.trf.xlu0 }
 0x548   : > { %5313 = vmatmul.mubr.msk.bf16.vlgmr.msra.gmra.mxu1 %vm990_vm1, %v1724_v61  ;;  %v5683_v61 = vld [vmem:[#allocation13 + $0x30] sm:$0xff]  }
 0x549   : > { %5325 = vmatpush3.bf16.msra.mxu1 %v2035_v11  ;;  %5328 = vmatprep.mubr.msk.bf16.mxu1 %vm990_vm1, %v2030_v38  ;;  %v5684_v38 = vld [vmem:[#allocation13 + $0x28] sm:$0xff]  }
 0x54a   : > { %5326 = vmatprep.subr.bf16.mxu1 %v2033_v62  ;;  %5366 = vmatprep.subr.bf16.mxu0 %v5683_v61 }
 0x54b   : > { %v2619_v53 = vpop.trf.xlu0  ;;  %5367 = vmatpush3.bf16.msra.mxu0 %v5683_v61  ;;  %v5695_v61 = vld [vmem:[#allocation15 + $0x64] ss:$8 sps:$4 sm:$0xff]  }
 0x54c   : > { %5368 = vmatprep.subr.bf16.mxu0 %v5684_v38 }
 0x54d   : > { %5327 = vmatpush3.bf16.msra.mxu1 %v2033_v62 }
 0x54e   : > { %5332 = vmatprep.subr.bf16.mxu1 %v2192_v59 }
 0x54f   : > { %v2620_v60 = vpop.trf.xlu0  ;;  %5369 = vmatpush3.bf16.msra.mxu0 %v5684_v38  ;;  %v5693_v38 = vld [vmem:[#allocation15 + $0x60] ss:$8 sps:$4 sm:$0xff]  }
 0x550   : > { %5329 = vmatmul.mubr.msk.bf16.vlgmr.msra.gmra.mxu1 %vm990_vm1, %v2031_v22  ;;  %v2171_v56 = vpop.trf.xlu1  ;;  %v7232_v11 = vpop.eup %5818  ;;  %5370 = vmatprep.subr.bf16.mxu0 %v5685_v25 }
 0x551   : > { %5333 = vmatpush3.bf16.msra.mxu1 %v2192_v59  ;;  %5336 = vmatprep.mubr.msk.bf16.mxu1 %vm990_vm1, %v2171_v56  ;;  %v7234_v43 = vpop.eup %5820 }
 0x552   : > { %5334 = vmatprep.subr.bf16.mxu1 %v2190_v15  ;;  %v2478_v62 = vpack.c.bf16 %v7232_v11, %v7234_v43  ;;  %v7240_v59 = vpop.eup %5822 }
 0x553   : > { %v7242_v4 = vpop.eup %5824  ;;  %5371 = vmatpush3.bf16.msra.mxu0 %v5685_v25  ;;  %v5696_v25 = vld [vmem:[#allocation15 + $0x50] ss:$8 sps:$4 sm:$0xff]  }
 0x554   : > { %v2172_v24 = vpop.trf.xlu1 }
 0x555   : > { %5335 = vmatpush3.bf16.msra.mxu1 %v2190_v15  ;;  %v2479_v15 = vpack.c.bf16 %v7240_v59, %v7242_v4 }
 0x556   : > { %5348 = vmatprep.subr.bf16.mxu1 %v2483_v39 }
 0x558   : > { %5337 = vmatmul.mubr.msk.bf16.vlgmr.msra.gmra.mxu1 %vm990_vm1, %v2172_v24  ;;  %v5686_v24 = vld [vmem:[#allocation13 + $0x18] sm:$0xff]  }
 0x559   : > { %5349 = vmatpush3.bf16.msra.mxu1 %v2483_v39  ;;  %5352 = vmatprep.mubr.msk.bf16.mxu1 %vm990_vm1, %v2478_v62 }
 0x55a   : > { %5350 = vmatprep.subr.bf16.mxu1 %v2481_v42  ;;  %5372 = vmatprep.subr.bf16.mxu0 %v5686_v24 }
 0x55b   : > { %5373 = vmatpush3.bf16.msra.mxu0 %v5686_v24  ;;  %v5702_v24 = vld [vmem:[#allocation15 + $0x30] ss:$8 sps:$4 sm:$0xff]  }
 0x55d   : > { %5351 = vmatpush3.bf16.msra.mxu1 %v2481_v42 }
 0x55e   : > { %5356 = vmatprep.subr.bf16.mxu1 %v2640_v32 }
 0x560   : > { %5353 = vmatmul.mubr.msk.bf16.vlgmr.msra.gmra.mxu1 %vm990_vm1, %v2479_v15 }
 0x561   : > { %5357 = vmatpush3.bf16.msra.mxu1 %v2640_v32  ;;  %5360 = vmatprep.mubr.msk.bf16.mxu1 %vm990_vm1, %v2619_v53  ;;  %v5687_v53 = vld [vmem:[#allocation13 + $0x10] sm:$0xff]  }
 0x562   : > { %5358 = vmatprep.subr.bf16.mxu1 %v2638_v34  ;;  %5374 = vmatprep.subr.bf16.mxu0 %v5687_v53 }
 0x563   : > { %5375 = vmatpush3.bf16.msra.mxu0 %v5687_v53  ;;  %v5707_v53 = vld [vmem:[#allocation15 + $0x24] ss:$8 sps:$4 sm:$0xff]  }
 0x565   : > { %5359 = vmatpush3.bf16.msra.mxu1 %v2638_v34 }
 0x566   : > { %3050 = vmatprep.subr.bf16.mxu1 %v5692_v51  ;;  %v5719_v51 = vld [vmem:[#allocation15 + $0xe4] ss:$8 sps:$4 sm:$0xff]  }
 0x568   : > { %5361 = vmatmul.mubr.msk.bf16.vlgmr.msra.gmra.mxu1 %vm990_vm1, %v2620_v60 }
 0x598   : > { %v7249_v39 = vpop.f32.mrf.mxu1 }
 0x59a   : > { %v7251_v47 = vpop.f32.mrf.mxu1 }
 0x59c   : > { %v7253_v6 = vpop.f32.mrf.mxu1 }
 0x59e   : > { %v7255_v37 = vpop.f32.mrf.mxu1 }
 0x5a0   : > { %v5290_v30 = vpop.f32.mrf.mxu1 }
 0x5a1   : > { %1368 = vst.msk [vmem:[#allocation6 + $0x10] sm:$0xff] %vm990_vm1, %v5290_v30 }
 0x5a2   : > { %v1351_v19 = vpop.f32.mrf.mxu1 }
 0x5a3   : > { %1366 = vst.msk [vmem:[#allocation6] sm:$0xff] %vm990_vm1, %v1351_v19  ;;  %v5688_v19 = vld [vmem:[#allocation13 + $0x8] sm:$0xff]  }
 0x5a4   : > { %v5291_v40 = vpop.f32.mrf.mxu1  ;;  %5376 = vmatprep.subr.bf16.mxu0 %v5688_v19 }
 0x5a5   : > { %1369 = vst.msk [vmem:[#allocation6 + $0x18] sm:$0xff] %vm990_vm1, %v5291_v40  ;;  %5377 = vmatpush3.bf16.msra.mxu0 %v5688_v19  ;;  %v5705_v19 = vld [vmem:[#allocation15 + $0x20] ss:$8 sps:$4 sm:$0xff]  }
 0x5a6   : > { %v1354_v50 = vpop.f32.mrf.mxu1 }
 0x5a7   : > { %1367 = vst.msk [vmem:[#allocation6 + $0x8] sm:$0xff] %vm990_vm1, %v1354_v50  ;;  %v5689_v50 = vld [vmem:[#allocation13] sm:$0xff]  }
 0x5a8   : > { %5378 = vmatprep.subr.bf16.mxu0 %v5689_v50 }
 0x5a9   : > { %5379 = vmatpush3.bf16.msra.mxu0 %v5689_v50  ;;  %v5708_v50 = vld [vmem:[#allocation15 + $0x10] ss:$8 sps:$4 sm:$0xff]  }
 0x5cf   : > { %v7261_v9 = vpop.f32.mrf.mxu1 }
 0x5d1   : > { %v7263_v5 = vpop.f32.mrf.mxu1 }
 0x5d3   : > { %v7265_v54 = vpop.f32.mrf.mxu1 }
 0x5d5   : > { %v7267_v41 = vpop.f32.mrf.mxu1 }
 0x608   : > { %v5314_v55 = vpop.f32.mrf.mxu1 }
 0x609   : > { %1810 = vrot.lane.b32.xlu0 %v5314_v55, %s6374_s8 }
 0x60a   : > { %v1787_v42 = vpop.f32.mrf.mxu1 }
 0x60c   : > { %v5315_v48 = vpop.f32.mrf.mxu1 }
 0x60d   : > { %1806 = vrot.lane.b32.xlu0 %v1787_v42, %s6374_s8 }
 0x60e   : > { %v1790_v52 = vpop.f32.mrf.mxu1 }
 0x610   : > { %v7271_v49 = vpop.f32.mrf.mxu1 }
 0x611   : > { %1812 = vrot.lane.b32.xlu0 %v5315_v48, %s6374_s8 }
 0x612   : > { %v7274_v18 = vpop.f32.mrf.mxu1 }
 0x614   : > { %v7276_v32 = vpop.f32.mrf.mxu1 }
 0x615   : > { %1808 = vrot.lane.b32.xlu0 %v1790_v52, %s6374_s8  ;;  %v5690_v52 = vld [vmem:[#allocation15 + $0x70] ss:$8 sps:$4 sm:$0xff]  }
 0x616   : > { %v7279_v27 = vpop.f32.mrf.mxu1  ;;  %3051 = vmatpush1.bf16.msra.mxu1 %v5690_v52  ;;  %v5714_v52 = vld [vmem:[#allocation15 + $0xf0] ss:$8 sps:$4 sm:$0xff]  }
 0x617   : > { %3052 = vmatprep.subr.bf16.mxu1 %v5695_v61  ;;  %v5717_v61 = vld [vmem:[#allocation15 + $0xe0] ss:$8 sps:$4 sm:$0xff]  }
 0x618   : > { %v5338_v29 = vpop.f32.mrf.mxu1 }
 0x619   : > { %2258 = vrot.lane.b32.xlu0 %v5338_v29, %s6373_s13  ;;  %v5698_v29 = vld [vmem:[#allocation15 + $0x54] ss:$8 sps:$4 sm:$0xff]  }
 0x61a   : > { %v2235_v34 = vpop.f32.mrf.mxu1  ;;  %3053 = vmatpush1.bf16.msra.mxu1 %v5693_v38  ;;  %v5722_v38 = vld [vmem:[#allocation15 + $0xd4] ss:$8 sps:$4 sm:$0xff]  }
 0x61b   : > { %3054 = vmatprep.subr.bf16.mxu1 %v5698_v29  ;;  %v5720_v29 = vld [vmem:[#allocation15 + $0xd0] ss:$8 sps:$4 sm:$0xff]  }
 0x61c   : > { %v5339_v22 = vpop.f32.mrf.mxu1 }
 0x61d   : > { %2254 = vrot.lane.b32.xlu0 %v2235_v34, %s6373_s13  ;;  %2260 = vrot.lane.b32.xlu1 %v5339_v22, %s6373_s13  ;;  %v5701_v34 = vld [vmem:[#allocation15 + $0x44] ss:$8 sps:$4 sm:$0xff]   ;;  %v5699_v22 = vld [vmem:[#allocation15 + $0x40] ss:$8 sps:$4 sm:$0xff]  }
 0x61e   : > { %v2238_v56 = vpop.f32.mrf.mxu1  ;;  %3055 = vmatpush1.bf16.msra.mxu1 %v5696_v25  ;;  %v5725_v25 = vld [vmem:[#allocation15 + $0xc4] ss:$8 sps:$4 sm:$0xff]  }
 0x61f   : > { %3056 = vmatprep.subr.bf16.mxu1 %v5701_v34  ;;  %v5723_v34 = vld [vmem:[#allocation15 + $0xc0] ss:$8 sps:$4 sm:$0xff]  }
 0x620   : > { %v7284_v62 = vpop.f32.mrf.mxu1 }
 0x621   : > { %8297 = vst [vmem:[#allocation62_spill] sm:$0xff] %v7284_v62  ;;  %2256 = vrot.lane.b32.xlu0 %v2238_v56, %s6373_s13  ;;  %v5704_v56 = vld [vmem:[#allocation15 + $0x34] ss:$8 sps:$4 sm:$0xff]  }
 0x622   : > { %v7287_v15 = vpop.f32.mrf.mxu1  ;;  %3057 = vmatpush1.bf16.msra.mxu1 %v5699_v22  ;;  %v5728_v22 = vld [vmem:[#allocation15 + $0xb4] ss:$8 sps:$4 sm:$0xff]  }
 0x623   : > { %8298 = vst [vmem:[#allocation63_spill] sm:$0xff] %v7287_v15  ;;  %3058 = vmatprep.subr.bf16.mxu1 %v5704_v56  ;;  %v5726_v56 = vld [vmem:[#allocation15 + $0xb0] ss:$8 sps:$4 sm:$0xff]  }
 0x624   : > { %v7289_v60 = vpop.f32.mrf.mxu1 }
 0x625   : > { %8299 = vst [vmem:[#allocation64_spill] sm:$0xff] %v7289_v60 }
 0x626   : > { %v7291_v30 = vpop.f32.mrf.mxu1  ;;  %3059 = vmatpush1.bf16.msra.mxu1 %v5702_v24 }
 0x627   : > { %8300 = vst [vmem:[#allocation65_spill] sm:$0xff] %v7291_v30  ;;  %3060 = vmatprep.subr.bf16.mxu1 %v5707_v53 }
 0x628   : > { %v5362_v40 = vpop.f32.mrf.mxu1 }
 0x62a   : > { %v2683_v55 = vpop.f32.mrf.mxu1  ;;  %3061 = vmatpush1.bf16.msra.mxu1 %v5705_v19 }
 0x62b   : > { %2702 = vrot.lane.b32.xlu0 %v2683_v55, %s6372_s6  ;;  %v5713_v55 = vld [vmem:[#allocation15 + $0x4] ss:$8 sps:$4 sm:$0xff]  }
 0x62c   : > { %v5363_v42 = vpop.f32.mrf.mxu1 }
 0x62e   : > { %v2686_v48 = vpop.f32.mrf.mxu1 }
 0x62f   : > { %2706 = vrot.lane.b32.xlu0 %v5362_v40, %s6372_s6  ;;  %2704 = vrot.lane.b32.xlu1 %v2686_v48, %s6372_s6  ;;  %v5710_v40 = vld [vmem:[#allocation15 + $0x14] ss:$8 sps:$4 sm:$0xff]  }
 0x630   : > { %3062 = vmatprep.subr.bf16.mxu1 %v5710_v40  ;;  %v5716_v48 = vld [vmem:[#allocation15 + $0xf4] ss:$8 sps:$4 sm:$0xff]  }
 0x631   : > { %3063 = vmatpush1.bf16.msra.mxu1 %v5708_v50 }
 0x632   : > { %3064 = vmatprep.subr.bf16.mxu1 %v5713_v55 }
 0x633   : > { %2708 = vrot.lane.b32.xlu1 %v5363_v42, %s6372_s6  ;;  %v5711_v42 = vld [vmem:[#allocation15] ss:$8 sps:$4 sm:$0xff]  }
 0x635   : > { %3065 = vmatpush1.bf16.msra.mxu1 %v5711_v42 }
 0x636   : > { %3066 = vmatprep.subr.bf16.mxu1 %v5716_v48 }
 0x639   : > { %3067 = vmatpush2.bf16.msra.mxu1 %v5714_v52 }
 0x63a   : > { %3068 = vmatprep.subr.bf16.mxu1 %v5719_v51 }
 0x63d   : > { %3069 = vmatpush2.bf16.msra.mxu1 %v5717_v61 }
 0x63e   : > { %3070 = vmatprep.subr.bf16.mxu1 %v5722_v38 }
 0x641   : > { %3071 = vmatpush2.bf16.msra.mxu1 %v5720_v29 }
 0x642   : > { %3072 = vmatprep.subr.bf16.mxu1 %v5725_v25 }
 0x645   : > { %3073 = vmatpush2.bf16.msra.mxu1 %v5723_v34 }
 0x646   : > { %3074 = vmatprep.subr.bf16.mxu1 %v5728_v22 }
 0x649   : > { %3075 = vmatpush2.bf16.msra.mxu1 %v5726_v56 }
 0x67b   : > { %v1811_v24 = vpop.permute.xlu0 %1810 }
 0x67c   : > { %1820 = vst.msk [vmem:[#allocation6 + $0x10] sm:$0xff] %vm1665_vm6, %v1811_v24 }
 0x67f   : > { %v1807_v53 = vpop.permute.xlu0 %1806 }
 0x680   : > { %1818 = vst.msk [vmem:[#allocation6] sm:$0xff] %vm1665_vm6, %v1807_v53  ;;  %v5729_v53 = vld [vmem:[#allocation15 + $0xa0] ss:$8 sps:$4 sm:$0xff]  }
 0x683   : > { %v1813_v19 = vpop.permute.xlu0 %1812 }
 0x684   : > { %1821 = vst.msk [vmem:[#allocation6 + $0x18] sm:$0xff] %vm1665_vm6, %v1813_v19  ;;  %v5731_v19 = vld [vmem:[#allocation15 + $0xa4] ss:$8 sps:$4 sm:$0xff]  }
 0x685   : > { %3076 = vmatprep.subr.bf16.mxu1 %v5731_v19 }
 0x686   : > { %3077 = vmatpush2.bf16.msra.mxu1 %v5729_v53  ;;  %v2878_v53 = vld [vmem:[%s8302_s10] sm:$0x3] }
 0x687   : > { %v1809_v40 = vpop.permute.xlu0 %1808  ;;  %v2883_v19 = vrot.slane %v2878_v53, %v6760_v17 }
 0x688   : > { %1819 = vst.msk [vmem:[#allocation6 + $0x8] sm:$0xff] %vm1665_vm6, %v1809_v40  ;;  %v5734_v40 = vld [vmem:[#allocation15 + $0x94] ss:$8 sps:$4 sm:$0xff]  }
 0x689   : > { %3078 = vmatprep.subr.bf16.mxu1 %v5734_v40  ;;  %v2887_v40 = vrot.slane %v2878_v53, %v6768_v33 }
 0x68b   : > { %v2259_v50 = vpop.permute.xlu0 %2258 }
 0x68c   : > { %2268 = vst.msk [vmem:[#allocation6 + $0x10] sm:$0xff] %vm2113_vm7, %v2259_v50  ;;  %v5732_v50 = vld [vmem:[#allocation15 + $0x90] ss:$8 sps:$4 sm:$0xff]  }
 0x68d   : > { %3079 = vmatpush2.bf16.msra.mxu1 %v5732_v50 }
 0x68f   : > { %v2255_v55 = vpop.permute.xlu0 %2254  ;;  %v2261_v42 = vpop.permute.xlu1 %2260 }
 0x690   : > { %2266 = vst.msk [vmem:[#allocation6] sm:$0xff] %vm2113_vm7, %v2255_v55  ;;  %2269 = vst.msk [vmem:[#allocation6 + $0x18] sm:$0xff] %vm2113_vm7, %v2261_v42  ;;  %v5735_v55 = vld [vmem:[#allocation15 + $0x80] ss:$8 sps:$4 sm:$0xff]   ;;  %v5737_v42 = vld [vmem:[#allocation15 + $0x84] ss:$8 sps:$4 sm:$0xff]  }
 0x691   : > { %3080 = vmatprep.subr.bf16.mxu1 %v5737_v42 }
 0x692   : > { %3081 = vmatpush2.bf16.msra.mxu1 %v5735_v55 }
 0x693   : > { %v2257_v48 = vpop.permute.xlu0 %2256 }
 0x694   : > { %2267 = vst.msk [vmem:[#allocation6 + $0x8] sm:$0xff] %vm2113_vm7, %v2257_v48 }
 0x69d   : > { %v2703_v52 = vpop.permute.xlu0 %2702 }
 0x69e   : > { %2714 = vst.msk [vmem:[#allocation6] sm:$0xff] %vm2561_vm8, %v2703_v52 }
 0x6a1   : > { %v2707_v51 = vpop.permute.xlu0 %2706  ;;  %v2705_v61 = vpop.permute.xlu1 %2704 }
 0x6a2   : > { %2716 = vst.msk [vmem:[#allocation6 + $0x10] sm:$0xff] %vm2561_vm8, %v2707_v51  ;;  %2715 = vst.msk [vmem:[#allocation6 + $0x8] sm:$0xff] %vm2561_vm8, %v2705_v61  ;;  %v5012_v61 = vld [vmem:[%s8301_s20] ss:$0 sm:$0xff] }
 0x6a5   : > { %v2709_v38 = vpop.permute.xlu1 %2708  ;;  %v2718_v29 = vld [vmem:[#allocation6] sm:$0xff] }
 0x6a6   : > { %2717 = vst.msk [vmem:[#allocation6 + $0x18] sm:$0xff] %vm2561_vm8, %v2709_v38 }
 0x6a9   : > { %v2719_v25 = vld [vmem:[#allocation6 + $0x8] sm:$0xff]  ;;  %v2720_v22 = vld [vmem:[#allocation6 + $0x10] sm:$0xff] }
 0x6aa   : > { %v2722_v34 = vpack.c.bf16 %v2719_v25, %v2718_v29 }
 0x6ac   : > { %5380 = vmatprep.mubr.bf16.mxu0 %v2722_v34 }
 0x6ad   : > { %v2721_v56 = vld [vmem:[#allocation6 + $0x18] sm:$0xff] }
 0x6ae   : > { %v2723_v24 = vpack.c.bf16 %v2721_v56, %v2720_v22 }
 0x6b0   : > { %5381 = vmatmul.mubr.bf16.vlgmr.msra.gmra.mxu0 %v2723_v24 }
 0x770   : > { %v5382_v48 = vpop.f32.mrf.mxu0 }
 0x771   : > { %v2838_v22 = vadd.f32 %v5382_v48, %v5012_v61 }
 0x772   : > { %v2829_v52 = vpop.f32.mrf.mxu0 }
 0x773   : > { %v2830_v29 = vadd.f32 %v5012_v61, %v2829_v52 }
 0x774   : > { %v5383_v51 = vpop.f32.mrf.mxu0 }
 0x775   : > { %v2841_v25 = vadd.f32 %v5383_v51, %v5012_v61 }
 0x776   : > { %v2832_v38 = vpop.f32.mrf.mxu0 }
 0x777   : > { %v2833_v34 = vadd.f32 %v5012_v61, %v2832_v38  ;;  %v2845_v24 = vpack.c.bf16 %v2841_v25, %v2838_v22 }
 0x779   : > { %v2844_v56 = vpack.c.bf16 %v2833_v34, %v2830_v29 }
 0x77b   : > { %3082 = vmatprep.mubr.bf16.mxu1 %v2844_v56 }
 0x77c   : > { %3083 = vmatmul.mubr.bf16.vlgmr.msra.gmra.mxu1 %v6747_v7 }
 0x77d   : > { %3092 = vmatprep.mubr.bf16.mxu1 %v2845_v24 }
 0x784   : > { %3093 = vmatmul.mubr.bf16.gmra.mxu1 %v6753_v10 }
 0x83c   : > { %v3084_v50 = vpop.f32.mrf.mxu1 }
 0x83d   : > { %v3085_v42 = vadd.f32 %v3084_v50, %v2883_v19 }
 0x83e   : > { %v3086_v55 = vpop.f32.mrf.mxu1 }
 0x83f   : > { %v3087_v48 = vadd.f32 %v3086_v55, %v2887_v40 }
 0x840   : > { %v3088_v52 = vpop.f32.mrf.mxu1 }
 0x841   : > { %v3103_v51 = vadd.f32 %v3087_v48, %v3085_v42  ;;  %v3089_v38 = vadd.f32 %v3088_v52, %v2883_v19 }
 0x842   : > { %v3090_v61 = vpop.f32.mrf.mxu1 }
 0x843   : > { %v3091_v7 = vadd.f32 %v3090_v61, %v2887_v40  ;;  %3104 = vadd.xlane.f32.xlu0 %v3103_v51 }
 0x844   : > { %v3094_v29 = vpop.f32.mrf.mxu1 }
 0x845   : > { %v3106_v10 = vadd.f32 %v3091_v7, %v3089_v38  ;;  %v3095_v34 = vadd.f32 %v3094_v29, %v2883_v19 }
 0x846   : > { %v3096_v25 = vpop.f32.mrf.mxu1 }
 0x847   : > { %v3097_v22 = vadd.f32 %v3096_v25, %v2887_v40  ;;  %3107 = vadd.xlane.f32.xlu1 %v3106_v10 }
 0x848   : > { %v3098_v56 = vpop.f32.mrf.mxu1 }
 0x849   : > { %v3109_v24 = vadd.f32 %v3097_v22, %v3095_v34  ;;  %v3099_v53 = vadd.f32 %v3098_v56, %v2883_v19 }
 0x84a   : > { %v3100_v60 = vpop.f32.mrf.mxu1 }
 0x84b   : > { %v3101_v62 = vadd.f32 %v3100_v60, %v2887_v40  ;;  %3110 = vadd.xlane.f32.xlu0 %v3109_v24 }
 0x84d   : > { %v3112_v50 = vadd.f32 %v3101_v62, %v3099_v53 }
 0x84f   : > { %3113 = vadd.xlane.f32.xlu0 %v3112_v50 }
 0x8cc   : > { %v3105_v55 = vpop.xlane.xlu0 %3104 }
 0x8cd   : > { %v3116_v30 = vmul.f32 0.00390625, %v3105_v55 }
 0x8cf   : > { %v7319_v15 = vsub.f32 %v3085_v42, %v3116_v30  ;;  %v7321_v52 = vsub.f32 %v3087_v48, %v3116_v30 }
 0x8d0   : > { %v3108_v51 = vpop.xlane.xlu1 %3107 }
 0x8d1   : > { %v3117_v61 = vmul.f32 0.00390625, %v3108_v51  ;;  %v3128_v29 = vmul.f32 %v7319_v15, %v7319_v15  ;;  %v3129_v10 = vmul.f32 %v7321_v52, %v7321_v52 }
 0x8d3   : > { %v7327_v25 = vsub.f32 %v3089_v38, %v3117_v61  ;;  %v7329_v60 = vsub.f32 %v3091_v7, %v3117_v61  ;;  %v3136_v19 = vadd.f32 %v3129_v10, %v3128_v29 }
 0x8d4   : > { %v3111_v40 = vpop.xlane.xlu0 %3110 }
 0x8d5   : > { %v3118_v56 = vmul.f32 0.00390625, %v3111_v40  ;;  %3137 = vadd.xlane.f32.xlu1 %v3136_v19  ;;  %v3130_v30 = vmul.f32 %v7327_v25, %v7327_v25  ;;  %v3131_v42 = vmul.f32 %v7329_v60, %v7329_v60  ;;  %v1124_v40 = vsel %vm990_vm1, %v7156_v36, 0.0 }
 0x8d6   : > { %v1075_v36 = vsub.f32 %v6892_v16, %v6907_v26 }
 0x8d7   : > { %v7335_v48 = vsub.f32 %v3095_v34, %v3118_v56  ;;  %v7337_v24 = vsub.f32 %v3097_v22, %v3118_v56  ;;  %v3139_v50 = vadd.f32 %v3131_v42, %v3130_v30  ;;  %v1130_v30 = vsel %vm990_vm1, %v7161_v21, 0.0 }
 0x8d8   : > { %v3114_v55 = vpop.xlane.xlu0 %3113  ;;  %v1127_v42 = vsel %vm990_vm1, %v7154_v23, 0.0 }
 0x8d9   : > { %v3119_v38 = vmul.f32 0.00390625, %v3114_v55  ;;  %3140 = vadd.xlane.f32.xlu0 %v3139_v50  ;;  %v3132_v7 = vmul.f32 %v7335_v48, %v7335_v48  ;;  %v3133_v51 = vmul.f32 %v7337_v24, %v7337_v24  ;;  %v5740_v55 = vld [vmem:[#allocation16 + $0x70] sm:$0xff]  }
 0x8db   : > { %v7343_v61 = vsub.f32 %v3099_v53, %v3119_v38  ;;  %v7345_v29 = vsub.f32 %v3101_v62, %v3119_v38  ;;  %v3142_v10 = vadd.f32 %v3133_v51, %v3132_v7  ;;  %v1074_v53 = vsub.f32 %v6869_v57, %v6878_v0  ;;  %v5741_v38 = vld [vmem:[#allocation16 + $0x30] sm:$0xff]   ;;  %v5742_v7 = vld [vmem:[#allocation16 + $0x68] sm:$0xff]  }
 0x8dc   : > { %v8303_v62 = vsub.f32 %v6880_v2, %v6890_v14  ;;  %v1133_v57 = vsel %vm990_vm1, %v7163_v45, 0.0  ;;  %v1082_v0 = vmul.f32 1.442695, %v1075_v36  ;;  %v8304_v2 = vsub.f32 %v6887_v12, %v6899_v20  ;;  %v5738_v20 = vld [vmem:[#allocation16 + $0x78] sm:$0xff]   ;;  %v5743_v51 = vld [vmem:[#allocation16 + $0x28] sm:$0xff]  }
 0x8dd   : > { %3143 = vadd.xlane.f32.xlu1 %v3142_v10  ;;  %v3134_v34 = vmul.f32 %v7343_v61, %v7343_v61  ;;  %v3135_v22 = vmul.f32 %v7345_v29, %v7345_v29  ;;  %v1080_v50 = vmul.f32 1.442695, %v1074_v53  ;;  %v8305_v12 = vmov 1   ;;  %5202 = vmatprep.subr.bf16.mxu0 %v5738_v20  ;;  %v5739_v45 = vld [vmem:[#allocation16 + $0x38] sm:$0xff]   ;;  %v5744_v10 = vld [vmem:[#allocation16 + $0x60] sm:$0xff]   ;;  %v5748_v53 = vld [vmem:[#allocation16 + $0x50] sm:$0xff]  }
 0x8de   : > { %v1076_v56 = vmul.f32 1.442695, %v8303_v62  ;;  %v1078_v14 = vmul.f32 1.442695, %v8304_v2  ;;  %5203 = vmatpush3.bf16.msra.mxu0 %v5739_v45  ;;  %v1531_v62 = vsel %vm990_vm1, %v7193_v28, 0.0  ;;  %v1537_v36 = vsel %vm990_vm1, %v7199_v58, 0.0 }
 0x8df   : > { %v3145_v19 = vadd.f32 %v3135_v22, %v3134_v34  ;;  %5204 = vmatprep.subr.bf16.mxu0 %v5740_v55  ;;  %v5745_v34 = vld [vmem:[#allocation16 + $0x20] sm:$0xff]   ;;  %v5746_v22 = vld [vmem:[#allocation16 + $0x58] sm:$0xff]   ;;  %v1540_v28 = vsel %vm990_vm1, %v7195_v31, 0.0  ;;  %v8312_v20 = vld [vmem:[#allocation42_spill] sm:$0xff] }
 0x8e0   : > { %5826 = vpow2.f32 %v1076_v56  ;;  %v8306_v56 = vld [vmem:[#allocation47_spill] sm:$0xff]  ;;  %v5752_v58 = vld [vmem:[#allocation16 + $0x40] sm:$0xff]  }
 0x8e1   : > { %1125 = vadd.xlane.f32.xlu1 %v1124_v40  ;;  %3146 = vadd.xlane.f32.xlu0 %v3145_v19  ;;  %5828 = vpow2.f32 %v1080_v50  ;;  %v1534_v19 = vsel %vm990_vm1, %v7197_v8, 0.0  ;;  %v5747_v40 = vld [vmem:[#allocation16 + $0x18] sm:$0xff]   ;;  %v5749_v50 = vld [vmem:[#allocation16 + $0x10] sm:$0xff]  }
 0x8e2   : > { %5830 = vpow2.f32 %v1082_v0  ;;  %5205 = vmatpush3.bf16.msra.mxu0 %v5741_v38  ;;  %v8308_v8 = vld [vmem:[#allocation44_spill] sm:$0xff]  ;;  %v5753_v38 = vld [vmem:[#allocation16] sm:$0xff]  }
 0x8e3   : > { %5832 = vpow2.f32 %v1078_v14  ;;  %5206 = vmatprep.subr.bf16.mxu0 %v5742_v7  ;;  %v5751_v14 = vld [vmem:[#allocation16 + $0x8] sm:$0xff]   ;;  %v8314_v7 = vld [vmem:[#allocation43_spill] sm:$0xff] }
 0x8e5   : > { %1131 = vadd.xlane.f32.xlu1 %v1130_v30  ;;  %1128 = vadd.xlane.f32.xlu0 %v1127_v42  ;;  %v8307_v30 = vsub.f32 %v6984_v63, %v8306_v56  ;;  %v5750_v63 = vld [vmem:[#allocation16 + $0x48] sm:$0xff]   ;;  %v8318_v56 = vld [vmem:[#allocation51_spill] sm:$0xff] }
 0x8e6   : > { %5207 = vmatpush3.bf16.msra.mxu0 %v5743_v51  ;;  %v8315_v51 = vld [vmem:[#allocation45_spill] sm:$0xff] }
 0x8e7   : > { %5208 = vmatprep.subr.bf16.mxu0 %v5744_v10  ;;  %v1485_v42 = vmul.f32 1.442695, %v8307_v30  ;;  %v8316_v10 = vsub.f32 %v8314_v7, %v8315_v51  ;;  %v8319_v30 = vld [vmem:[#allocation53_spill] sm:$0xff]  ;;  %v8322_v51 = vmov 3  }
 0x8e9   : > { %1134 = vadd.xlane.f32.xlu0 %v1133_v57  ;;  %5834 = vpow2.f32 %v1485_v42  ;;  %v8309_v57 = vld [vmem:[#allocation46_spill] sm:$0xff]  ;;  %v8320_v42 = vsub.f32 %v8318_v56, %v8319_v30 }
 0x8ea   : > { %5209 = vmatpush3.bf16.msra.mxu0 %v5745_v34  ;;  %v8310_v0 = vsub.f32 %v8308_v8, %v8309_v57  ;;  %v1489_v34 = vmul.f32 1.442695, %v8316_v10 }
 0x8eb   : > { %5210 = vmatprep.subr.bf16.mxu0 %v5746_v22  ;;  %v8317_v22 = vmov 2  }
 0x8ec   : > { %v1483_v2 = vmul.f32 1.442695, %v8310_v0 }
 0x8ed   : > { %v7369_v23 = vpop.eup %5826 }
 0x8ee   : > { %v7372_v21 = vpop.eup %5828  ;;  %5211 = vmatpush3.bf16.msra.mxu0 %v5747_v40  ;;  %5836 = vpow2.f32 %v1483_v2  ;;  %v1116_v2 = vld [vmem:[#allocation4] sm:$0xff] }
 0x8ef   : > { %v7375_v16 = vpop.eup %5830  ;;  %5212 = vmatprep.subr.bf16.mxu0 %v5748_v53 }
 0x8f0   : > { %v7377_v26 = vpop.eup %5832 }
 0x8f2   : > { %5213 = vmatpush3.bf16.msra.mxu0 %v5749_v50  ;;  %v1933_v50 = vmul.f32 1.442695, %v8320_v42 }
 0x8f3   : > { %5214 = vmatprep.subr.bf16.mxu0 %v5750_v63 }
 0x8f6   : > { %1151 = vperm.xlu1 %5634, %v7369_v23   ;;  %5215 = vmatpush3.bf16.msra.mxu0 %v5751_v14  ;;  %v7403_v31 = vpop.eup %5834 }
 0x8f7   : > { %5216 = vmatprep.subr.bf16.mxu0 %v5752_v58  ;;  %v3168_v58 = vld [vmem:[%s8321_s7] sm:$0x3] }
 0x8f8   : > { %v7442_v30 = vrot.slane %v3168_v58, %v6760_v17  ;;  %v7445_v42 = vrot.slane %v3168_v58, %v6768_v33 }
 0x8fa   : > { %1161 = vperm.xlu1 %5634, %v7372_v21   ;;  %5217 = vmatpush3.bf16.msra.mxu0 %v5753_v38 }
 0x8fe   : > { %1166 = vperm.xlu1 %5634, %v7375_v16  }
 0x8ff   : > { %1156 = vperm.xlu0 %5635, %v7377_v26  }
 0x902   : > { %5636 = vset.pattern.permute.xlu1 %v8305_v12 }
 0x903   : > { %5637 = vset.pattern.permute.xlu0 %v8305_v12  ;;  %v8311_v12 = vld [vmem:[#allocation41_spill] sm:$0xff] }
 0x904   : > { %v8313_v45 = vsub.f32 %v8311_v12, %v8312_v20  ;;  %v1118_v12 = vld [vmem:[#allocation4 + $0x10] sm:$0xff]  ;;  %v1117_v20 = vld [vmem:[#allocation4 + $0x8] sm:$0xff] }
 0x905   : > { %v1122_v38 = vmul.f32 %v7372_v21, %v1118_v12  ;;  %v1121_v7 = vmul.f32 %v7377_v26, %v1117_v20  ;;  %v3188_v21 = vld [vmem:[%s8323_s28] sm:$0x3] }
 0x906   : > { %v1487_v55 = vmul.f32 1.442695, %v8313_v45 }
 0x908   : > { %5838 = vpow2.f32 %v1487_v55 }
 0x909   : > { %5840 = vpow2.f32 %v1489_v34 }
 0x90a   : > { %5842 = vpow2.f32 %v1933_v50 }
 0x91e   : > { %1535 = vadd.xlane.f32.xlu0 %v1534_v19  ;;  %v7407_v19 = vpop.eup %5836 }
 0x91f   : > { %v7410_v40 = vpop.eup %5838 }
 0x920   : > { %v7413_v53 = vpop.eup %5840 }
 0x922   : > { %1532 = vadd.xlane.f32.xlu1 %v1531_v62  ;;  %v1984_v62 = vsel %vm990_vm1, %v7213_v46, 0.0  ;;  %v7430_v46 = vpop.eup %5842 }
 0x926   : > { %1538 = vadd.xlane.f32.xlu1 %v1537_v36 }
 0x92a   : > { %1541 = vadd.xlane.f32.xlu1 %v1540_v28 }
 0x934   : > { %1563 = vperm.xlu0 %5637, %v7403_v31  }
 0x938   : > { %5638 = vset.pattern.permute.xlu0 %v8317_v22 }
 0x93b   : > { %1558 = vperm.xlu1 %5636, %v7407_v19  }
 0x93f   : > { %1568 = vperm.xlu1 %5636, %v7410_v40  }
 0x943   : > { %1573 = vperm.xlu1 %5636, %v7413_v53  }
 0x947   : > { %1649 = vrot.lane.b32.xlu1 %v7263_v5, %s6374_s8 }
 0x948   : > { %5639 = vset.pattern.permute.xlu1 %v8317_v22  ;;  %v1119_v22 = vld [vmem:[#allocation4 + $0x18] sm:$0xff] }
 0x94b   : > { %1651 = vrot.lane.b32.xlu1 %v7267_v41, %s6374_s8 }
 0x94f   : > { %1653 = vrot.lane.b32.xlu1 %v7261_v9, %s6374_s8 }
 0x953   : > { %1655 = vrot.lane.b32.xlu1 %v7265_v54, %s6374_s8  ;;  %1985 = vadd.xlane.f32.xlu0 %v1984_v62  ;;  %v1120_v54 = vmul.f32 %v7369_v23, %v1116_v2  ;;  %v7459_v2 = vrot.slane %v3188_v21, %v6768_v33  ;;  %s8348_s8 = sld [smem:[#allocation31_spill]] }
 0x959   : > { %p5070_p1 = scmp.ne.s32.totalorder %s8348_s8, 1 }
 0x95a   : > { %s8349_s19 = sld [smem:[#allocation71_spill]] (!%p5070_p1) }
 0x95b   : > { %s8350_s12 = sld [smem:[#allocation73_spill]] (!%p5070_p1) }
 0x95c   : > { %s8351_s24 = sld [smem:[#allocation74_spill]] (!%p5070_p1) }
 0x95d   : > { %s8352_s0 = sld [smem:[#allocation75_spill]] (!%p5070_p1) }
 0x95e   : > { %v3138_v5 = vpop.xlane.xlu1 %3137 }
 0x95f   : > { %v3148_v36 = vmul.f32 0.00390625, %v3138_v5  ;;  %v1145_v5 = vld [vmem:[#allocation5] sm:$0xff] }
 0x961   : > { %v3152_v8 = vadd.f32 1e-05, %v3148_v36 }
 0x962   : > { %v3141_v57 = vpop.xlane.xlu0 %3140 }
 0x963   : > { %5844 = vrsqrt.f32 %v3152_v8  ;;  %v3149_v41 = vmul.f32 0.00390625, %v3141_v57  ;;  %v1123_v8 = vmul.f32 %v7375_v16, %v1119_v22  ;;  %v1147_v16 = vld [vmem:[#allocation5 + $0x10] sm:$0xff] }
 0x965   : > { %v3153_v0 = vadd.f32 1e-05, %v3149_v41 }
 0x966   : > { %v3144_v9 = vpop.xlane.xlu1 %3143 }
 0x967   : > { %5846 = vrsqrt.f32 %v3153_v0  ;;  %v3150_v28 = vmul.f32 0.00390625, %v3144_v9  ;;  %v7456_v9 = vrot.slane %v3188_v21, %v6760_v17 }
 0x969   : > { %2008 = vperm.xlu0 %5638, %v7430_v46   ;;  %v3154_v23 = vadd.f32 1e-05, %v3150_v28 }
 0x96a   : > { %v1126_v63 = vpop.xlane.xlu1 %1125  ;;  %v3147_v14 = vpop.xlane.xlu0 %3146 }
 0x96b   : > { %v1136_v45 = vadd.f32 %v1126_v63, %v1120_v54  ;;  %v3151_v55 = vmul.f32 0.00390625, %v3147_v14  ;;  %5848 = vrsqrt.f32 %v3154_v23  ;;  %v1148_v23 = vld [vmem:[#allocation5 + $0x18] sm:$0xff] }
 0x96d   : > { %1141 = vst.msk [vmem:[#allocation4] sm:$0xff] %vm1140_vm2, %v1136_v45  ;;  %5641 = vset.pattern.permute.xlu0 %v8322_v51  ;;  %v3155_v26 = vadd.f32 1e-05, %v3151_v55  ;;  %v1981_v55 = vsel %vm990_vm1, %v7216_v44, 0.0 }
 0x96e   : > { %v1132_v10 = vpop.xlane.xlu1 %1131  ;;  %v1129_v34 = vpop.xlane.xlu0 %1128 }
 0x96f   : > { %v1138_v62 = vadd.f32 %v1132_v10, %v1122_v38  ;;  %v1137_v56 = vadd.f32 %v1129_v34, %v1121_v7  ;;  %5850 = vrsqrt.f32 %v3155_v26 }
 0x970   : > { %v5845_v50 = vpop.eup %5844 }
 0x971   : > { %v3160_v36 = vmul.f32 %v5845_v50, %v7319_v15  ;;  %1143 = vst.msk [vmem:[#allocation4 + $0x10] sm:$0xff] %vm1140_vm2, %v1138_v62  ;;  %1142 = vst.msk [vmem:[#allocation4 + $0x8] sm:$0xff] %vm1140_vm2, %v1137_v56  ;;  %v3161_v57 = vmul.f32 %v5845_v50, %v7321_v52  ;;  %v1987_v56 = vsel %vm990_vm1, %v7226_v35, 0.0 }
 0x972   : > { %v1152_v41 = vpop.permute.xlu1 %1151  ;;  %v1135_v0 = vpop.xlane.xlu0 %1134 }
 0x973   : > { %v1169_v54 = vmul.f32 %v1152_v41, %v1145_v5  ;;  %v1139_v28 = vadd.f32 %v1135_v0, %v1123_v8  ;;  %v3181_v15 = vmul.f32 %v7445_v42, %v3161_v57  ;;  %v3180_v63 = vmul.f32 %v7442_v30, %v3160_v36  ;;  %v8324_v57 = vld [vmem:[#allocation48_spill] sm:$0xff]  ;;  %v8325_v41 = vld [vmem:[#allocation49_spill] sm:$0xff] }
 0x974   : > { %v5847_v14 = vpop.eup %5846  ;;  %v8326_v35 = vsub.f32 %v8324_v57, %v8325_v41  ;;  %v8333_v57 = vsub.f32 %v7139_v13, %v7142_v1 }
 0x975   : > { %v3162_v52 = vmul.f32 %v5847_v14, %v7327_v25  ;;  %v1230_v12 = vadd.f32 %v7251_v47, %v1169_v54  ;;  %1144 = vst.msk [vmem:[#allocation4 + $0x18] sm:$0xff] %vm1140_vm2, %v1139_v28  ;;  %v3163_v20 = vmul.f32 %v5847_v14, %v7329_v60  ;;  %v7470_v58 = vadd.f32 %v7459_v2, %v3181_v15  ;;  %v1146_v60 = vld [vmem:[#allocation5 + $0x8] sm:$0xff]  ;;  %v8328_v14 = vld [vmem:[#allocation55_spill] sm:$0xff] }
 0x976   : > { %v1162_v45 = vpop.permute.xlu1 %1161  ;;  %v7476_v47 = vadd.f32 %v7456_v9, %v3180_v63  ;;  %v1937_v0 = vmul.f32 1.442695, %v8326_v35  ;;  %v8327_v63 = vld [vmem:[#allocation54_spill] sm:$0xff]  ;;  %v2383_v41 = vmul.f32 1.442695, %v8333_v57 }
 0x977   : > { %1234 = vst.msk [vmem:[#allocation5] sm:$0xff] %vm990_vm1, %v1230_v12  ;;  %v1171_v38 = vmul.f32 %v1162_v45, %v1147_v16  ;;  %1982 = vadd.xlane.f32.xlu1 %v1981_v55  ;;  %v3183_v7 = vmul.f32 %v7445_v42, %v3163_v20  ;;  %v3182_v25 = vmul.f32 %v7442_v30, %v3162_v52  ;;  %v7479_v10 = vmul.f32 0.70710677, %v7470_v58 }
 0x978   : > { %v7496_v36 = vmul.f32 0.70710677, %v7476_v47  ;;  %v8329_v16 = vsub.f32 %v8327_v63, %v8328_v14  ;;  %v1990_v12 = vsel %vm990_vm1, %v7224_v3, 0.0  ;;  %v5849_v55 = vpop.eup %5848 }
 0x979   : > { %v1232_v44 = vadd.f32 %v7249_v39, %v1171_v38  ;;  %v7483_v34 = vadd.f32 %v7459_v2, %v3183_v7  ;;  %v3241_v21 = vand.u32 2147483647, %v7479_v10  ;;  %v7489_v50 = vadd.f32 %v7456_v9, %v3182_v25 }
 0x97a   : > { %v1167_v22 = vpop.permute.xlu1 %1166  ;;  %v1157_v62 = vpop.permute.xlu0 %1156  ;;  %v1935_v52 = vmul.f32 1.442695, %v8329_v16  ;;  %vm3225_vm9 = vcmp.ge.f32.partialorder %v7479_v10, 0.0  ;;  %vm3224_vm11 = vcmp.ge.f32.partialorder %v7496_v36, 0.0 }
 0x97b   : > { %1236 = vst.msk [vmem:[#allocation5 + $0x10] sm:$0xff] %vm990_vm1, %v1232_v44  ;;  %v1172_v26 = vmul.f32 %v1167_v22, %v1148_v23  ;;  %v1170_v5 = vmul.f32 %v1157_v62, %v1146_v60  ;;  %1988 = vadd.xlane.f32.xlu1 %v1987_v56  ;;  %v7493_v39 = vmul.f32 0.70710677, %v7483_v34  ;;  %v3249_v8 = vmul.f32 0.3275911, %v3241_v21  ;;  %v8330_v44 = vld [vmem:[#allocation50_spill] sm:$0xff] }
 0x97c   : > { %v7510_v45 = vmul.f32 0.70710677, %v7489_v50  ;;  %v5851_v38 = vpop.eup %5850  ;;  %v3353_v23 = vsub.f32 0.0, %v3241_v21  ;;  %v8331_v22 = vld [vmem:[#allocation52_spill] sm:$0xff] }
 0x97d   : > { %v1233_v54 = vadd.f32 %v7253_v6, %v1172_v26  ;;  %v1231_v28 = vadd.f32 %v7255_v37, %v1170_v5  ;;  %v3243_v15 = vand.u32 2147483647, %v7493_v39  ;;  %v3257_v20 = vadd.f32 1.0, %v3249_v8 }
 0x97e   : > { %v3240_v37 = vand.u32 2147483647, %v7496_v36  ;;  %v3242_v25 = vand.u32 2147483647, %v7510_v45  ;;  %v8332_v62 = vsub.f32 %v8330_v44, %v8331_v22  ;;  %v3165_v5 = vmul.f32 %v5849_v55, %v7337_v24 }
 0x97f   : > { %1237 = vst.msk [vmem:[#allocation5 + $0x18] sm:$0xff] %vm990_vm1, %v1233_v54  ;;  %1235 = vst.msk [vmem:[#allocation5 + $0x8] sm:$0xff] %vm990_vm1, %v1231_v28  ;;  %1991 = vadd.xlane.f32.xlu1 %v1990_v12  ;;  %v3251_v6 = vmul.f32 0.3275911, %v3243_v15  ;;  %5852 = vrcp.f32 %v3257_v20  ;;  %v3167_v8 = vmul.f32 %v5851_v38, %v7345_v29  ;;  %v3355_v35 = vsub.f32 0.0, %v3243_v15 }
 0x980   : > { %5854 = vpow2.f32 %v1937_v0  ;;  %v3248_v3 = vmul.f32 0.3275911, %v3240_v37  ;;  %v3250_v60 = vmul.f32 0.3275911, %v3242_v25  ;;  %v1939_v56 = vmul.f32 1.442695, %v8332_v62 }
 0x981   : > { %v3259_v7 = vadd.f32 1.0, %v3251_v6  ;;  %5856 = vpow2.f32 %v1935_v52  ;;  %v3164_v54 = vmul.f32 %v5849_v55, %v7335_v48  ;;  %v2432_v28 = vsel %vm990_vm1, %v7232_v11, 0.0 }
 0x982   : > { %v3256_v26 = vadd.f32 1.0, %v3248_v3  ;;  %v3258_v0 = vadd.f32 1.0, %v3250_v60  ;;  %v3185_v63 = vmul.f32 %v7445_v42, %v3165_v5  ;;  %v3187_v14 = vmul.f32 %v7445_v42, %v3167_v8 }
 0x983   : > { %5858 = vrcp.f32 %v3259_v7  ;;  %v3361_v16 = vmul.f32 %v3353_v23, %v3241_v21  ;;  %v3166_v24 = vmul.f32 %v5851_v38, %v7343_v61  ;;  %v3184_v29 = vmul.f32 %v7442_v30, %v3164_v54 }
 0x984   : > { %5860 = vrcp.f32 %v3256_v26  ;;  %v3352_v13 = vsub.f32 0.0, %v3240_v37  ;;  %v7532_v1 = vadd.f32 %v7459_v2, %v3185_v63  ;;  %v7535_v48 = vadd.f32 %v7459_v2, %v3187_v14 }
 0x985   : > { %5862 = vrcp.f32 %v3258_v0  ;;  %v3363_v11 = vmul.f32 %v3355_v35, %v3243_v15  ;;  %v3354_v52 = vsub.f32 0.0, %v3242_v25  ;;  %v3186_v12 = vmul.f32 %v7442_v30, %v3166_v24  ;;  %v1523_v15 = vld [vmem:[#allocation4] sm:$0xff] }
 0x986   : > { %5864 = vpow2.f32 %v1939_v56  ;;  %v7539_v42 = vadd.f32 %v7456_v9, %v3184_v29  ;;  %v7542_v61 = vmul.f32 0.70710677, %v7532_v1  ;;  %v7545_v21 = vmul.f32 0.70710677, %v7535_v48 }
 0x987   : > { %5866 = vpow2.f32 %v2383_v41  ;;  %v2435_v20 = vsel %vm990_vm1, %v7242_v4, 0.0  ;;  %v2438_v2 = vsel %vm990_vm1, %v7240_v59, 0.0  ;;  %v3370_v55 = vmul.f32 1.442695, %v3361_v16 }
 0x988   : > { %2433 = vadd.xlane.f32.xlu0 %v2432_v28  ;;  %v7552_v30 = vadd.f32 %v7456_v9, %v3186_v12  ;;  %v3360_v6 = vmul.f32 %v3352_v13, %v3240_v37  ;;  %v7555_v38 = vand.u32 2147483647, %v7542_v61  ;;  %v7558_v7 = vand.u32 2147483647, %v7545_v21 }
 0x989   : > { %v3374_v23 = vmul.f32 1.442695, %v3363_v11  ;;  %v3362_v4 = vmul.f32 %v3354_v52, %v3242_v25  ;;  %v7563_v60 = vmul.f32 0.70710677, %v7539_v42  ;;  %v7571_v37 = vmul.f32 %v7407_v19, %v1523_v15 }
 0x98a   : > { %v7566_v59 = vmul.f32 0.70710677, %v7552_v30  ;;  %v3253_v22 = vmul.f32 0.3275911, %v7555_v38  ;;  %v3255_v62 = vmul.f32 0.3275911, %v7558_v7  ;;  %5868 = vpow2.f32 %v3370_v55 }
 0x98b   : > { %v7579_v25 = vmul.f32 0.5, %v7470_v58  ;;  %v7583_v26 = vmul.f32 0.5, %v7476_v47  ;;  %v3368_v8 = vmul.f32 1.442695, %v3360_v6  ;;  %v7589_v35 = vmul.f32 0.5, %v7483_v34 }
 0x98c   : > { %2436 = vadd.xlane.f32.xlu0 %v2435_v20  ;;  %v7560_v3 = vpop.eup %5852  ;;  %v3261_v57 = vadd.f32 1.0, %v3253_v22  ;;  %v3263_v41 = vadd.f32 1.0, %v3255_v62  ;;  %5870 = vpow2.f32 %v3374_v23  ;;  %v3372_v0 = vmul.f32 1.442695, %v3362_v4 }
 0x98d   : > { %v7568_v9 = vpop.eup %5854  ;;  %v3281_v44 = vmul.f32 1.0614054, %v7560_v3  ;;  %v3244_v47 = vand.u32 2147483647, %v7563_v60  ;;  %v7595_v28 = vand.u32 2147483647, %v7566_v59 }
 0x98e   : > { %v7576_v56 = vpop.eup %5856  ;;  %5872 = vrcp.f32 %v3261_v57  ;;  %v6378_v14 = vmov -1.0   ;;  %v7605_v24 = vmul.f32 0.5, %v7489_v50  ;;  %v3357_v55 = vsub.f32 0.0, %v7555_v38 }
 0x98f   : > { %v3289_v19 = vadd.f32 -1.4531521, %v3281_v44  ;;  %v7602_v34 = vsel %vm3225_vm9, 1.0, %v6378_v14  ;;  %5874 = vrcp.f32 %v3263_v41  ;;  %v3252_v52 = vmul.f32 0.3275911, %v3244_v47 }
 0x990   : > { %v7585_v5 = vpop.eup %5858  ;;  %2013 = vperm.xlu1 %5639, %v7576_v56   ;;  %2439 = vadd.xlane.f32.xlu0 %v2438_v2  ;;  %5876 = vpow2.f32 %v3368_v8  ;;  %v3254_v50 = vmul.f32 0.3275911, %v7595_v28  ;;  %v3359_v22 = vsub.f32 0.0, %v7558_v7  ;;  %vm3227_vm10 = vcmp.ge.f32.partialorder %v7493_v39, 0.0 }
 0x991   : > { %v3283_v58 = vmul.f32 1.0614054, %v7585_v5  ;;  %v3297_v54 = vmul.f32 %v7560_v3, %v3289_v19  ;;  %v7597_v63 = vpop.eup %5860  ;;  %5878 = vpow2.f32 %v3372_v0  ;;  %v3260_v6 = vadd.f32 1.0, %v3252_v52 }
 0x992   : > { %v7607_v29 = vpop.eup %5862  ;;  %v3280_v11 = vmul.f32 1.0614054, %v7597_v63  ;;  %v3262_v62 = vadd.f32 1.0, %v3254_v50  ;;  %vm3226_vm12 = vcmp.ge.f32.partialorder %v7510_v45, 0.0  ;;  %v3367_v52 = vmul.f32 %v3359_v22, %v7558_v7 }
 0x993   : > { %v3291_v16 = vadd.f32 -1.4531521, %v3283_v58  ;;  %v3305_v13 = vadd.f32 1.4214138, %v3297_v54  ;;  %v7611_v12 = vpop.eup %5864  ;;  %v3282_v20 = vmul.f32 1.0614054, %v7607_v29  ;;  %5880 = vrcp.f32 %v3260_v6 }
 0x994   : > { %2018 = vperm.xlu1 %5639, %v7568_v9   ;;  %v3288_v15 = vadd.f32 -1.4531521, %v3280_v11  ;;  %v7618_v23 = vpop.eup %5866  ;;  %5882 = vrcp.f32 %v3262_v62  ;;  %v3356_v58 = vsub.f32 0.0, %v3244_v47  ;;  %v3235_v50 = vsel %vm3227_vm10, 1.0, %v6378_v14 }
 0x995   : > { %v3299_v10 = vmul.f32 %v7585_v5, %v3291_v16  ;;  %v3313_v2 = vmul.f32 %v7560_v3, %v3305_v13  ;;  %v3290_v44 = vadd.f32 -1.4531521, %v3282_v20  ;;  %v3365_v16 = vmul.f32 %v3357_v55, %v7555_v38  ;;  %v1524_v20 = vld [vmem:[#allocation4 + $0x8] sm:$0xff] }
 0x996   : > { %v3296_v8 = vmul.f32 %v7597_v63, %v3288_v15  ;;  %v3358_v38 = vsub.f32 0.0, %v7595_v28  ;;  %v7640_v55 = vsel %vm3224_vm11, 1.0, %v6378_v14  ;;  %v3364_v6 = vmul.f32 %v3356_v58, %v3244_v47 }
 0x997   : > { %v3307_v4 = vadd.f32 1.4214138, %v3299_v10  ;;  %v3321_v19 = vadd.f32 -0.28449672, %v3313_v2  ;;  %v3298_v41 = vmul.f32 %v7607_v29, %v3290_v44  ;;  %v5869_v10 = vpop.eup %5868  ;;  %v7648_v39 = vsel %vm3226_vm12, 1.0, %v6378_v14 }
 0x998   : > { %2023 = vperm.xlu1 %5639, %v7611_v12   ;;  %v3304_v54 = vadd.f32 1.4214138, %v3296_v8  ;;  %v3378_v22 = vmul.f32 1.442695, %v3365_v16  ;;  %v3366_v58 = vmul.f32 %v3358_v38, %v7595_v28  ;;  %vm3229_vm13 = vcmp.ge.f32.partialorder %v7542_v61, 0.0 }
 0x999   : > { %v3315_v57 = vmul.f32 %v7585_v5, %v3307_v4  ;;  %v3329_v0 = vmul.f32 %v7560_v3, %v3321_v19  ;;  %v3306_v11 = vadd.f32 1.4214138, %v3298_v41  ;;  %v1528_v19 = vmul.f32 %v7403_v31, %v1524_v20 }
 0x99a   : > { %v3312_v36 = vmul.f32 %v7597_v63, %v3304_v54  ;;  %v3382_v41 = vmul.f32 1.442695, %v3367_v52  ;;  %5884 = vpow2.f32 %v3378_v22  ;;  %vm3231_vm14 = vcmp.ge.f32.partialorder %v7545_v21, 0.0 }
 0x99b   : > { %v3323_v13 = vadd.f32 -0.28449672, %v3315_v57  ;;  %v3337_v2 = vadd.f32 0.2548296, %v3329_v0  ;;  %v3314_v7 = vmul.f32 %v7607_v29, %v3306_v11  ;;  %v3239_v61 = vsel %vm3231_vm14, 1.0, %v6378_v14 }
 0x99c   : > { %2097 = vrot.lane.b32.xlu1 %v7274_v18, %s6373_s13  ;;  %v5871_v18 = vpop.eup %5870  ;;  %v3320_v44 = vadd.f32 -0.28449672, %v3312_v36  ;;  %5886 = vpow2.f32 %v3382_v41  ;;  %vm3228_vm15 = vcmp.ge.f32.partialorder %v7563_v60, 0.0  ;;  %vm3230_vm0 = vcmp.ge.f32.partialorder %v7566_v59, 0.0 }
 0x99d   : > { %v3331_v15 = vmul.f32 %v7585_v5, %v3323_v13  ;;  %5640 = vset.pattern.permute.xlu1 %v8322_v51  ;;  %v3345_v4 = vmul.f32 %v7560_v3, %v3337_v2  ;;  %v7650_v62 = vpop.eup %5872  ;;  %v3322_v57 = vadd.f32 -0.28449672, %v3314_v7  ;;  %v3376_v13 = vmul.f32 1.442695, %v3364_v6 }
 0x99e   : > { %v7653_v47 = vpop.eup %5874  ;;  %v3328_v3 = vmul.f32 %v7597_v63, %v3320_v44  ;;  %v3285_v45 = vmul.f32 1.0614054, %v7650_v62  ;;  %v3212_v60 = vmul.f32 0.5, %v7539_v42  ;;  %v3214_v59 = vmul.f32 0.5, %v7552_v30  ;;  %v8334_v30 = vld [vmem:[#allocation58_spill] sm:$0xff] }
 0x99f   : > { %v3339_v8 = vadd.f32 0.2548296, %v3331_v15  ;;  %v3385_v51 = vmul.f32 %v5869_v10, %v3345_v4  ;;  %v5877_v0 = vpop.eup %5876  ;;  %v3330_v31 = vmul.f32 %v7607_v29, %v3322_v57  ;;  %v3287_v16 = vmul.f32 1.0614054, %v7653_v47 }
 0x9a0   : > { %2099 = vrot.lane.b32.xlu1 %v7279_v27, %s6373_s13  ;;  %v5879_v11 = vpop.eup %5878  ;;  %v3336_v20 = vadd.f32 0.2548296, %v3328_v3  ;;  %v3293_v2 = vadd.f32 -1.4531521, %v3285_v45  ;;  %v3380_v15 = vmul.f32 1.442695, %v3366_v58  ;;  %5888 = vpow2.f32 %v3376_v13 }
 0x9a1   : > { %v3347_v54 = vmul.f32 %v7585_v5, %v3339_v8  ;;  %v3393_v52 = vsub.f32 1.0, %v3385_v51  ;;  %v3338_v10 = vadd.f32 0.2548296, %v3330_v31  ;;  %v3295_v36 = vadd.f32 -1.4531521, %v3287_v16  ;;  %v7668_v7 = vpop.eup %5880 }
 0x9a2   : > { %v3344_v5 = vmul.f32 %v7597_v63, %v3336_v20  ;;  %v3301_v38 = vmul.f32 %v7650_v62, %v3293_v2  ;;  %v7672_v44 = vpop.eup %5882  ;;  %v3284_v63 = vmul.f32 1.0614054, %v7668_v7  ;;  %5890 = vpow2.f32 %v3380_v15  ;;  %v1525_v20 = vld [vmem:[#allocation4 + $0x10] sm:$0xff] }
 0x9a3   : > { %v3387_v27 = vmul.f32 %v5871_v18, %v3347_v54  ;;  %v3401_v28 = vmul.f32 %v3393_v52, %v7602_v34  ;;  %v3346_v4 = vmul.f32 %v7607_v29, %v3338_v10  ;;  %v3303_v18 = vmul.f32 %v7653_v47, %v3295_v36 }
 0x9a4   : > { %2101 = vrot.lane.b32.xlu1 %v7271_v49, %s6373_s13  ;;  %v3384_v22 = vmul.f32 %v5877_v0, %v3344_v5  ;;  %v3309_v34 = vadd.f32 1.4214138, %v3301_v38  ;;  %v3286_v3 = vmul.f32 1.0614054, %v7672_v44  ;;  %v3292_v16 = vadd.f32 -1.4531521, %v3284_v63 }
 0x9a5   : > { %v3395_v6 = vsub.f32 1.0, %v3387_v27  ;;  %v3409_v49 = vadd.f32 1.0, %v3401_v28  ;;  %v3386_v41 = vmul.f32 %v5879_v11, %v3346_v4  ;;  %v3311_v51 = vadd.f32 1.4214138, %v3303_v18 }
 0x9a6   : > { %2461 = vperm.xlu0 %5641, %v7618_v23   ;;  %v3392_v29 = vsub.f32 1.0, %v3384_v22  ;;  %v3317_v58 = vmul.f32 %v7650_v62, %v3309_v34  ;;  %v3300_v10 = vmul.f32 %v7668_v7, %v3292_v16  ;;  %v1526_v34 = vld [vmem:[#allocation4 + $0x18] sm:$0xff] }
 0x9a7   : > { %v1536_v8 = vpop.xlane.xlu0 %1535  ;;  %v3403_v57 = vmul.f32 %v3395_v6, %v3235_v50  ;;  %v3394_v31 = vsub.f32 1.0, %v3386_v41  ;;  %v3319_v0 = vmul.f32 %v7653_v47, %v3311_v51  ;;  %v3417_v50 = vmul.f32 %v3409_v49, %v7579_v25  ;;  %v5885_v18 = vpop.eup %5884 }
 0x9a8   : > { %v1544_v45 = vadd.f32 %v1536_v8, %v1528_v19  ;;  %2103 = vrot.lane.b32.xlu1 %v7276_v32, %s6373_s13  ;;  %v3400_v13 = vmul.f32 %v3392_v29, %v7640_v55  ;;  %v3325_v11 = vadd.f32 -0.28449672, %v3317_v58  ;;  %v3294_v19 = vadd.f32 -1.4531521, %v3286_v3  ;;  %s8347_s13 = sld [smem:[#allocation77_spill]] }
 0x9a9   : > { %v3411_v54 = vadd.f32 1.0, %v3403_v57  ;;  %v3402_v2 = vmul.f32 %v3394_v31, %v7648_v39  ;;  %v3327_v27 = vadd.f32 -0.28449672, %v3319_v0  ;;  %v3308_v6 = vadd.f32 1.4214138, %v3300_v10  ;;  %v5887_v57 = vpop.eup %5886 }
 0x9aa   : > { %1549 = vst.msk [vmem:[#allocation4 + $0x8] sm:$0xff] %vm1547_vm3, %v1544_v45  ;;  %v3408_v28 = vadd.f32 1.0, %v3400_v13  ;;  %v3333_v5 = vmul.f32 %v7650_v62, %v3325_v11  ;;  %v3302_v25 = vmul.f32 %v7672_v44, %v3294_v19  ;;  %v3237_v11 = vsel %vm3229_vm13, 1.0, %v6378_v14 }
 0x9ab   : > { %v1533_v52 = vpop.xlane.xlu1 %1532  ;;  %v3419_v32 = vmul.f32 %v3411_v54, %v7589_v35  ;;  %v3410_v55 = vadd.f32 1.0, %v3402_v2  ;;  %v3335_v15 = vmul.f32 %v7653_v47, %v3327_v27  ;;  %v1529_v35 = vmul.f32 %v7410_v40, %v1525_v20 }
 0x9ac   : > { %v1543_v36 = vadd.f32 %v1533_v52, %v7571_v37  ;;  %v3341_v39 = vadd.f32 0.2548296, %v3333_v5  ;;  %v3310_v4 = vadd.f32 1.4214138, %v3302_v25  ;;  %v3416_v37 = vmul.f32 %v3408_v28, %v7583_v26 }
 0x9ad   : > { %v3425_v38 = vpack.c.bf16 %v3419_v32, %v3417_v50  ;;  %v3418_v22 = vmul.f32 %v3410_v55, %v7605_v24  ;;  %v3343_v63 = vadd.f32 0.2548296, %v3335_v15  ;;  %v3316_v8 = vmul.f32 %v7668_v7, %v3308_v6  ;;  %v5889_v58 = vpop.eup %5888 }
 0x9ae   : > { %1548 = vst.msk [vmem:[#allocation4] sm:$0xff] %vm1547_vm3, %v1543_v36  ;;  %v3349_v51 = vmul.f32 %v7650_v62, %v3341_v39  ;;  %v3318_v3 = vmul.f32 %v7672_v44, %v3310_v4  ;;  %v1530_v26 = vmul.f32 %v7413_v53, %v1526_v34  ;;  %v3213_v27 = vmul.f32 0.5, %v7532_v1 }
 0x9af   : > { %v1539_v49 = vpop.xlane.xlu1 %1538  ;;  %3595 = vmatprep.mubr.bf16.mxu0 %v3425_v38  ;;  %v3424_v40 = vpack.c.bf16 %v3418_v22, %v3416_v37  ;;  %v3351_v45 = vmul.f32 %v7653_v47, %v3343_v63  ;;  %v3324_v29 = vadd.f32 -0.28449672, %v3316_v8  ;;  %v5891_v13 = vpop.eup %5890  ;;  %v3215_v28 = vmul.f32 0.5, %v7535_v48  ;;  %v1552_v22 = vld [vmem:[#allocation5] sm:$0xff] }
 0x9b0   : > { %v1545_v41 = vadd.f32 %v1539_v49, %v1529_v35  ;;  %v3389_v24 = vmul.f32 %v5885_v18, %v3349_v51  ;;  %v3326_v54 = vadd.f32 -0.28449672, %v3318_v3  ;;  %v3238_v4 = vsel %vm3230_vm0, 1.0, %v6378_v14 }
 0x9b1   : > { %3596 = vmatmul.mubr.bf16.vlgmr.msra.gmra.mxu0 %v3424_v40  ;;  %v3391_v62 = vmul.f32 %v5887_v57, %v3351_v45  ;;  %v3332_v0 = vmul.f32 %v7668_v7, %v3324_v29  ;;  %v1564_v57 = vpop.permute.xlu0 %1563  ;;  %v1553_v40 = vld [vmem:[#allocation5 + $0x8] sm:$0xff] }
 0x9b2   : > { %1550 = vst.msk [vmem:[#allocation4 + $0x10] sm:$0xff] %vm1547_vm3, %v1545_v41  ;;  %v3397_v50 = vsub.f32 1.0, %v3389_v24  ;;  %v3334_v47 = vmul.f32 %v7672_v44, %v3326_v54 }
 0x9b3   : > { %v1542_v31 = vpop.xlane.xlu1 %1541  ;;  %v3399_v19 = vsub.f32 1.0, %v3391_v62  ;;  %v3340_v53 = vadd.f32 0.2548296, %v3332_v0  ;;  %v2429_v62 = vsel %vm990_vm1, %v7234_v43, 0.0 }
 0x9b4   : > { %v1546_v16 = vadd.f32 %v1542_v31, %v1530_v26  ;;  %v3405_v52 = vmul.f32 %v3397_v50, %v3237_v11  ;;  %v3342_v20 = vadd.f32 0.2548296, %v3334_v47  ;;  %v8335_v26 = vld [vmem:[#allocation59_spill] sm:$0xff]  ;;  %v8337_v47 = vld [vmem:[#allocation56_spill] sm:$0xff] }
 0x9b5   : > { %v3407_v21 = vmul.f32 %v3399_v19, %v3239_v61  ;;  %v3348_v2 = vmul.f32 %v7668_v7, %v3340_v53  ;;  %v3236_v7 = vsel %vm3228_vm15, 1.0, %v6378_v14  ;;  %v1577_v14 = vmul.f32 %v1564_v57, %v1553_v40 }
 0x9b6   : > { %1551 = vst.msk [vmem:[#allocation4 + $0x18] sm:$0xff] %vm1547_vm3, %v1546_v16  ;;  %v3413_v10 = vadd.f32 1.0, %v3405_v52  ;;  %v3350_v36 = vmul.f32 %v7672_v44, %v3342_v20  ;;  %v8336_v24 = vsub.f32 %v8334_v30, %v8335_v26  ;;  %v1555_v16 = vld [vmem:[#allocation5 + $0x18] sm:$0xff]  ;;  %v8341_v20 = vld [vmem:[#allocation61_spill] sm:$0xff] }
 0x9b7   : > { %v1559_v32 = vpop.permute.xlu1 %1558  ;;  %v3415_v5 = vadd.f32 1.0, %v3407_v21  ;;  %v3388_v25 = vmul.f32 %v5889_v58, %v3348_v2  ;;  %v1554_v58 = vld [vmem:[#allocation5 + $0x10] sm:$0xff]  ;;  %v8340_v52 = vld [vmem:[#allocation60_spill] sm:$0xff]  ;;  %v1974_v21 = vld [vmem:[#allocation4 + $0x8] sm:$0xff] }
 0x9b8   : > { %v3390_v38 = vmul.f32 %v5891_v13, %v3350_v36  ;;  %v3421_v55 = vmul.f32 %v3413_v10, %v3213_v27  ;;  %v1576_v34 = vmul.f32 %v1559_v32, %v1552_v22  ;;  %v2381_v54 = vmul.f32 1.442695, %v8336_v24  ;;  %v8338_v13 = vld [vmem:[#allocation57_spill] sm:$0xff] }
 0x9b9   : > { %v3423_v15 = vmul.f32 %v3415_v5, %v3215_v28  ;;  %v3396_v6 = vsub.f32 1.0, %v3388_v25  ;;  %v8339_v11 = vsub.f32 %v8337_v47, %v8338_v13  ;;  %v8342_v32 = vsub.f32 %v8340_v52, %v8341_v20  ;;  %v8343_v25 = vld [vmem:[#allocation63_spill] sm:$0xff] }
 0x9ba   : > { %v3398_v39 = vsub.f32 1.0, %v3390_v38  ;;  %5892 = vpow2.f32 %v2381_v54  ;;  %v1978_v2 = vmul.f32 %v7576_v56, %v1974_v21  ;;  %v8344_v38 = vld [vmem:[#allocation65_spill] sm:$0xff]  ;;  %v8345_v56 = vld [vmem:[#allocation62_spill] sm:$0xff] }
 0x9bb   : > { %v1569_v35 = vpop.permute.xlu1 %1568  ;;  %v3427_v1 = vpack.c.bf16 %v3423_v15, %v3421_v55  ;;  %v3404_v44 = vmul.f32 %v3396_v6, %v3236_v7  ;;  %v2385_v19 = vmul.f32 1.442695, %v8339_v11  ;;  %v2387_v43 = vmul.f32 1.442695, %v8342_v32  ;;  %v8346_v55 = vld [vmem:[#allocation64_spill] sm:$0xff]  ;;  %v1973_v15 = vld [vmem:[#allocation4] sm:$0xff] }
 0x9bc   : > { %v3406_v18 = vmul.f32 %v3398_v39, %v3238_v4  ;;  %v1578_v42 = vmul.f32 %v1569_v35, %v1554_v58  ;;  %v1977_v6 = vmul.f32 %v7430_v46, %v1973_v15  ;;  %v1975_v7 = vld [vmem:[#allocation4 + $0x10] sm:$0xff] }
 0x9bd   : > { %3603 = vmatprep.mubr.bf16.mxu0 %v3427_v1  ;;  %v3412_v48 = vadd.f32 1.0, %v3404_v44  ;;  %5894 = vpow2.f32 %v2385_v19  ;;  %v1979_v1 = vmul.f32 %v7568_v9, %v1975_v7  ;;  %v1976_v44 = vld [vmem:[#allocation4 + $0x18] sm:$0xff] }
 0x9be   : > { %v3414_v37 = vadd.f32 1.0, %v3406_v18  ;;  %5896 = vpow2.f32 %v2387_v43 }
 0x9bf   : > { %v1574_v49 = vpop.permute.xlu1 %1573  ;;  %v3420_v63 = vmul.f32 %v3412_v48, %v3212_v60  ;;  %v1980_v48 = vmul.f32 %v7611_v12, %v1976_v44  ;;  %v5053_v44 = vld [vmem:[%s8347_s13] ss:$0 sm:$0xff] }
 0x9c0   : > { %v3422_v8 = vmul.f32 %v3414_v37, %v3214_v59  ;;  %v1579_v50 = vmul.f32 %v1574_v49, %v1555_v16 }
 0x9c2   : > { %v3426_v51 = vpack.c.bf16 %v3422_v8, %v3420_v63 }
 0x9c3   : > { %v1650_v41 = vpop.permute.xlu1 %1649 }
 0x9c4   : > { %v1661_v3 = vadd.f32 %v1650_v41, %v1576_v34  ;;  %3604 = vmatmul.mubr.bf16.gmra.mxu0 %v3426_v51 }
 0x9c6   : > { %1666 = vst.msk [vmem:[#allocation5] sm:$0xff] %vm1665_vm6, %v1661_v3 }
 0x9c7   : > { %v1652_v45 = vpop.permute.xlu1 %1651  ;;  %v7734_v27 = vpop.eup %5892 }
 0x9c8   : > { %v1662_v29 = vadd.f32 %v1652_v45, %v1577_v14 }
 0x9ca   : > { %1667 = vst.msk [vmem:[#allocation5 + $0x8] sm:$0xff] %vm1665_vm6, %v1662_v29  ;;  %v5895_v28 = vpop.eup %5894 }
 0x9cb   : > { %v1654_v31 = vpop.permute.xlu1 %1653  ;;  %v5897_v5 = vpop.eup %5896 }
 0x9cc   : > { %v1663_v0 = vadd.f32 %v1654_v31, %v1578_v42  ;;  %2430 = vadd.xlane.f32.xlu1 %v2429_v62 }
 0x9cd   : > { %v2002_v12 = vld [vmem:[#allocation5] sm:$0xff] }
 0x9ce   : > { %1668 = vst.msk [vmem:[#allocation5 + $0x10] sm:$0xff] %vm1665_vm6, %v1663_v0 }
 0x9cf   : > { %v1656_v53 = vpop.permute.xlu1 %1655 }
 0x9d0   : > { %v1664_v61 = vadd.f32 %v1656_v53, %v1579_v50 }
 0x9d1   : > { %v2003_v30 = vld [vmem:[#allocation5 + $0x8] sm:$0xff] }
 0x9d2   : > { %1669 = vst.msk [vmem:[#allocation5 + $0x18] sm:$0xff] %vm1665_vm6, %v1664_v61 }
 0x9d5   : > { %v2004_v31 = vld [vmem:[#allocation5 + $0x10] sm:$0xff] }
 0x9d9   : > { %v2005_v50 = vld [vmem:[#allocation5 + $0x18] sm:$0xff] }
 0x9dc   : > { %v1986_v10 = vpop.xlane.xlu0 %1985 }
 0x9dd   : > { %v1994_v36 = vadd.f32 %v1986_v10, %v1978_v2  ;;  %2456 = vperm.xlu1 %5640, %v7734_v27  }
 0x9df   : > { %1999 = vst.msk [vmem:[#allocation4 + $0x8] sm:$0xff] %vm1997_vm4, %v1994_v36 }
 0x9e1   : > { %2466 = vperm.xlu1 %5640, %v5895_v28  }
 0x9e4   : > { %v2009_v46 = vpop.permute.xlu0 %2008 }
 0x9e5   : > { %2471 = vperm.xlu1 %5640, %v5897_v5   ;;  %v2026_v14 = vmul.f32 %v2009_v46, %v2002_v12  ;;  %v5898_v46 = vld [vmem:[%s6713_s25] sm:$0xff] }
 0x9e6   : > { %v2422_v37 = vld [vmem:[#allocation4 + $0x8] sm:$0xff] }
 0x9e7   : > { %v2426_v34 = vmul.f32 %v7618_v23, %v2422_v37 }
 0x9e9   : > { %2545 = vrot.lane.b32.xlu1 %v8343_v25, %s6372_s6 }
 0x9ed   : > { %2547 = vrot.lane.b32.xlu1 %v8344_v38, %s6372_s6 }
 0x9f1   : > { %2549 = vrot.lane.b32.xlu1 %v8345_v56, %s6372_s6 }
 0x9f5   : > { %2551 = vrot.lane.b32.xlu1 %v8346_v55, %s6372_s6  ;;  %s8353_s6 = sld [smem:[#allocation77_spill]] (!%p5070_p1) }
 0xa00   : > { %v1983_v35 = vpop.xlane.xlu1 %1982 }
 0xa01   : > { %v1993_v39 = vadd.f32 %v1983_v35, %v1977_v6 }
 0xa03   : > { %1998 = vst.msk [vmem:[#allocation4] sm:$0xff] %vm1997_vm4, %v1993_v39 }
 0xa04   : > { %v1989_v4 = vpop.xlane.xlu1 %1988 }
 0xa05   : > { %v1995_v18 = vadd.f32 %v1989_v4, %v1979_v1 }
 0xa07   : > { %2000 = vst.msk [vmem:[#allocation4 + $0x10] sm:$0xff] %vm1997_vm4, %v1995_v18 }
 0xa08   : > { %v1992_v49 = vpop.xlane.xlu1 %1991 }
 0xa09   : > { %v1996_v60 = vadd.f32 %v1992_v49, %v1980_v48 }
 0xa0a   : > { %v2421_v19 = vld [vmem:[#allocation4] sm:$0xff] }
 0xa0b   : > { %2001 = vst.msk [vmem:[#allocation4 + $0x18] sm:$0xff] %vm1997_vm4, %v1996_v60  ;;  %v2425_v53 = vmul.f32 %v7734_v27, %v2421_v19 }
 0xa0c   : > { %v2014_v59 = vpop.permute.xlu1 %2013 }
 0xa0d   : > { %v2027_v26 = vmul.f32 %v2014_v59, %v2003_v30 }
 0xa0e   : > { %v2423_v8 = vld [vmem:[#allocation4 + $0x10] sm:$0xff] }
 0xa0f   : > { %v2427_v41 = vmul.f32 %v5895_v28, %v2423_v8 }
 0xa10   : > { %v2019_v22 = vpop.permute.xlu1 %2018 }
 0xa11   : > { %v2434_v63 = vpop.xlane.xlu0 %2433  ;;  %v2028_v62 = vmul.f32 %v2019_v22, %v2004_v31 }
 0xa12   : > { %v2442_v9 = vadd.f32 %v2434_v63, %v2426_v34  ;;  %v2424_v3 = vld [vmem:[#allocation4 + $0x18] sm:$0xff]  ;;  %v5899_v63 = vld [vmem:[%s6713_s25 + $0x8] sm:$0xff] }
 0xa13   : > { %v2428_v29 = vmul.f32 %v5897_v5, %v2424_v3 }
 0xa14   : > { %2447 = vst.msk [vmem:[#allocation4 + $0x8] sm:$0xff] %vm2445_vm5, %v2442_v9  ;;  %v2024_v57 = vpop.permute.xlu1 %2023 }
 0xa15   : > { %v2437_v51 = vpop.xlane.xlu0 %2436  ;;  %v2029_v47 = vmul.f32 %v2024_v57, %v2005_v50 }
 0xa16   : > { %v2443_v40 = vadd.f32 %v2437_v51, %v2427_v41 }
 0xa18   : > { %2448 = vst.msk [vmem:[#allocation4 + $0x10] sm:$0xff] %vm2445_vm5, %v2443_v40  ;;  %v2098_v45 = vpop.permute.xlu1 %2097  ;;  %v5900_v40 = vld [vmem:[%s6713_s25 + $0x10] sm:$0xff] }
 0xa19   : > { %v2109_v58 = vadd.f32 %v2098_v45, %v2026_v14  ;;  %v2440_v42 = vpop.xlane.xlu0 %2439 }
 0xa1a   : > { %v2444_v23 = vadd.f32 %v2440_v42, %v2428_v29 }
 0xa1b   : > { %2114 = vst.msk [vmem:[#allocation5] sm:$0xff] %vm2113_vm7, %v2109_v58  ;;  %v5901_v58 = vld [vmem:[%s6713_s25 + $0x18] sm:$0xff] }
 0xa1c   : > { %2449 = vst.msk [vmem:[#allocation4 + $0x18] sm:$0xff] %vm2445_vm5, %v2444_v23  ;;  %v2100_v24 = vpop.permute.xlu1 %2099 }
 0xa1d   : > { %v2110_v54 = vadd.f32 %v2100_v24, %v2027_v26 }
 0xa1f   : > { %2115 = vst.msk [vmem:[#allocation5 + $0x8] sm:$0xff] %vm2113_vm7, %v2110_v54 }
 0xa20   : > { %v2102_v0 = vpop.permute.xlu1 %2101 }
 0xa21   : > { %v2111_v16 = vadd.f32 %v2102_v0, %v2028_v62  ;;  %v2462_v5 = vpop.permute.xlu0 %2461 }
 0xa22   : > { %v2450_v21 = vld [vmem:[#allocation5] sm:$0xff] }
 0xa23   : > { %2116 = vst.msk [vmem:[#allocation5 + $0x10] sm:$0xff] %vm2113_vm7, %v2111_v16 }
 0xa24   : > { %v2104_v13 = vpop.permute.xlu1 %2103 }
 0xa25   : > { %v2112_v11 = vadd.f32 %v2104_v13, %v2029_v47 }
 0xa26   : > { %v2451_v10 = vld [vmem:[#allocation5 + $0x8] sm:$0xff] }
 0xa27   : > { %2117 = vst.msk [vmem:[#allocation5 + $0x18] sm:$0xff] %vm2113_vm7, %v2112_v11  ;;  %v2475_v25 = vmul.f32 %v2462_v5, %v2451_v10 }
 0xa2a   : > { %v2452_v55 = vld [vmem:[#allocation5 + $0x10] sm:$0xff] }
 0xa2e   : > { %v2453_v35 = vld [vmem:[#allocation5 + $0x18] sm:$0xff] }
 0xa55   : > { %v2431_v61 = vpop.xlane.xlu1 %2430 }
 0xa56   : > { %v2441_v52 = vadd.f32 %v2431_v61, %v2425_v53 }
 0xa58   : > { %2446 = vst.msk [vmem:[#allocation4] sm:$0xff] %vm2445_vm5, %v2441_v52 }
 0xa59   : > { %v2457_v20 = vpop.permute.xlu1 %2456 }
 0xa5a   : > { %v2474_v2 = vmul.f32 %v2457_v20, %v2450_v21 }
 0xa5d   : > { %v2467_v32 = vpop.permute.xlu1 %2466 }
 0xa5e   : > { %v2476_v27 = vmul.f32 %v2467_v32, %v2452_v55 }
 0xa61   : > { %v2472_v43 = vpop.permute.xlu1 %2471 }
 0xa62   : > { %v2477_v7 = vmul.f32 %v2472_v43, %v2453_v35 }
 0xa65   : > { %v2546_v36 = vpop.permute.xlu1 %2545 }
 0xa66   : > { %v2557_v28 = vadd.f32 %v2546_v36, %v2474_v2 }
 0xa68   : > { %2562 = vst.msk [vmem:[#allocation5] sm:$0xff] %vm2561_vm8, %v2557_v28 }
 0xa69   : > { %v2548_v38 = vpop.permute.xlu1 %2547 }
 0xa6a   : > { %v2558_v56 = vadd.f32 %v2548_v38, %v2475_v25 }
 0xa6c   : > { %2563 = vst.msk [vmem:[#allocation5 + $0x8] sm:$0xff] %vm2561_vm8, %v2558_v56 }
 0xa6d   : > { %v2550_v15 = vpop.permute.xlu1 %2549 }
 0xa6e   : > { %v2559_v6 = vadd.f32 %v2550_v15, %v2476_v27 }
 0xa70   : > { %2564 = vst.msk [vmem:[#allocation5 + $0x10] sm:$0xff] %vm2561_vm8, %v2559_v6 }
 0xa71   : > { %v2552_v39 = vpop.permute.xlu1 %2551  ;;  %v5218_v4 = vpop.f32.mrf.mxu0 }
 0xa72   : > { %v2560_v1 = vadd.f32 %v2552_v39, %v2477_v7 }
 0xa73   : > { %v5219_v18 = vpop.f32.mrf.mxu0 }
 0xa74   : > { %2565 = vst.msk [vmem:[#allocation5 + $0x18] sm:$0xff] %vm2561_vm8, %v2560_v1  ;;  %v5220_v48 = vadd.f32 %v5219_v18, %v5218_v4 }
 0xa75   : > { %v5221_v49 = vpop.f32.mrf.mxu0 }
 0xa76   : > { %v3598_v60 = vadd.f32 %v5220_v48, %v5053_v44 }
 0xa77   : > { %v5222_v59 = vpop.f32.mrf.mxu0 }
 0xa78   : > { %v3612_v37 = vadd.f32 %v5898_v46, %v3598_v60  ;;  %v5223_v22 = vadd.f32 %v5222_v59, %v5221_v49 }
 0xa7a   : > { %3616 = vst [vmem:[%s6733_s23] sm:$0xff] %v3612_v37  ;;  %v3601_v34 = vadd.f32 %v5223_v22, %v5053_v44 }
 0xa7c   : > { %v3613_v8 = vadd.f32 %v5899_v63, %v3601_v34 }
 0xa7e   : > { %3617 = vst [vmem:[%s6733_s23 + $0x8] sm:$0xff] %v3613_v8 }
 0xa84   : > { %v5224_v9 = vpop.f32.mrf.mxu0 }
 0xa86   : > { %v5225_v57 = vpop.f32.mrf.mxu0 }
 0xa87   : > { %v5226_v41 = vadd.f32 %v5225_v57, %v5224_v9 }
 0xa88   : > { %v5227_v51 = vpop.f32.mrf.mxu0 }
 0xa89   : > { %v3606_v3 = vadd.f32 %v5226_v41, %v5053_v44 }
 0xa8a   : > { %v5228_v12 = vpop.f32.mrf.mxu0 }
 0xa8b   : > { %v3614_v14 = vadd.f32 %v5900_v40, %v3606_v3  ;;  %v5229_v45 = vadd.f32 %v5228_v12, %v5227_v51 }
 0xa8d   : > { %3618 = vst [vmem:[%s6733_s23 + $0x10] sm:$0xff] %v3614_v14  ;;  %v3609_v29 = vadd.f32 %v5229_v45, %v5053_v44  ;;  %3623 = sbr.rel (%p5070_p1) target bundleno = 3883 (0xf2b), region = 100 }
 0xa8f   : > { %v3615_v42 = vadd.f32 %v5901_v58, %v3609_v29 }
 0xa91   : > { %3619 = vst [vmem:[%s6733_s23 + $0x18] sm:$0xff] %v3615_v42 }
 0xa92   : > { %v3630_v30 = vld [vmem:[#allocation4 + $0x10] sm:$0xff]  ;;  %v3628_v23 = vld [vmem:[#allocation4] sm:$0xff]  ;;  %v3631_v26 = vld [vmem:[#allocation4 + $0x18] sm:$0xff]  ;;  %v6379_v24 = vmov 0   ;;  %v6380_v50 = vmov 1   ;;  %v6381_v11 = vmov 2  }
 0xa93   : > { %5903 = vset.pattern.permute.xlu1 %v6379_v24  ;;  %5902 = vset.pattern.permute.xlu0 %v6379_v24  ;;  %5982 = vrcp.f32 %v3630_v30  ;;  %v3629_v54 = vld [vmem:[#allocation4 + $0x8] sm:$0xff]  ;;  %v5910_v47 = vld [vmem:[#allocation13 + $0x38] sm:$0xff]   ;;  %v5911_v13 = vld [vmem:[#allocation13 + $0x30] sm:$0xff]   ;;  %v6382_v53 = vmov 3  }
 0xa94   : > { %5984 = vrcp.f32 %v3628_v23  ;;  %5384 = vmatprep.subr.bf16.mxu0 %v5910_v47  ;;  %v5912_v19 = vld [vmem:[#allocation13 + $0x28] sm:$0xff]   ;;  %v5913_v61 = vld [vmem:[#allocation13 + $0x20] sm:$0xff]   ;;  %v5914_v52 = vld [vmem:[#allocation13 + $0x18] sm:$0xff]  }
 0xa95   : > { %5986 = vrcp.f32 %v3631_v26  ;;  %5385 = vmatpush3.bf16.msra.mxu0 %v5910_v47  ;;  %v5915_v20 = vld [vmem:[#allocation13 + $0x10] sm:$0xff]   ;;  %v5916_v32 = vld [vmem:[#allocation13 + $0x8] sm:$0xff]   ;;  %v5917_v43 = vld [vmem:[#allocation13] sm:$0xff]  }
 0xa96   : > { %5988 = vrcp.f32 %v3629_v54  ;;  %5386 = vmatprep.subr.bf16.mxu0 %v5911_v13  ;;  %v5918_v21 = vld [vmem:[#allocation15 + $0x74] ss:$8 sps:$4 sm:$0xff]   ;;  %v5920_v2 = vld [vmem:[#allocation15 + $0x70] ss:$8 sps:$4 sm:$0xff]   ;;  %v5921_v10 = vld [vmem:[#allocation15 + $0x64] ss:$8 sps:$4 sm:$0xff]  }
 0xa97   : > { %4122 = vmatprep.subr.bf16.mxu1 %v5918_v21  ;;  %v5923_v36 = vld [vmem:[#allocation15 + $0x60] ss:$8 sps:$4 sm:$0xff]   ;;  %v5924_v28 = vld [vmem:[#allocation15 + $0x54] ss:$8 sps:$4 sm:$0xff]   ;;  %v5926_v5 = vld [vmem:[#allocation15 + $0x50] ss:$8 sps:$4 sm:$0xff]  }
 0xa98   : > { %4123 = vmatpush1.bf16.msra.mxu1 %v5920_v2  ;;  %v5927_v25 = vld [vmem:[#allocation15 + $0x44] ss:$8 sps:$4 sm:$0xff]   ;;  %v5929_v38 = vld [vmem:[#allocation15 + $0x40] ss:$8 sps:$4 sm:$0xff]   ;;  %v5930_v56 = vld [vmem:[#allocation15 + $0x34] ss:$8 sps:$4 sm:$0xff]  }
 0xa99   : > { %5387 = vmatpush3.bf16.msra.mxu0 %v5911_v13  ;;  %4124 = vmatprep.subr.bf16.mxu1 %v5921_v10  ;;  %v5932_v55 = vld [vmem:[#allocation15 + $0x30] ss:$8 sps:$4 sm:$0xff]   ;;  %v5933_v27 = vld [vmem:[#allocation15 + $0x24] ss:$8 sps:$4 sm:$0xff]   ;;  %v5935_v15 = vld [vmem:[#allocation15 + $0x20] ss:$8 sps:$4 sm:$0xff]  }
 0xa9a   : > { %5388 = vmatprep.subr.bf16.mxu0 %v5912_v19  ;;  %v5936_v6 = vld [vmem:[#allocation15 + $0x14] ss:$8 sps:$4 sm:$0xff]   ;;  %v5938_v35 = vld [vmem:[#allocation15 + $0x10] ss:$8 sps:$4 sm:$0xff]   ;;  %v5939_v7 = vld [vmem:[#allocation15 + $0x4] ss:$8 sps:$4 sm:$0xff]  }
 0xa9b   : > { %v5941_v39 = vld [vmem:[#allocation15] ss:$8 sps:$4 sm:$0xff]   ;;  %v5942_v1 = vld [vmem:[#allocation15 + $0xf4] ss:$8 sps:$4 sm:$0xff]   ;;  %v5944_v4 = vld [vmem:[#allocation15 + $0xf0] ss:$8 sps:$4 sm:$0xff]  }
 0xa9c   : > { %4125 = vmatpush1.bf16.msra.mxu1 %v5923_v36  ;;  %v5945_v44 = vld [vmem:[#allocation15 + $0xe4] ss:$8 sps:$4 sm:$0xff]   ;;  %v5947_v18 = vld [vmem:[#allocation15 + $0xe0] ss:$8 sps:$4 sm:$0xff]   ;;  %v5948_v48 = vld [vmem:[#allocation15 + $0xd4] ss:$8 sps:$4 sm:$0xff]  }
 0xa9d   : > { %5389 = vmatpush3.bf16.msra.mxu0 %v5912_v19  ;;  %4126 = vmatprep.subr.bf16.mxu1 %v5924_v28  ;;  %v5950_v49 = vld [vmem:[#allocation15 + $0xd0] ss:$8 sps:$4 sm:$0xff]   ;;  %v5951_v60 = vld [vmem:[#allocation15 + $0xc4] ss:$8 sps:$4 sm:$0xff]   ;;  %v5953_v59 = vld [vmem:[#allocation15 + $0xc0] ss:$8 sps:$4 sm:$0xff]  }
 0xa9e   : > { %5390 = vmatprep.subr.bf16.mxu0 %v5913_v61  ;;  %v5954_v46 = vld [vmem:[#allocation15 + $0xb4] ss:$8 sps:$4 sm:$0xff]   ;;  %v5956_v37 = vld [vmem:[#allocation15 + $0xb0] ss:$8 sps:$4 sm:$0xff]   ;;  %v3624_v34 = vld [vmem:[#allocation5] sm:$0xff] }
 0xa9f   : > { %v3626_v22 = vld [vmem:[#allocation5 + $0x10] sm:$0xff]  ;;  %v3627_v41 = vld [vmem:[#allocation5 + $0x18] sm:$0xff]  ;;  %v3625_v51 = vld [vmem:[#allocation5 + $0x8] sm:$0xff] }
 0xaa0   : > { %v5983_v31 = vpop.eup %5982  ;;  %4127 = vmatpush1.bf16.msra.mxu1 %v5926_v5 }
 0xaa1   : > { %v5985_v62 = vpop.eup %5984  ;;  %3648 = vperm.xlu1 %5903, %v5983_v31   ;;  %5391 = vmatpush3.bf16.msra.mxu0 %v5913_v61 }
 0xaa2   : > { %v5987_v0 = vpop.eup %5986  ;;  %3638 = vperm.xlu0 %5902, %v5985_v62   ;;  %5392 = vmatprep.subr.bf16.mxu0 %v5914_v52 }
 0xaa3   : > { %v5989_v16 = vpop.eup %5988  ;;  %4128 = vmatprep.subr.bf16.mxu1 %v5927_v25 }
 0xaa4   : > { %4129 = vmatpush1.bf16.msra.mxu1 %v5929_v38 }
 0xaa5   : > { %3653 = vperm.xlu1 %5903, %v5987_v0   ;;  %5393 = vmatpush3.bf16.msra.mxu0 %v5914_v52 }
 0xaa6   : > { %3643 = vperm.xlu0 %5902, %v5989_v16   ;;  %5394 = vmatprep.subr.bf16.mxu0 %v5915_v20 }
 0xaa7   : > { %4130 = vmatprep.subr.bf16.mxu1 %v5930_v56 }
 0xaa8   : > { %4131 = vmatpush1.bf16.msra.mxu1 %v5932_v55 }
 0xaa9   : > { %5905 = vset.pattern.permute.xlu1 %v6380_v50  ;;  %5395 = vmatpush3.bf16.msra.mxu0 %v5915_v20 }
 0xaaa   : > { %5904 = vset.pattern.permute.xlu0 %v6380_v50  ;;  %3683 = vperm.xlu1 %5905, %v5989_v16  }
 0xaab   : > { %3678 = vperm.xlu0 %5904, %v5985_v62   ;;  %5396 = vmatprep.subr.bf16.mxu0 %v5916_v32 }
 0xaac   : > { %4132 = vmatprep.subr.bf16.mxu1 %v5933_v27 }
 0xaad   : > { %5397 = vmatpush3.bf16.msra.mxu0 %v5916_v32  ;;  %4133 = vmatpush1.bf16.msra.mxu1 %v5935_v15 }
 0xaae   : > { %3688 = vperm.xlu1 %5905, %v5983_v31   ;;  %5398 = vmatprep.subr.bf16.mxu0 %v5917_v43 }
 0xaaf   : > { %3693 = vperm.xlu0 %5904, %v5987_v0   ;;  %4134 = vmatprep.subr.bf16.mxu1 %v5936_v6 }
 0xab1   : > { %5399 = vmatpush3.bf16.msra.mxu0 %v5917_v43  ;;  %4135 = vmatpush1.bf16.msra.mxu1 %v5938_v35 }
 0xab2   : > { %5906 = vset.pattern.permute.xlu1 %v6381_v11  ;;  %4136 = vmatprep.subr.bf16.mxu1 %v5939_v7 }
 0xab3   : > { %3718 = vperm.xlu1 %5906, %v5985_v62   ;;  %5907 = vset.pattern.permute.xlu0 %v6381_v11 }
 0xab4   : > { %3723 = vperm.xlu0 %5907, %v5989_v16  }
 0xab5   : > { %4137 = vmatpush1.bf16.msra.mxu1 %v5941_v39 }
 0xab6   : > { %4138 = vmatprep.subr.bf16.mxu1 %v5942_v1 }
 0xab7   : > { %3728 = vperm.xlu1 %5906, %v5983_v31  }
 0xab8   : > { %5908 = vset.pattern.permute.xlu0 %v6382_v53 }
 0xab9   : > { %3758 = vperm.xlu0 %5908, %v5985_v62   ;;  %4139 = vmatpush2.bf16.msra.mxu1 %v5944_v4 }
 0xaba   : > { %4140 = vmatprep.subr.bf16.mxu1 %v5945_v44  ;;  %v5957_v44 = vld [vmem:[#allocation15 + $0xa4] ss:$8 sps:$4 sm:$0xff]  }
 0xabb   : > { %3733 = vperm.xlu1 %5906, %v5987_v0  }
 0xabd   : > { %3773 = vperm.xlu0 %5908, %v5987_v0   ;;  %4141 = vmatpush2.bf16.msra.mxu1 %v5947_v18  ;;  %v5959_v18 = vld [vmem:[#allocation15 + $0xa0] ss:$8 sps:$4 sm:$0xff]  }
 0xabe   : > { %4142 = vmatprep.subr.bf16.mxu1 %v5948_v48  ;;  %v5960_v48 = vld [vmem:[#allocation15 + $0x94] ss:$8 sps:$4 sm:$0xff]  }
 0xabf   : > { %5909 = vset.pattern.permute.xlu1 %v6382_v53 }
 0xac0   : > { %3763 = vperm.xlu1 %5909, %v5989_v16  }
 0xac1   : > { %4143 = vmatpush2.bf16.msra.mxu1 %v5950_v49  ;;  %v5962_v49 = vld [vmem:[#allocation15 + $0x90] ss:$8 sps:$4 sm:$0xff]  }
 0xac2   : > { %4144 = vmatprep.subr.bf16.mxu1 %v5951_v60  ;;  %v5963_v60 = vld [vmem:[#allocation15 + $0x84] ss:$8 sps:$4 sm:$0xff]  }
 0xac4   : > { %3768 = vperm.xlu1 %5909, %v5983_v31  }
 0xac5   : > { %4145 = vmatpush2.bf16.msra.mxu1 %v5953_v59  ;;  %v5965_v59 = vld [vmem:[#allocation15 + $0x80] ss:$8 sps:$4 sm:$0xff]  }
 0xac6   : > { %4146 = vmatprep.subr.bf16.mxu1 %v5954_v46 }
 0xac9   : > { %4147 = vmatpush2.bf16.msra.mxu1 %v5956_v37 }
 0xaca   : > { %4148 = vmatprep.subr.bf16.mxu1 %v5957_v44 }
 0xacd   : > { %4149 = vmatpush2.bf16.msra.mxu1 %v5959_v18 }
 0xace   : > { %4150 = vmatprep.subr.bf16.mxu1 %v5960_v48 }
 0xad1   : > { %4151 = vmatpush2.bf16.msra.mxu1 %v5962_v49 }
 0xad2   : > { %4152 = vmatprep.subr.bf16.mxu1 %v5963_v60 }
 0xad5   : > { %4153 = vmatpush2.bf16.msra.mxu1 %v5965_v59 }
 0xb1c   : > { %v3649_v63 = vpop.permute.xlu1 %3648 }
 0xb1d   : > { %v3658_v8 = vmul.f32 %v3649_v63, %v3626_v22  ;;  %v3639_v9 = vpop.permute.xlu0 %3638  ;;  %v7798_v63 = vld [vmem:[%s6703_s2 + $0x8] sm:$0xff] }
 0xb1e   : > { %v3656_v57 = vmul.f32 %v3639_v9, %v3624_v34  ;;  %v7795_v34 = vld [vmem:[%s6703_s2] sm:$0xff] }
 0xb1f   : > { %3662 = vst.msk [vmem:[#allocation5 + $0x10] sm:$0xff] %vm990_vm1, %v3658_v8  ;;  %v5071_v8 = vld [vmem:[%s8349_s19] ss:$0 sm:$0xff] }
 0xb20   : > { %3660 = vst.msk [vmem:[#allocation5] sm:$0xff] %vm990_vm1, %v3656_v57  ;;  %v3654_v3 = vpop.permute.xlu1 %3653 }
 0xb21   : > { %v3659_v12 = vmul.f32 %v3654_v3, %v3627_v41  ;;  %v3644_v40 = vpop.permute.xlu0 %3643  ;;  %v3914_v3 = vpack.c.bf16 %v7798_v63, %v7795_v34 }
 0xb22   : > { %v3657_v14 = vmul.f32 %v3644_v40, %v3625_v51 }
 0xb23   : > { %3663 = vst.msk [vmem:[#allocation5 + $0x18] sm:$0xff] %vm990_vm1, %v3659_v12 }
 0xb24   : > { %3661 = vst.msk [vmem:[#allocation5 + $0x8] sm:$0xff] %vm990_vm1, %v3657_v14 }
 0xb25   : > { %v3684_v45 = vpop.permute.xlu1 %3683 }
 0xb26   : > { %v3679_v29 = vpop.permute.xlu0 %3678  ;;  %v3666_v23 = vld [vmem:[#allocation5 + $0x10] sm:$0xff] }
 0xb27   : > { %v3664_v58 = vld [vmem:[#allocation5] sm:$0xff] }
 0xb28   : > { %v3696_v42 = vmul.f32 %v3679_v29, %v3664_v58  ;;  %v7809_v29 = vld [vmem:[%s6703_s2 + $0x18] sm:$0xff] }
 0xb29   : > { %v3689_v30 = vpop.permute.xlu1 %3688 }
 0xb2a   : > { %3700 = vst.msk [vmem:[#allocation5] sm:$0xff] %vm1665_vm6, %v3696_v42  ;;  %v3698_v26 = vmul.f32 %v3689_v30, %v3666_v23  ;;  %v3694_v24 = vpop.permute.xlu0 %3693  ;;  %v3667_v54 = vld [vmem:[#allocation5 + $0x18] sm:$0xff]  ;;  %v3950_v42 = vld [vmem:[%s8350_s12] sm:$0x3] }
 0xb2b   : > { %v3665_v31 = vld [vmem:[#allocation5 + $0x8] sm:$0xff]  ;;  %v3699_v62 = vmul.f32 %v3694_v24, %v3667_v54  ;;  %v3955_v30 = vrot.slane %v3950_v42, %v6760_v17  ;;  %v3959_v23 = vrot.slane %v3950_v42, %v6768_v33  ;;  %v5973_v42 = vld [vmem:[#allocation16 + $0x20] sm:$0xff]  }
 0xb2c   : > { %v3697_v0 = vmul.f32 %v3684_v45, %v3665_v31  ;;  %3702 = vst.msk [vmem:[#allocation5 + $0x10] sm:$0xff] %vm1665_vm6, %v3698_v26  ;;  %v7806_v45 = vld [vmem:[%s6703_s2 + $0x10] sm:$0xff] }
 0xb2d   : > { %3703 = vst.msk [vmem:[#allocation5 + $0x18] sm:$0xff] %vm1665_vm6, %v3699_v62  ;;  %v3916_v58 = vpack.c.bf16 %v7809_v29, %v7806_v45 }
 0xb2e   : > { %3701 = vst.msk [vmem:[#allocation5 + $0x8] sm:$0xff] %vm1665_vm6, %v3697_v0  ;;  %v3719_v16 = vpop.permute.xlu1 %3718 }
 0xb2f   : > { %v3724_v19 = vpop.permute.xlu0 %3723 }
 0xb31   : > { %v3704_v50 = vld [vmem:[#allocation5] sm:$0xff] }
 0xb32   : > { %v3736_v47 = vmul.f32 %v3719_v16, %v3704_v50  ;;  %v3729_v13 = vpop.permute.xlu1 %3728 }
 0xb33   : > { %v3706_v11 = vld [vmem:[#allocation5 + $0x10] sm:$0xff] }
 0xb34   : > { %3740 = vst.msk [vmem:[#allocation5] sm:$0xff] %vm2113_vm7, %v3736_v47  ;;  %v3738_v53 = vmul.f32 %v3729_v13, %v3706_v11  ;;  %v3707_v32 = vld [vmem:[#allocation5 + $0x18] sm:$0xff]  ;;  %v3759_v21 = vpop.permute.xlu0 %3758 }
 0xb35   : > { %v3705_v61 = vld [vmem:[#allocation5 + $0x8] sm:$0xff] }
 0xb36   : > { %3742 = vst.msk [vmem:[#allocation5 + $0x10] sm:$0xff] %vm2113_vm7, %v3738_v53  ;;  %v3737_v52 = vmul.f32 %v3724_v19, %v3705_v61  ;;  %v3734_v20 = vpop.permute.xlu1 %3733 }
 0xb37   : > { %v3739_v43 = vmul.f32 %v3734_v20, %v3707_v32 }
 0xb38   : > { %3741 = vst.msk [vmem:[#allocation5 + $0x8] sm:$0xff] %vm2113_vm7, %v3737_v52  ;;  %v3774_v56 = vpop.permute.xlu0 %3773 }
 0xb39   : > { %3743 = vst.msk [vmem:[#allocation5 + $0x18] sm:$0xff] %vm2113_vm7, %v3739_v43 }
 0xb3b   : > { %v3744_v2 = vld [vmem:[#allocation5] sm:$0xff]  ;;  %v3764_v10 = vpop.permute.xlu1 %3763 }
 0xb3c   : > { %v3776_v36 = vmul.f32 %v3759_v21, %v3744_v2 }
 0xb3d   : > { %v3746_v25 = vld [vmem:[#allocation5 + $0x10] sm:$0xff] }
 0xb3e   : > { %3780 = vst.msk [vmem:[#allocation5] sm:$0xff] %vm2561_vm8, %v3776_v36 }
 0xb3f   : > { %v3745_v28 = vld [vmem:[#allocation5 + $0x8] sm:$0xff]  ;;  %v3769_v5 = vpop.permute.xlu1 %3768 }
 0xb40   : > { %v3777_v38 = vmul.f32 %v3764_v10, %v3745_v28  ;;  %v3747_v55 = vld [vmem:[#allocation5 + $0x18] sm:$0xff]  ;;  %v3778_v27 = vmul.f32 %v3769_v5, %v3746_v25 }
 0xb41   : > { %v3779_v15 = vmul.f32 %v3774_v56, %v3747_v55 }
 0xb42   : > { %3781 = vst.msk [vmem:[#allocation5 + $0x8] sm:$0xff] %vm2561_vm8, %v3777_v38  ;;  %3782 = vst.msk [vmem:[#allocation5 + $0x10] sm:$0xff] %vm2561_vm8, %v3778_v27 }
 0xb43   : > { %3783 = vst.msk [vmem:[#allocation5 + $0x18] sm:$0xff] %vm2561_vm8, %v3779_v15 }
 0xb45   : > { %v3788_v6 = vld [vmem:[#allocation5] sm:$0xff] }
 0xb49   : > { %v3789_v35 = vld [vmem:[#allocation5 + $0x8] sm:$0xff]  ;;  %v3790_v7 = vld [vmem:[#allocation5 + $0x10] sm:$0xff] }
 0xb4a   : > { %v3792_v39 = vpack.c.bf16 %v3789_v35, %v3788_v6  ;;  %v3791_v1 = vld [vmem:[#allocation5 + $0x18] sm:$0xff] }
 0xb4b   : > { %v3793_v4 = vpack.c.bf16 %v3791_v1, %v3790_v7 }
 0xb4c   : > { %5400 = vmatprep.mubr.bf16.mxu0 %v3792_v39 }
 0xb4d   : > { %5401 = vmatmul.mubr.bf16.vlgmr.msra.gmra.mxu0 %v3793_v4 }
 0xc0d   : > { %v5402_v46 = vpop.f32.mrf.mxu0 }
 0xc0e   : > { %v3908_v12 = vadd.f32 %v5402_v46, %v5071_v8 }
 0xc0f   : > { %v3899_v37 = vpop.f32.mrf.mxu0 }
 0xc10   : > { %v3900_v57 = vadd.f32 %v5071_v8, %v3899_v37 }
 0xc11   : > { %v5403_v22 = vpop.f32.mrf.mxu0 }
 0xc12   : > { %v3911_v41 = vadd.f32 %v5403_v22, %v5071_v8 }
 0xc13   : > { %v3902_v9 = vpop.f32.mrf.mxu0 }
 0xc14   : > { %v3903_v51 = vadd.f32 %v5071_v8, %v3902_v9  ;;  %v3917_v14 = vpack.c.bf16 %v3911_v41, %v3908_v12  ;;  %v5966_v41 = vld [vmem:[#allocation16 + $0x78] sm:$0xff]   ;;  %v5969_v12 = vld [vmem:[#allocation16 + $0x30] sm:$0xff]  }
 0xc15   : > { %5240 = vmatprep.subr.bf16.mxu0 %v5966_v41 }
 0xc16   : > { %v3915_v40 = vpack.c.bf16 %v3903_v51, %v3900_v57  ;;  %v5967_v51 = vld [vmem:[#allocation16 + $0x38] sm:$0xff]  }
 0xc17   : > { %5241 = vmatpush3.bf16.msra.mxu0 %v5967_v51 }
 0xc18   : > { %4154 = vmatprep.mubr.bf16.mxu1 %v3915_v40  ;;  %v5970_v40 = vld [vmem:[#allocation16 + $0x68] sm:$0xff]  }
 0xc19   : > { %4155 = vmatmul.mubr.bf16.vlgmr.msra.gmra.mxu1 %v3914_v3  ;;  %v5968_v3 = vld [vmem:[#allocation16 + $0x70] sm:$0xff]  }
 0xc1a   : > { %4164 = vmatprep.mubr.bf16.mxu1 %v3917_v14  ;;  %5242 = vmatprep.subr.bf16.mxu0 %v5968_v3  ;;  %v5971_v14 = vld [vmem:[#allocation16 + $0x28] sm:$0xff]  }
 0xc1b   : > { %5243 = vmatpush3.bf16.msra.mxu0 %v5969_v12 }
 0xc1c   : > { %5244 = vmatprep.subr.bf16.mxu0 %v5970_v40 }
 0xc1f   : > { %5245 = vmatpush3.bf16.msra.mxu0 %v5971_v14 }
 0xc21   : > { %4165 = vmatmul.mubr.bf16.gmra.mxu1 %v3916_v58  ;;  %v5972_v58 = vld [vmem:[#allocation16 + $0x60] sm:$0xff]  }
 0xc22   : > { %5246 = vmatprep.subr.bf16.mxu0 %v5972_v58 }
 0xc23   : > { %5247 = vmatpush3.bf16.msra.mxu0 %v5973_v42 }
 0xcd9   : > { %v4156_v26 = vpop.f32.mrf.mxu1 }
 0xcda   : > { %v4157_v54 = vadd.f32 %v4156_v26, %v3955_v30  ;;  %v5976_v26 = vld [vmem:[#allocation16 + $0x50] sm:$0xff]  }
 0xcdb   : > { %v4158_v24 = vpop.f32.mrf.mxu1 }
 0xcdc   : > { %v4159_v31 = vadd.f32 %v4158_v24, %v3959_v23  ;;  %v5977_v24 = vld [vmem:[#allocation16 + $0x10] sm:$0xff]  }
 0xcdd   : > { %v4160_v62 = vpop.f32.mrf.mxu1 }
 0xcde   : > { %v4175_v0 = vadd.f32 %v4159_v31, %v4157_v54  ;;  %v4161_v50 = vadd.f32 %v4160_v62, %v3955_v30  ;;  %v5980_v62 = vld [vmem:[#allocation16 + $0x40] sm:$0xff]  }
 0xcdf   : > { %v4162_v16 = vpop.f32.mrf.mxu1 }
 0xce0   : > { %v4163_v47 = vadd.f32 %v4162_v16, %v3959_v23  ;;  %4176 = vadd.xlane.f32.xlu1 %v4175_v0  ;;  %v5981_v0 = vld [vmem:[#allocation16] sm:$0xff]  }
 0xce1   : > { %v4166_v13 = vpop.f32.mrf.mxu1 }
 0xce2   : > { %v4178_v11 = vadd.f32 %v4163_v47, %v4161_v50  ;;  %v4167_v53 = vadd.f32 %v4166_v13, %v3955_v30 }
 0xce3   : > { %v4168_v19 = vpop.f32.mrf.mxu1 }
 0xce4   : > { %v4169_v61 = vadd.f32 %v4168_v19, %v3959_v23  ;;  %4179 = vadd.xlane.f32.xlu0 %v4178_v11 }
 0xce5   : > { %v4170_v52 = vpop.f32.mrf.mxu1 }
 0xce6   : > { %v4181_v20 = vadd.f32 %v4169_v61, %v4167_v53  ;;  %v4171_v43 = vadd.f32 %v4170_v52, %v3955_v30  ;;  %v5974_v30 = vld [vmem:[#allocation16 + $0x58] sm:$0xff]  }
 0xce7   : > { %v4172_v32 = vpop.f32.mrf.mxu1  ;;  %5248 = vmatprep.subr.bf16.mxu0 %v5974_v30 }
 0xce8   : > { %v4173_v21 = vadd.f32 %v4172_v32, %v3959_v23  ;;  %4182 = vadd.xlane.f32.xlu0 %v4181_v20  ;;  %v5975_v23 = vld [vmem:[#allocation16 + $0x18] sm:$0xff]  }
 0xce9   : > { %5249 = vmatpush3.bf16.msra.mxu0 %v5975_v23 }
 0xcea   : > { %v4184_v2 = vadd.f32 %v4173_v21, %v4171_v43  ;;  %5250 = vmatprep.subr.bf16.mxu0 %v5976_v26 }
 0xcec   : > { %4185 = vadd.xlane.f32.xlu1 %v4184_v2  ;;  %v4259_v2 = vld [vmem:[%s8352_s0] sm:$0x3] }
 0xced   : > { %5251 = vmatpush3.bf16.msra.mxu0 %v5977_v24 }
 0xd69   : > { %v4177_v10 = vpop.xlane.xlu1 %4176 }
 0xd6a   : > { %v4187_v36 = vmul.f32 0.00390625, %v4177_v10 }
 0xd6c   : > { %v7818_v28 = vsub.f32 %v4157_v54, %v4187_v36  ;;  %v7820_v5 = vsub.f32 %v4159_v31, %v4187_v36  ;;  %v5978_v54 = vld [vmem:[#allocation16 + $0x48] sm:$0xff]  }
 0xd6d   : > { %v4180_v25 = vpop.xlane.xlu0 %4179  ;;  %v5979_v31 = vld [vmem:[#allocation16 + $0x8] sm:$0xff]   ;;  %5252 = vmatprep.subr.bf16.mxu0 %v5978_v54 }
 0xd6e   : > { %v4188_v38 = vmul.f32 0.00390625, %v4180_v25  ;;  %v4199_v56 = vmul.f32 %v7818_v28, %v7818_v28  ;;  %v4200_v55 = vmul.f32 %v7820_v5, %v7820_v5  ;;  %5253 = vmatpush3.bf16.msra.mxu0 %v5979_v31 }
 0xd6f   : > { %5254 = vmatprep.subr.bf16.mxu0 %v5980_v62 }
 0xd70   : > { %v7826_v27 = vsub.f32 %v4161_v50, %v4188_v38  ;;  %v7828_v15 = vsub.f32 %v4163_v47, %v4188_v38  ;;  %v4207_v6 = vadd.f32 %v4200_v55, %v4199_v56  ;;  %v4264_v55 = vrot.slane %v4259_v2, %v6760_v17 }
 0xd71   : > { %v4183_v35 = vpop.xlane.xlu0 %4182 }
 0xd72   : > { %v4189_v7 = vmul.f32 0.00390625, %v4183_v35  ;;  %4208 = vadd.xlane.f32.xlu0 %v4207_v6  ;;  %v4201_v39 = vmul.f32 %v7826_v27, %v7826_v27  ;;  %v4202_v1 = vmul.f32 %v7828_v15, %v7828_v15  ;;  %5255 = vmatpush3.bf16.msra.mxu0 %v5981_v0  ;;  %v4268_v6 = vrot.slane %v4259_v2, %v6768_v33 }
 0xd74   : > { %v7834_v4 = vsub.f32 %v4167_v53, %v4189_v7  ;;  %v7836_v44 = vsub.f32 %v4169_v61, %v4189_v7  ;;  %v4210_v18 = vadd.f32 %v4202_v1, %v4201_v39 }
 0xd75   : > { %v4186_v48 = vpop.xlane.xlu1 %4185 }
 0xd76   : > { %v4190_v49 = vmul.f32 0.00390625, %v4186_v48  ;;  %4211 = vadd.xlane.f32.xlu1 %v4210_v18  ;;  %v4203_v60 = vmul.f32 %v7834_v4, %v7834_v4  ;;  %v4204_v59 = vmul.f32 %v7836_v44, %v7836_v44 }
 0xd78   : > { %v7842_v46 = vsub.f32 %v4171_v43, %v4190_v49  ;;  %v7844_v37 = vsub.f32 %v4173_v21, %v4190_v49  ;;  %v4213_v22 = vadd.f32 %v4204_v59, %v4203_v60  ;;  %v4239_v43 = vld [vmem:[%s8351_s24] sm:$0x3] }
 0xd79   : > { %v4244_v10 = vrot.slane %v4239_v43, %v6760_v17  ;;  %v4248_v36 = vrot.slane %v4239_v43, %v6768_v33 }
 0xd7a   : > { %4214 = vadd.xlane.f32.xlu0 %v4213_v22  ;;  %v4205_v8 = vmul.f32 %v7842_v46, %v7842_v46  ;;  %v4206_v9 = vmul.f32 %v7844_v37, %v7844_v37 }
 0xd7c   : > { %v4216_v57 = vadd.f32 %v4206_v9, %v4205_v8 }
 0xd7e   : > { %4217 = vadd.xlane.f32.xlu1 %v4216_v57 }
 0xdfb   : > { %v4209_v16 = vpop.xlane.xlu0 %4208 }
 0xdfc   : > { %v4219_v50 = vmul.f32 0.00390625, %v4209_v16 }
 0xdfe   : > { %v4223_v47 = vadd.f32 1e-05, %v4219_v50 }
 0xdff   : > { %v4212_v13 = vpop.xlane.xlu1 %4211 }
 0xe00   : > { %5990 = vrsqrt.f32 %v4223_v47  ;;  %v4220_v11 = vmul.f32 0.00390625, %v4212_v13 }
 0xe02   : > { %v4224_v19 = vadd.f32 1e-05, %v4220_v11 }
 0xe03   : > { %v4215_v53 = vpop.xlane.xlu0 %4214 }
 0xe04   : > { %5992 = vrsqrt.f32 %v4224_v19  ;;  %v4221_v61 = vmul.f32 0.00390625, %v4215_v53 }
 0xe06   : > { %v4225_v52 = vadd.f32 1e-05, %v4221_v61 }
 0xe07   : > { %v4218_v20 = vpop.xlane.xlu1 %4217 }
 0xe08   : > { %v4222_v32 = vmul.f32 0.00390625, %v4218_v20  ;;  %5994 = vrsqrt.f32 %v4225_v52 }
 0xe0a   : > { %v4226_v21 = vadd.f32 1e-05, %v4222_v32 }
 0xe0c   : > { %5996 = vrsqrt.f32 %v4226_v21 }
 0xe0d   : > { %v5991_v25 = vpop.eup %5990 }
 0xe0e   : > { %v4231_v38 = vmul.f32 %v5991_v25, %v7818_v28  ;;  %v4232_v56 = vmul.f32 %v5991_v25, %v7820_v5 }
 0xe10   : > { %v4252_v35 = vmul.f32 %v4248_v36, %v4232_v56  ;;  %v4251_v7 = vmul.f32 %v4244_v10, %v4231_v38 }
 0xe11   : > { %v5993_v39 = vpop.eup %5992 }
 0xe12   : > { %v4233_v1 = vmul.f32 %v5993_v39, %v7826_v27  ;;  %v4234_v18 = vmul.f32 %v5993_v39, %v7828_v15  ;;  %v4272_v48 = vadd.f32 %v4268_v6, %v4252_v35  ;;  %v4271_v49 = vadd.f32 %v4264_v55, %v4251_v7 }
 0xe14   : > { %v4254_v60 = vmul.f32 %v4248_v36, %v4234_v18  ;;  %v7864_v59 = vmul.f32 0.70710677, %v4272_v48  ;;  %v4253_v28 = vmul.f32 %v4244_v10, %v4233_v1  ;;  %v7866_v22 = vmul.f32 0.70710677, %v4271_v49 }
 0xe15   : > { %v5995_v9 = vpop.eup %5994  ;;  %v7909_v38 = vmul.f32 0.5, %v4271_v49 }
 0xe16   : > { %v7868_v5 = vadd.f32 %v4268_v6, %v4254_v60  ;;  %v4312_v17 = vand.u32 2147483647, %v7864_v59  ;;  %v7871_v33 = vadd.f32 %v4264_v55, %v4253_v28  ;;  %v4311_v8 = vand.u32 2147483647, %v7866_v22 }
 0xe17   : > { %v4236_v14 = vmul.f32 %v5995_v9, %v7836_v44  ;;  %v4235_v62 = vmul.f32 %v5995_v9, %v7834_v4  ;;  %vm4296_vm1 = vcmp.ge.f32.partialorder %v7864_v59, 0.0  ;;  %vm4295_vm2 = vcmp.ge.f32.partialorder %v7866_v22, 0.0 }
 0xe18   : > { %v7875_v27 = vmul.f32 0.70710677, %v7868_v5  ;;  %v4320_v15 = vmul.f32 0.3275911, %v4312_v17  ;;  %v7878_v57 = vmul.f32 0.70710677, %v7871_v33 }
 0xe19   : > { %v4319_v41 = vmul.f32 0.3275911, %v4311_v8  ;;  %v5997_v58 = vpop.eup %5996  ;;  %v4256_v54 = vmul.f32 %v4248_v36, %v4236_v14  ;;  %v4424_v31 = vsub.f32 0.0, %v4312_v17  ;;  %v4423_v50 = vsub.f32 0.0, %v4311_v8 }
 0xe1a   : > { %v4314_v51 = vand.u32 2147483647, %v7875_v27  ;;  %v4328_v3 = vadd.f32 1.0, %v4320_v15  ;;  %v4313_v12 = vand.u32 2147483647, %v7878_v57  ;;  %v4238_v24 = vmul.f32 %v5997_v58, %v7844_v37 }
 0xe1b   : > { %v4327_v40 = vadd.f32 1.0, %v4319_v41  ;;  %v7885_v16 = vadd.f32 %v4268_v6, %v4256_v54  ;;  %v4237_v44 = vmul.f32 %v5997_v58, %v7842_v46  ;;  %v4255_v47 = vmul.f32 %v4244_v10, %v4235_v62 }
 0xe1c   : > { %v4322_v42 = vmul.f32 0.3275911, %v4314_v51  ;;  %5998 = vrcp.f32 %v4328_v3  ;;  %v4321_v30 = vmul.f32 0.3275911, %v4313_v12  ;;  %v4258_v0 = vmul.f32 %v4248_v36, %v4238_v24 }
 0xe1d   : > { %6000 = vrcp.f32 %v4327_v40  ;;  %v7891_v11 = vmul.f32 0.70710677, %v7885_v16  ;;  %v4426_v19 = vsub.f32 0.0, %v4314_v51  ;;  %v4432_v37 = vmul.f32 %v4424_v31, %v4312_v17 }
 0xe1e   : > { %v4330_v23 = vadd.f32 1.0, %v4322_v42  ;;  %v4329_v26 = vadd.f32 1.0, %v4321_v30  ;;  %v7888_v13 = vadd.f32 %v4268_v6, %v4258_v0  ;;  %v4257_v53 = vmul.f32 %v4244_v10, %v4237_v44 }
 0xe1f   : > { %v7893_v61 = vadd.f32 %v4264_v55, %v4255_v47  ;;  %v4425_v52 = vsub.f32 0.0, %v4313_v12  ;;  %v4316_v20 = vand.u32 2147483647, %v7891_v11  ;;  %v4431_v32 = vmul.f32 %v4423_v50, %v4311_v8 }
 0xe20   : > { %6002 = vrcp.f32 %v4330_v23  ;;  %v7896_v4 = vmul.f32 0.70710677, %v7888_v13  ;;  %v7899_v43 = vadd.f32 %v4264_v55, %v4257_v53  ;;  %v7907_v36 = vmul.f32 0.5, %v4272_v48 }
 0xe21   : > { %6004 = vrcp.f32 %v4329_v26  ;;  %v7902_v46 = vmul.f32 0.70710677, %v7893_v61  ;;  %v4324_v2 = vmul.f32 0.3275911, %v4316_v20  ;;  %v4434_v10 = vmul.f32 %v4426_v19, %v4314_v51 }
 0xe22   : > { %v7905_v21 = vand.u32 2147483647, %v7896_v4  ;;  %v4441_v25 = vmul.f32 1.442695, %v4432_v37  ;;  %v4433_v6 = vmul.f32 %v4425_v52, %v4313_v12  ;;  %v7915_v7 = vmul.f32 0.70710677, %v7899_v43 }
 0xe23   : > { %v4332_v55 = vadd.f32 1.0, %v4324_v2  ;;  %v4439_v18 = vmul.f32 1.442695, %v4431_v32  ;;  %v7921_v48 = vand.u32 2147483647, %v7902_v46  ;;  %v4428_v42 = vsub.f32 0.0, %v4316_v20 }
 0xe24   : > { %v4326_v35 = vmul.f32 0.3275911, %v7905_v21  ;;  %v4445_v17 = vmul.f32 1.442695, %v4434_v10  ;;  %v4443_v15 = vmul.f32 1.442695, %v4433_v6 }
 0xe25   : > { %6006 = vrcp.f32 %v4332_v55  ;;  %v7929_v41 = vand.u32 2147483647, %v7915_v7  ;;  %v4323_v40 = vmul.f32 0.3275911, %v7921_v48  ;;  %v4430_v44 = vsub.f32 0.0, %v7905_v21 }
 0xe26   : > { %v4334_v60 = vadd.f32 1.0, %v4326_v35  ;;  %6008 = vpow2.f32 %v4441_v25  ;;  %v4436_v37 = vmul.f32 %v4428_v42, %v4316_v20  ;;  %vm4298_vm3 = vcmp.ge.f32.partialorder %v7875_v27, 0.0 }
 0xe27   : > { %v4325_v30 = vmul.f32 0.3275911, %v7929_v41  ;;  %v4331_v24 = vadd.f32 1.0, %v4323_v40  ;;  %v6383_v53 = vmov -1.0   ;;  %v7949_v10 = vmul.f32 0.5, %v7868_v5 }
 0xe28   : > { %6010 = vrcp.f32 %v4334_v60  ;;  %v4304_v52 = vsel %vm4296_vm1, 1.0, %v6383_v53  ;;  %v4303_v25 = vsel %vm4295_vm2, 1.0, %v6383_v53  ;;  %v4438_v55 = vmul.f32 %v4430_v44, %v7905_v21 }
 0xe29   : > { %v7911_v56 = vpop.eup %5998  ;;  %6012 = vpow2.f32 %v4439_v18  ;;  %v4333_v62 = vadd.f32 1.0, %v4325_v30  ;;  %v4427_v59 = vsub.f32 0.0, %v7921_v48  ;;  %vm4297_vm4 = vcmp.ge.f32.partialorder %v7878_v57, 0.0 }
 0xe2a   : > { %v7917_v39 = vpop.eup %6000  ;;  %v4352_v1 = vmul.f32 1.0614054, %v7911_v56  ;;  %6014 = vpow2.f32 %v4445_v17  ;;  %v4429_v17 = vsub.f32 0.0, %v7929_v41  ;;  %vm4300_vm5 = vcmp.ge.f32.partialorder %v7891_v11, 0.0 }
 0xe2b   : > { %v4351_v49 = vmul.f32 1.0614054, %v7917_v39  ;;  %6016 = vpow2.f32 %v4443_v15  ;;  %v4435_v42 = vmul.f32 %v4427_v59, %v7921_v48  ;;  %vm4302_vm6 = vcmp.ge.f32.partialorder %v7896_v4, 0.0 }
 0xe2c   : > { %v4360_v28 = vadd.f32 -1.4531521, %v4352_v1  ;;  %6018 = vrcp.f32 %v4331_v24  ;;  %v4306_v1 = vsel %vm4298_vm3, 1.0, %v6383_v53  ;;  %vm4299_vm7 = vcmp.ge.f32.partialorder %v7902_v46, 0.0 }
 0xe2d   : > { %v7926_v8 = vpop.eup %6002  ;;  %v4359_v9 = vadd.f32 -1.4531521, %v4351_v49  ;;  %6020 = vrcp.f32 %v4333_v62  ;;  %v4449_v49 = vmul.f32 1.442695, %v4436_v37  ;;  %vm4301_vm8 = vcmp.ge.f32.partialorder %v7915_v7, 0.0 }
 0xe2e   : > { %v7931_v51 = vpop.eup %6004  ;;  %v4354_v3 = vmul.f32 1.0614054, %v7926_v8  ;;  %v4368_v12 = vmul.f32 %v7911_v56, %v4360_v28 }
 0xe2f   : > { %v4353_v14 = vmul.f32 1.0614054, %v7931_v51  ;;  %v4367_v58 = vmul.f32 %v7917_v39, %v4359_v9  ;;  %6022 = vpow2.f32 %v4449_v49 }
 0xe30   : > { %v4362_v23 = vadd.f32 -1.4531521, %v4354_v3  ;;  %v4376_v26 = vadd.f32 1.4214138, %v4368_v12 }
 0xe31   : > { %v4361_v54 = vadd.f32 -1.4531521, %v4353_v14  ;;  %v4375_v31 = vadd.f32 1.4214138, %v4367_v58  ;;  %v4453_v58 = vmul.f32 1.442695, %v4438_v55 }
 0xe32   : > { %v4370_v0 = vmul.f32 %v7926_v8, %v4362_v23  ;;  %v4384_v50 = vmul.f32 %v7911_v56, %v4376_v26  ;;  %v7961_v60 = vpop.eup %6006 }
 0xe33   : > { %v4369_v47 = vmul.f32 %v7931_v51, %v4361_v54  ;;  %v4383_v19 = vmul.f32 %v7917_v39, %v4375_v31  ;;  %v6009_v9 = vpop.eup %6008  ;;  %v4356_v3 = vmul.f32 1.0614054, %v7961_v60  ;;  %6024 = vpow2.f32 %v4453_v58 }
 0xe34   : > { %v4378_v32 = vadd.f32 1.4214138, %v4370_v0  ;;  %v4392_v2 = vadd.f32 -0.28449672, %v4384_v50  ;;  %v4437_v0 = vmul.f32 %v4429_v17, %v7929_v41 }
 0xe35   : > { %v4377_v6 = vadd.f32 1.4214138, %v4369_v47  ;;  %v4391_v35 = vadd.f32 -0.28449672, %v4383_v19  ;;  %v7966_v12 = vpop.eup %6010  ;;  %v4364_v54 = vadd.f32 -1.4531521, %v4356_v3 }
 0xe36   : > { %v4386_v20 = vmul.f32 %v7926_v8, %v4378_v32  ;;  %v4400_v27 = vmul.f32 %v7911_v56, %v4392_v2  ;;  %v6013_v30 = vpop.eup %6012  ;;  %v4358_v24 = vmul.f32 1.0614054, %v7966_v12 }
 0xe37   : > { %v4385_v18 = vmul.f32 %v7931_v51, %v4377_v6  ;;  %v4399_v5 = vmul.f32 %v7917_v39, %v4391_v35  ;;  %v6015_v50 = vpop.eup %6014  ;;  %v4372_v19 = vmul.f32 %v7961_v60, %v4364_v54 }
 0xe38   : > { %v4394_v22 = vadd.f32 -0.28449672, %v4386_v20  ;;  %v4408_v28 = vadd.f32 0.2548296, %v4400_v27  ;;  %v6017_v48 = vpop.eup %6016 }
 0xe39   : > { %v4393_v15 = vadd.f32 -0.28449672, %v4385_v18  ;;  %v4407_v21 = vadd.f32 0.2548296, %v4399_v5  ;;  %v7977_v2 = vpop.eup %6018  ;;  %v4380_v41 = vadd.f32 1.4214138, %v4372_v19 }
 0xe3a   : > { %v4402_v40 = vmul.f32 %v7926_v8, %v4394_v22  ;;  %v4416_v14 = vmul.f32 %v7911_v56, %v4408_v28  ;;  %v4366_v56 = vadd.f32 -1.4531521, %v4358_v24  ;;  %v7981_v27 = vpop.eup %6020  ;;  %v4355_v18 = vmul.f32 1.0614054, %v7977_v2 }
 0xe3b   : > { %v4401_v23 = vmul.f32 %v7931_v51, %v4393_v15  ;;  %v4415_v26 = vmul.f32 %v7917_v39, %v4407_v21  ;;  %v4447_v39 = vmul.f32 1.442695, %v4435_v42  ;;  %v4451_v5 = vmul.f32 1.442695, %v4437_v0 }
 0xe3c   : > { %v4410_v31 = vadd.f32 0.2548296, %v4402_v40  ;;  %v4456_v62 = vmul.f32 %v6009_v9, %v4416_v14  ;;  %v4374_v20 = vmul.f32 %v7966_v12, %v4366_v56  ;;  %v4388_v28 = vmul.f32 %v7961_v60, %v4380_v41  ;;  %v6023_v19 = vpop.eup %6022 }
 0xe3d   : > { %v4409_v44 = vadd.f32 0.2548296, %v4401_v23  ;;  %v4455_v47 = vmul.f32 %v6013_v30, %v4415_v26  ;;  %v4357_v9 = vmul.f32 1.0614054, %v7981_v27  ;;  %v4363_v15 = vadd.f32 -1.4531521, %v4355_v18 }
 0xe3e   : > { %v4418_v37 = vmul.f32 %v7926_v8, %v4410_v31  ;;  %v4464_v32 = vsub.f32 1.0, %v4456_v62  ;;  %v4382_v22 = vadd.f32 1.4214138, %v4374_v20  ;;  %6026 = vpow2.f32 %v4447_v39 }
 0xe3f   : > { %v4417_v6 = vmul.f32 %v7931_v51, %v4409_v44  ;;  %v4463_v35 = vsub.f32 1.0, %v4455_v47  ;;  %v4305_v51 = vsel %vm4297_vm4, 1.0, %v6383_v53  ;;  %v4365_v58 = vadd.f32 -1.4531521, %v4357_v9 }
 0xe40   : > { %v4458_v55 = vmul.f32 %v6015_v50, %v4418_v37  ;;  %v4472_v59 = vmul.f32 %v4464_v32, %v4304_v52  ;;  %v4390_v3 = vmul.f32 %v7966_v12, %v4382_v22  ;;  %v4396_v52 = vadd.f32 -0.28449672, %v4388_v28  ;;  %v6025_v20 = vpop.eup %6024 }
 0xe41   : > { %v4457_v49 = vmul.f32 %v6017_v48, %v4417_v6  ;;  %v4471_v8 = vmul.f32 %v4463_v35, %v4303_v25  ;;  %v4371_v25 = vmul.f32 %v7977_v2, %v4363_v15  ;;  %v4373_v24 = vmul.f32 %v7981_v27, %v4365_v58 }
 0xe42   : > { %v4466_v17 = vsub.f32 1.0, %v4458_v55  ;;  %v4480_v14 = vadd.f32 1.0, %v4472_v59  ;;  %v4398_v23 = vadd.f32 -0.28449672, %v4390_v3  ;;  %v4404_v26 = vmul.f32 %v7961_v60, %v4396_v52 }
 0xe43   : > { %v4465_v21 = vsub.f32 1.0, %v4457_v49  ;;  %v4479_v30 = vadd.f32 1.0, %v4471_v8  ;;  %v4379_v54 = vadd.f32 1.4214138, %v4371_v25  ;;  %6028 = vpow2.f32 %v4451_v5 }
 0xe44   : > { %v4474_v40 = vmul.f32 %v4466_v17, %v4306_v1  ;;  %v4281_v31 = vmul.f32 0.5, %v7871_v33  ;;  %v4406_v0 = vmul.f32 %v7966_v12, %v4398_v23  ;;  %v4412_v1 = vadd.f32 0.2548296, %v4404_v26 }
 0xe45   : > { %v4473_v42 = vmul.f32 %v4465_v21, %v4305_v51  ;;  %v4488_v50 = vmul.f32 %v4480_v14, %v7907_v36  ;;  %v4381_v47 = vadd.f32 1.4214138, %v4373_v24  ;;  %v4387_v56 = vmul.f32 %v7977_v2, %v4379_v54 }
 0xe46   : > { %v4482_v57 = vadd.f32 1.0, %v4474_v40  ;;  %v4487_v48 = vmul.f32 %v4479_v30, %v7909_v38  ;;  %v4414_v32 = vadd.f32 0.2548296, %v4406_v0  ;;  %v4420_v39 = vmul.f32 %v7961_v60, %v4412_v1  ;;  %v5112_v0 = vld [vmem:[%s8353_s6] ss:$0 sm:$0xff] }
 0xe47   : > { %v4481_v62 = vadd.f32 1.0, %v4473_v42  ;;  %v4389_v33 = vmul.f32 %v7981_v27, %v4381_v47  ;;  %v4395_v35 = vadd.f32 -0.28449672, %v4387_v56  ;;  %v4308_v18 = vsel %vm4300_vm5, 1.0, %v6383_v53 }
 0xe48   : > { %v4490_v44 = vmul.f32 %v4482_v57, %v7949_v10  ;;  %v4422_v36 = vmul.f32 %v7966_v12, %v4414_v32  ;;  %v4460_v10 = vmul.f32 %v6023_v19, %v4420_v39  ;;  %v4310_v12 = vsel %vm4302_vm6, 1.0, %v6383_v53 }
 0xe49   : > { %v4489_v37 = vmul.f32 %v4481_v62, %v4281_v31  ;;  %v4397_v55 = vadd.f32 -0.28449672, %v4389_v33  ;;  %v4403_v59 = vmul.f32 %v7977_v2, %v4395_v35  ;;  %v4284_v3 = vmul.f32 0.5, %v7885_v16 }
 0xe4a   : > { %v4496_v6 = vpack.c.bf16 %v4490_v44, %v4488_v50  ;;  %v4462_v38 = vmul.f32 %v6025_v20, %v4422_v36  ;;  %v4468_v60 = vsub.f32 1.0, %v4460_v10  ;;  %v4286_v52 = vmul.f32 0.5, %v7888_v13 }
 0xe4b   : > { %v4495_v41 = vpack.c.bf16 %v4489_v37, %v4487_v48  ;;  %v4405_v5 = vmul.f32 %v7981_v27, %v4397_v55  ;;  %v4411_v49 = vadd.f32 0.2548296, %v4403_v59  ;;  %v6027_v11 = vpop.eup %6026  ;;  %v4283_v16 = vmul.f32 0.5, %v7893_v61 }
 0xe4c   : > { %4666 = vmatprep.mubr.bf16.mxu0 %v4496_v6  ;;  %v4470_v8 = vsub.f32 1.0, %v4462_v38  ;;  %v4476_v22 = vmul.f32 %v4468_v60, %v4308_v18  ;;  %v4285_v13 = vmul.f32 0.5, %v7899_v43 }
 0xe4d   : > { %4667 = vmatmul.mubr.bf16.vlgmr.msra.gmra.mxu0 %v4495_v41  ;;  %v4413_v28 = vadd.f32 0.2548296, %v4405_v5  ;;  %v4419_v17 = vmul.f32 %v7977_v2, %v4411_v49  ;;  %v4307_v2 = vsel %vm4299_vm7, 1.0, %v6383_v53 }
 0xe4e   : > { %v4478_v51 = vmul.f32 %v4470_v8, %v4310_v12  ;;  %v4484_v9 = vadd.f32 1.0, %v4476_v22 }
 0xe4f   : > { %v4421_v4 = vmul.f32 %v7981_v27, %v4413_v28  ;;  %v4459_v15 = vmul.f32 %v6027_v11, %v4419_v17  ;;  %v4309_v27 = vsel %vm4301_vm8, 1.0, %v6383_v53 }
 0xe50   : > { %v6029_v21 = vpop.eup %6028  ;;  %v4486_v40 = vadd.f32 1.0, %v4478_v51  ;;  %v4492_v25 = vmul.f32 %v4484_v9, %v4284_v3 }
 0xe51   : > { %v4461_v14 = vmul.f32 %v6029_v21, %v4421_v4  ;;  %v4467_v58 = vsub.f32 1.0, %v4459_v15 }
 0xe52   : > { %v4494_v42 = vmul.f32 %v4486_v40, %v4286_v52 }
 0xe53   : > { %v4469_v30 = vsub.f32 1.0, %v4461_v14  ;;  %v4475_v23 = vmul.f32 %v4467_v58, %v4307_v2 }
 0xe54   : > { %v4498_v46 = vpack.c.bf16 %v4494_v42, %v4492_v25 }
 0xe55   : > { %v4477_v26 = vmul.f32 %v4469_v30, %v4309_v27  ;;  %v4483_v57 = vadd.f32 1.0, %v4475_v23 }
 0xe56   : > { %4674 = vmatprep.mubr.bf16.mxu0 %v4498_v46 }
 0xe57   : > { %v4485_v7 = vadd.f32 1.0, %v4477_v26  ;;  %v4491_v24 = vmul.f32 %v4483_v57, %v4283_v16 }
 0xe59   : > { %v4493_v54 = vmul.f32 %v4485_v7, %v4285_v13 }
 0xe5b   : > { %v4497_v31 = vpack.c.bf16 %v4493_v54, %v4491_v24 }
 0xe5d   : > { %4675 = vmatmul.mubr.bf16.gmra.mxu0 %v4497_v31 }
 0xf0d   : > { %v5256_v62 = vpop.f32.mrf.mxu0 }
 0xf0f   : > { %v5257_v53 = vpop.f32.mrf.mxu0 }
 0xf10   : > { %v5258_v1 = vadd.f32 %v5257_v53, %v5256_v62 }
 0xf11   : > { %v5259_v50 = vpop.f32.mrf.mxu0 }
 0xf12   : > { %v4669_v44 = vadd.f32 %v5258_v1, %v5112_v0 }
 0xf13   : > { %v5260_v61 = vpop.f32.mrf.mxu0 }
 0xf14   : > { %v4683_v47 = vadd.f32 %v4669_v44, %v7795_v34  ;;  %v5261_v43 = vadd.f32 %v5260_v61, %v5259_v50 }
 0xf16   : > { %4687 = vst [vmem:[%s6731_s11] sm:$0xff] %v4683_v47  ;;  %v4672_v56 = vadd.f32 %v5261_v43, %v5112_v0 }
 0xf18   : > { %v4684_v19 = vadd.f32 %v4672_v56, %v7798_v63 }
 0xf1a   : > { %4688 = vst [vmem:[%s6731_s11 + $0x8] sm:$0xff] %v4684_v19 }
 0xf1d   : > { %v5262_v48 = vpop.f32.mrf.mxu0 }
 0xf1f   : > { %v5263_v37 = vpop.f32.mrf.mxu0 }
 0xf20   : > { %v5264_v32 = vadd.f32 %v5263_v37, %v5262_v48 }
 0xf21   : > { %v5265_v39 = vpop.f32.mrf.mxu0 }
 0xf22   : > { %v4677_v6 = vadd.f32 %v5264_v32, %v5112_v0 }
 0xf23   : > { %v5266_v33 = vpop.f32.mrf.mxu0 }
 0xf24   : > { %v4685_v35 = vadd.f32 %v4677_v6, %v7806_v45  ;;  %v5267_v20 = vadd.f32 %v5266_v33, %v5265_v39 }
 0xf26   : > { %4689 = vst [vmem:[%s6731_s11 + $0x10] sm:$0xff] %v4685_v35  ;;  %v4680_v41 = vadd.f32 %v5267_v20, %v5112_v0 }
 0xf28   : > { %v4686_v34 = vadd.f32 %v4680_v41, %v7809_v29 }
 0xf2a   : > { %4690 = vst [vmem:[%s6731_s11 + $0x18] sm:$0xff] %v4686_v34 }
 0xf2b PF: > { %s8354_s26 = sld [smem:[#allocation32_spill]]  ;;  %s4710_s21 = sshll.u32 %s6731_s11, 4  ;;  %s8036_s21 = int_to_ptr.vmem [resolvable:$true] %s4710_s21 }
 0xf2c   : > { %s8355_s13 = sld [smem:[#allocation35_spill]]  ;;  %s4692_s12 = scalar_lea.sflag [#allocation9], %s6699_s3 }
 0xf2d   : > { %s8356_s19 = sld [smem:[#allocation78_spill]]  ;;  %s6190_s2 = scalar_lea.vmem %s8036_s21, 512 }
 0xf2e   : > { %p6191_p2 = scmp.ne.s32.totalorder %s8036_s21, %s6190_s2  ;;  %s6384_s10 = smov [#allocation18]  }
 0xf2f   : > { %s6194_s24 = sshll.u32 %s6384_s10, 4  ;;  %s6195_s24 = int_to_ptr.vmem [resolvable:$false] %s6194_s24 }
 0xf30   : > { %s6196_s22 = scalar_lea.vmem %s6195_s24, 1024  ;;  %p6197_p3 = scmp.lt.s32.totalorder %s8036_s21, %s6195_s24 }
 0xf31   : > { %s5143_s8 = sshll.u32 %s8354_s26, 9  ;;  %p6198_p11 = scmp.lt.s32.totalorder %s6196_s22, %s6190_s2 }
 0xf32   : > { %p8357_p8 = scmp.ne.s32.totalorder %s8355_s13, 0 }
 0xf33   : > { %s8033_s20 = scalar_lea.hbm %s8356_s19, %s5143_s8  ;;  %p6199_p6 = por %p6198_p11, %p6197_p3 }
 0xf34   : > { %p6192_p4 = pnand %p6191_p2, %p8357_p8 }
 0xf36   : > { %p6193_p7 = pneg %p6192_p4 }
 0xf38   : > { %p6200_p9 = pnand %p6199_p6, %p6193_p7 }
 0xf3a   : > { %6203 = shalt.err (!%p6200_p9)
}
 0xf3b   : > { %s6204_s11 = scalar_lea.hbm %s8033_s20, 512  ;;  %s6208_s14 = scalar_lea.hbm %s8356_s19, 1024 }
 0xf3c   : > { %p6205_p12 = scmp.ne.s32.totalorder %s8033_s20, %s6204_s11  ;;  %p6209_p10 = scmp.lt.s32.totalorder %s8033_s20, %s8356_s19 }
 0xf3d   : > { %p6210_p5 = scmp.lt.s32.totalorder %s6208_s14, %s6204_s11 }
 0xf3e   : > { %p6206_p13 = pnand %p6205_p12, %p8357_p8 }
 0xf3f   : > { %p6211_p1 = por %p6210_p5, %p6209_p10 }
 0xf40   : > { %p6207_p0 = pneg %p6206_p13 }
 0xf42   : > { %p6212_p2 = pnand %p6211_p1, %p6207_p0 }
 0xf44   : > { %6215 = shalt.err (!%p6212_p2)
}
 0xf45   : > { %s6385_s8 = smov 128   ;;  %s8358_s25 = sld [smem:[#allocation31_spill]] }
 0xf46   : > { %s8359_s15 = sld [smem:[#allocation29_spill]]  ;;  %s6386_s10 = smov 8  }
 0xf47   : > { %s8360_s2 = sld [smem:[#allocation39_spill]]  ;;  %s5134_s22 = sshll.u32 %s8354_s26, 3 }
 0xf48   : > { %5448 = dma.vmem_to_hbm [thread:$0]  (%p8357_p8), %s8036_s21, 512, %s8033_s20, %s4692_s12, %s6385_s8, %s6385_s8, %s6386_s10  }
 0xf49   : > { %s4728_s7 = sshll.u32 %s6733_s23, 4  ;;  %s8361_s6 = sld [smem:[#allocation79_spill]]  ;;  %s8067_s7 = int_to_ptr.vmem [resolvable:$true] %s4728_s7 }
 0xf4a   : > { %s6216_s19 = scalar_lea.vmem %s8067_s7, 512  ;;  %s6387_s3 = smov [#allocation19]  }
 0xf4b   : > { %s5133_s24 = sshll.u32 %s8358_s25, 2  ;;  %p6217_p4 = scmp.ne.s32.totalorder %s8067_s7, %s6216_s19 }
 0xf4c   : > { %s4725_s11 = sadd.s32 %s5134_s22, %s5133_s24  ;;  %s8362_s13 = sand.u32 1, %s8359_s15  }
 0xf4d   : > { %s5135_s0 = sshll.u32 %s4725_s11, 7  ;;  %s4697_s1 = scalar_lea.sflag [#allocation20], %s8362_s13 }
 0xf4e   : > { %p8363_p8 = scmp.ne.s32.totalorder %s8360_s2, 0  ;;  %s6220_s23 = sshll.u32 %s6387_s3, 4  ;;  %s6221_s23 = int_to_ptr.vmem [resolvable:$false] %s6220_s23 }
 0xf4f   : > { %s8072_s9 = scalar_lea.hbm %s8361_s6, %s5135_s0  ;;  %s6222_s26 = scalar_lea.vmem %s6221_s23, 1024 }
 0xf50   : > { %p6218_p7 = pnand %p6217_p4, %p8363_p8  ;;  %p6223_p11 = scmp.lt.s32.totalorder %s8067_s7, %s6221_s23 }
 0xf51   : > { %p6224_p6 = scmp.lt.s32.totalorder %s6222_s26, %s6216_s19 }
 0xf52   : > { %p6219_p3 = pneg %p6218_p7 }
 0xf53   : > { %p6225_p9 = por %p6224_p6, %p6223_p11 }
 0xf55   : > { %p6226_p12 = pnand %p6225_p9, %p6219_p3 }
 0xf57   : > { %6229 = shalt.err (!%p6226_p12)
}
 0xf58   : > { %s6230_s20 = scalar_lea.hbm %s8072_s9, 512  ;;  %s6234_s25 = scalar_lea.hbm %s8361_s6, 2048 }
 0xf59   : > { %p6231_p13 = scmp.ne.s32.totalorder %s8072_s9, %s6230_s20  ;;  %p6235_p5 = scmp.lt.s32.totalorder %s8072_s9, %s8361_s6 }
 0xf5a   : > { %p6236_p1 = scmp.lt.s32.totalorder %s6234_s25, %s6230_s20 }
 0xf5b   : > { %p6232_p0 = pnand %p6231_p13, %p8363_p8 }
 0xf5c   : > { %p6237_p2 = por %p6236_p1, %p6235_p5 }
 0xf5d   : > { %p6233_p10 = pneg %p6232_p0 }
 0xf5f   : > { %p6238_p4 = pnand %p6237_p2, %p6233_p10 }
 0xf61   : > { %6241 = shalt.err (!%p6238_p4)
}
 0xf62   : > { %5449 = dma.vmem_to_hbm [thread:$0]  (%p8363_p8), %s8067_s7, 512, %s8072_s9, %s4697_s1, %s6385_s8, %s6385_s8, %s6386_s10  }
 0xf63 PF: > { %s8364_s19 = sld [smem:[#allocation30_spill]]  ;;  %p5488_p7 = scmp.ge.s32.totalorder %s6356_s18, 2 }
 0xf64   : > { %s8365_s22 = sld [smem:[#allocation36_spill]] }
 0xf69   : > { %s4743_s11 = sand.u32 1, %s8364_s19  }
 0xf6a   : > { %p8366_p3 = scmp.ne.s32.totalorder %s8365_s22, 0  ;;  %s4744_s0 = scalar_lea.sflag [#allocation9], %s4743_s11 }
 0xf6c   : > { %p5473_p11 = pnand %p5488_p7, %p8366_p3 }
 0xf6e   : > { %p5474_p6 = pneg %p5473_p11 }
 0xf70   : > { %6307 = dma.done.wait (%p5474_p6), %s4744_s0, 512  }
 0xf71   : > { %6309 = vsyncadd (%p5474_p6), %s4744_s0, 4294966784  ;;  %s8367_s14 = sld [smem:[#allocation28_spill]] }
 0xf72   : > { %s8368_s2 = sld [smem:[#allocation37_spill]] }
 0xf77   : > { %s4752_s28 = sand.u32 1, %s8367_s14  }
 0xf78   : > { %p8369_p9 = scmp.ne.s32.totalorder %s8368_s2, 0  ;;  %s4753_s13 = scalar_lea.sflag [#allocation20], %s4752_s28 }
 0xf7a   : > { %p5476_p12 = pnand %p5488_p7, %p8369_p9 }
 0xf7c   : > { %p5477_p13 = pneg %p5476_p12 }
 0xf7e   : > { %6311 = dma.done.wait (%p5477_p13), %s4753_s13, 512  }
 0xf7f   : > { %6313 = vsyncadd (%p5477_p13), %s4753_s13, 4294966784  ;;  %s38_s18 = sadd.s32 1, %s6356_s18   ;;  %s8370_s25 = sld [smem:[#allocation29_spill]] }
 0xf80   : > { %p35_p8 = scmp.ge.s32.totalorder %s38_s18, 6   ;;  %s8371_s1 = sld [smem:[#allocation38_spill]] }
 0xf81   : > { %s8372_s9 = sld [smem:[#allocation40_spill]]  ;;  %s8373_s26 = smov %s6324_s27 }
 0xf82   : > { %s8374_s27 = smov %s6676_s4  ;;  %s8375_s28 = smov %s6332_s29 }
 0xf83   : > { %s8376_s29 = smov %s6336_s30  ;;  %s8377_s30 = smov %s6673_s5 }
 0xf84   : > { %s8378_s14 = smov %s6348_s16  ;;  %s8379_s15 = smov %s6352_s17 }
 0xf85   :  { %37 = sbr.rel (!%p35_p8) target bundleno = 30 (0x1e), region = 167 }
 0xf86   : > { %s8380_s16 = smov %s8371_s1 }
 0xf87   : > { %s8381_s17 = smov %s8372_s9 }
 0xf8a   :  { %4758 = vsyncpa [#allocation8], 1 }
 0xf8b   :  { %4760 = vsyncpa [#allocation8 + $0x1], 1 }
 0xf8c   :  { %4761 = vsyncpa [#allocation11], 1 }
 0xf8d   :  { %4763 = vsyncpa [#allocation11 + $0x1], 1 }
 0xf8e   :  { %4764 = vsyncpa [#allocation14], 1 }
 0xf8f   :  { %4765 = vsyncpa [#allocation17], 1 }
 0xf90   :  { %4766 = vsyncpa [#allocation9], 1 }
 0xf91   :  { %4768 = vsyncpa [#allocation9 + $0x1], 1 }
 0xf92   :  { %4769 = vsyncpa [#allocation20], 1 }
 0xf93   :  { %4771 = vsyncpa [#allocation20 + $0x1], 1 }

</bundles_post_ra>
